<compile_context>
chip_gen: v6e
topology: v6e:2x2x1
jax: 0.10.0
libtpu: 0.0.40
codegen_flags: <defaults>
</compile_context>

<pallas_src>
import functools

import jax
import jax.numpy as jnp
from jax import lax
from jax.experimental import pallas as pl
from jax.experimental.pallas import tpu as pltpu


def _order_embedding_kernel(idx_ref,      # VMEM (TILE_M, 1) int32  indices for this block
                            nr_g_ref,     # VMEM (TILE_M, 1) f32    norm_range[idx] for this block
                            nr_all_ref,   # VMEM (1, N) f32         full norm_range (resident)
                            ord_ref,      # VMEM (1, D) f32         order_embedding (resident)
                            gamma_ref,    # VMEM (1, D) f32         BN weight (resident)
                            beta_ref,     # VMEM (1, D) f32         BN bias (resident)
                            cls_ref,      # VMEM (N, D)             class_embedding table (resident)
                            out_ref,      # VMEM (TILE_M, D)        output block
                            *, eps):
    # ---- index-invariant BN math: once per block, amortized over TILE_M rows ----
    o = jnp.maximum(ord_ref[...], 0.0)                            # relu(order_embedding), (1, D)
    nr_all = nr_all_ref[...]                                      # (1, N)
    mu = jnp.mean(nr_all, axis=-1, keepdims=True)                 # (1, 1)
    var = jnp.mean((nr_all - mu) ** 2, axis=-1, keepdims=True)    # (1, 1) biased, as torch BN train
    # order_embed is rank-1 (nr outer relu(o)) so BN stats factor exactly:
    #   mean_d = mu * o_d,   var_d = var * o_d^2
    inv_std = lax.rsqrt(var * (o * o) + eps)                      # (1, D), EUP
    a_vec = o * inv_std * gamma_ref[...]                          # (1, D)
    b_vec = beta_ref[...] - mu * a_vec                            # (1, D)

    # ---- per-row work:  out = class_embedding[idx] + nr[idx] * A + B ----
    res = nr_g_ref[...] * a_vec + b_vec                           # (TILE_M, D), VPU

    # Row gather from the VMEM-resident class table: vectorized select-sweep over
    # the N table rows (pure VPU, no per-row DMA, no MXU work).
    idx_f = idx_ref[...]                                          # (TILE_M, 1) int32
    n_rows = cls_ref.shape[0]
    for n in range(n_rows):                                       # static, N is small
        row = cls_ref[pl.ds(n, 1), :]                             # (1, D)
        sel = (idx_f == n).astype(res.dtype)                      # (TILE_M, 1) one-hot column
        res = res + sel * row                                     # broadcast mul + add

    out_ref[...] = res.astype(out_ref.dtype)


def order_embedding_forward(index_tensor, class_embedding, norm_range,
                            order_embedding, bn_weight, bn_bias,
                            eps=1e-5, tile_m=128):
    """index_tensor: int array of any shape -> output index_tensor.shape + (D,)."""
    N, D = class_embedding.shape
    idx = index_tensor.reshape(-1).astype(jnp.int32)              # (M,)
    M = idx.shape[0]

    # Pad M up to a multiple of TILE_M (pad rows use index 0, sliced off at the end).
    m_pad = pl.cdiv(M, tile_m) * tile_m
    idx_p = jnp.zeros((m_pad,), jnp.int32).at[:M].set(idx)

    # Gather the scalar norm_range values in the wrapper (trivial XLA gather) so the
    # kernel never does per-row scalar SMEM loads.
    nr_flat = norm_range.reshape(N).astype(jnp.float32)
    nr_g = nr_flat[idx_p].reshape(m_pad, 1)

    idx2 = idx_p.reshape(m_pad, 1)
    nr_all = norm_range.reshape(1, N).astype(jnp.float32)
    ord2 = order_embedding.reshape(1, D).astype(jnp.float32)
    g2 = bn_weight.reshape(1, D).astype(jnp.float32)
    b2 = bn_bias.reshape(1, D).astype(jnp.float32)
    cls2 = class_embedding                                        # (N, D), resident table

    grid_spec = pltpu.PrefetchScalarGridSpec(
        num_scalar_prefetch=0,
        grid=(m_pad // tile_m,),
        in_specs=[
            pl.BlockSpec((tile_m, 1), lambda i: (i, 0)),          # idx block
            pl.BlockSpec((tile_m, 1), lambda i: (i, 0)),          # norm_range[idx] block
            pl.BlockSpec((1, N), lambda i: (0, 0)),               # full norm_range (resident)
            pl.BlockSpec((1, D), lambda i: (0, 0)),               # order_embedding (resident)
            pl.BlockSpec((1, D), lambda i: (0, 0)),               # BN gamma (resident)
            pl.BlockSpec((1, D), lambda i: (0, 0)),               # BN beta (resident)
            pl.BlockSpec((N, D), lambda i: (0, 0)),               # class_embedding table (resident)
        ],
        out_specs=pl.BlockSpec((tile_m, D), lambda i: (i, 0)),    # lane-dense output slab
    )

    out = pl.pallas_call(
        functools.partial(_order_embedding_kernel, eps=eps),
        out_shape=jax.ShapeDtypeStruct((m_pad, D), class_embedding.dtype),
        grid_spec=grid_spec,
        compiler_params=pltpu.CompilerParams(
            dimension_semantics=("parallel",)),
    )(idx2, nr_g, nr_all, ord2, g2, b2, cls2)

    return out[:M].reshape(index_tensor.shape + (D,))


if __name__ == "__main__":
    key = jax.random.PRNGKey(0)
    N, D = 16, 128                       # num_embeddings, embedding_dim (lane-width)
    k1, k2, k3 = jax.random.split(key, 3)

    # Parameters mirroring the PyTorch module's init
    std_cls = (2.0 / (N + D)) ** 0.5     # xavier_normal_
    class_embedding = std_cls * jax.random.normal(k1, (N, D), jnp.float32)
    norm_range = jnp.linspace(-1.0, 1.0, N, dtype=jnp.float32).reshape(N, 1)
    std_ord = (2.0 / (1 + D)) ** 0.5     # xavier_normal_ on (1, D)
    order_embedding = std_ord * jax.random.normal(k2, (1, D), jnp.float32)
    bn_weight = jnp.ones((D,), jnp.float32)    # BatchNorm1d gamma init
    bn_bias = jnp.zeros((D,), jnp.float32)     # BatchNorm1d beta init

    index_tensor = jax.random.randint(k3, (2, 8), 0, N, dtype=jnp.int32)

    out = order_embedding_forward(index_tensor, class_embedding, norm_range,
                                  order_embedding, bn_weight, bn_bias)
    out = jax.block_until_ready(out)

    # Pure-JAX reference of the same forward math
    eps = 1e-5
    o = jnp.maximum(order_embedding, 0.0)
    order_embed = norm_range @ o                          # (N, D)
    mu = order_embed.mean(axis=0)
    var = ((order_embed - mu) ** 2).mean(axis=0)          # biased, like torch BN train mode
    bn = (order_embed - mu) / jnp.sqrt(var + eps) * bn_weight + bn_bias
    edge = class_embedding + bn
    ref = edge[index_tensor]                              # (2, 8, D)

    assert out.shape == index_tensor.shape + (D,)
    assert jnp.allclose(out, ref, atol=1e-4, rtol=1e-4), \
        float(jnp.max(jnp.abs(out - ref)))

    print("KERNEL_OK")
</pallas_src>

<mosaic_0001>
module attributes {stable_mosaic.version = 11 : i64} {
  func.func @_order_embedding_kernel(%arg0: i32, %arg1: memref<128x1xi32, #tpu.memory_space<vmem>>, %arg2: memref<128x1xf32, #tpu.memory_space<vmem>>, %arg3: memref<1x16xf32, #tpu.memory_space<vmem>>, %arg4: memref<1x128xf32, #tpu.memory_space<vmem>>, %arg5: memref<1x128xf32, #tpu.memory_space<vmem>>, %arg6: memref<1x128xf32, #tpu.memory_space<vmem>>, %arg7: memref<16x128xf32, #tpu.memory_space<vmem>>, %arg8: memref<128x128xf32, #tpu.memory_space<vmem>>) attributes {dimension_semantics = [#tpu.dimension_semantics<parallel>], iteration_bounds = array<i64: 1>, scalar_prefetch = 0 : i64, scratch_operands = 0 : i64, tpu.core_type = #tpu.core_type<tc>, window_params = [{transform_indices = @transform_0, window_bounds = array<i64: 128, 1>}, {transform_indices = @transform_1, window_bounds = array<i64: 128, 1>}, {pipeline_mode = #tpu.pipeline_mode<synchronous>, transform_indices = @transform_2, window_bounds = array<i64: 1, 16>}, {pipeline_mode = #tpu.pipeline_mode<synchronous>, transform_indices = @transform_3, window_bounds = array<i64: 1, 128>}, {pipeline_mode = #tpu.pipeline_mode<synchronous>, transform_indices = @transform_4, window_bounds = array<i64: 1, 128>}, {pipeline_mode = #tpu.pipeline_mode<synchronous>, transform_indices = @transform_5, window_bounds = array<i64: 1, 128>}, {pipeline_mode = #tpu.pipeline_mode<synchronous>, transform_indices = @transform_6, window_bounds = array<i64: 16, 128>}, {transform_indices = @transform_7, window_bounds = array<i64: 128, 128>}]} {
    %c0 = arith.constant 0 : index
    %c0_0 = arith.constant 0 : index
    %0 = vector.load %arg4[%c0, %c0_0] : memref<1x128xf32, #tpu.memory_space<vmem>>, vector<1x128xf32>
    %cst = arith.constant 0.000000e+00 : f32
    %1 = vector.broadcast %cst : f32 to vector<1x128xf32>
    %2 = arith.maximumf %0, %1 : vector<1x128xf32>
    %c0_1 = arith.constant 0 : index
    %c0_2 = arith.constant 0 : index
    %3 = vector.load %arg3[%c0_1, %c0_2] : memref<1x16xf32, #tpu.memory_space<vmem>>, vector<1x16xf32>
    %cst_3 = arith.constant dense<0.000000e+00> : vector<1xf32>
    %4 = vector.multi_reduction <add>, %3, %cst_3 [1] : vector<1x16xf32> to vector<1xf32>
    %5 = vector.shape_cast %4 : vector<1xf32> to vector<1x1xf32>
    %cst_4 = arith.constant 1.600000e+01 : f32
    %6 = vector.broadcast %cst_4 : f32 to vector<1x1xf32>
    %7 = arith.divf %5, %6 : vector<1x1xf32>
    %8 = vector.broadcast %7 : vector<1x1xf32> to vector<1x16xf32>
    %9 = arith.subf %3, %8 : vector<1x16xf32>
    %10 = arith.mulf %9, %9 : vector<1x16xf32>
    %cst_5 = arith.constant dense<0.000000e+00> : vector<1xf32>
    %11 = vector.multi_reduction <add>, %10, %cst_5 [1] : vector<1x16xf32> to vector<1xf32>
    %12 = vector.shape_cast %11 : vector<1xf32> to vector<1x1xf32>
    %cst_6 = arith.constant 1.600000e+01 : f32
    %13 = vector.broadcast %cst_6 : f32 to vector<1x1xf32>
    %14 = arith.divf %12, %13 : vector<1x1xf32>
    %15 = arith.mulf %2, %2 : vector<1x128xf32>
    %16 = vector.broadcast %14 : vector<1x1xf32> to vector<1x128xf32>
    %17 = arith.mulf %16, %15 : vector<1x128xf32>
    %cst_7 = arith.constant 9.99999974E-6 : f32
    %18 = vector.broadcast %cst_7 : f32 to vector<1x128xf32>
    %19 = arith.addf %17, %18 : vector<1x128xf32>
    %20 = math.rsqrt %19 : vector<1x128xf32>
    %21 = arith.mulf %2, %20 : vector<1x128xf32>
    %c0_8 = arith.constant 0 : index
    %c0_9 = arith.constant 0 : index
    %22 = vector.load %arg5[%c0_8, %c0_9] : memref<1x128xf32, #tpu.memory_space<vmem>>, vector<1x128xf32>
    %23 = arith.mulf %21, %22 : vector<1x128xf32>
    %c0_10 = arith.constant 0 : index
    %c0_11 = arith.constant 0 : index
    %24 = vector.load %arg6[%c0_10, %c0_11] : memref<1x128xf32, #tpu.memory_space<vmem>>, vector<1x128xf32>
    %25 = vector.broadcast %7 : vector<1x1xf32> to vector<1x128xf32>
    %26 = arith.mulf %25, %23 : vector<1x128xf32>
    %27 = arith.subf %24, %26 : vector<1x128xf32>
    %c0_12 = arith.constant 0 : index
    %c0_13 = arith.constant 0 : index
    %28 = vector.load %arg2[%c0_12, %c0_13] : memref<128x1xf32, #tpu.memory_space<vmem>>, vector<128x1xf32>
    %29 = vector.broadcast %28 : vector<128x1xf32> to vector<128x128xf32>
    %30 = vector.broadcast %23 : vector<1x128xf32> to vector<128x128xf32>
    %31 = arith.mulf %29, %30 : vector<128x128xf32>
    %32 = vector.broadcast %27 : vector<1x128xf32> to vector<128x128xf32>
    %33 = arith.addf %31, %32 : vector<128x128xf32>
    %c0_14 = arith.constant 0 : index
    %c0_15 = arith.constant 0 : index
    %34 = vector.load %arg1[%c0_14, %c0_15] : memref<128x1xi32, #tpu.memory_space<vmem>>, vector<128x1xi32>
    %c0_16 = arith.constant 0 : index
    %c0_17 = arith.constant 0 : index
    %35 = vector.load %arg7[%c0_16, %c0_17] : memref<16x128xf32, #tpu.memory_space<vmem>>, vector<1x128xf32>
    %c0_i32 = arith.constant 0 : i32
    %36 = vector.broadcast %c0_i32 : i32 to vector<128x1xi32>
    %37 = arith.cmpi eq, %34, %36 : vector<128x1xi32>
    %38 = arith.extui %37 : vector<128x1xi1> to vector<128x1xi32>
    %39 = arith.sitofp %38 : vector<128x1xi32> to vector<128x1xf32>
    %40 = vector.broadcast %39 : vector<128x1xf32> to vector<128x128xf32>
    %41 = vector.broadcast %35 : vector<1x128xf32> to vector<128x128xf32>
    %42 = arith.mulf %40, %41 : vector<128x128xf32>
    %43 = arith.addf %33, %42 : vector<128x128xf32>
    %c1 = arith.constant 1 : index
    %c0_18 = arith.constant 0 : index
    %44 = vector.load %arg7[%c1, %c0_18] : memref<16x128xf32, #tpu.memory_space<vmem>>, vector<1x128xf32>
    %c1_i32 = arith.constant 1 : i32
    %45 = vector.broadcast %c1_i32 : i32 to vector<128x1xi32>
    %46 = arith.cmpi eq, %34, %45 : vector<128x1xi32>
    %47 = arith.extui %46 : vector<128x1xi1> to vector<128x1xi32>
    %48 = arith.sitofp %47 : vector<128x1xi32> to vector<128x1xf32>
    %49 = vector.broadcast %48 : vector<128x1xf32> to vector<128x128xf32>
    %50 = vector.broadcast %44 : vector<1x128xf32> to vector<128x128xf32>
    %51 = arith.mulf %49, %50 : vector<128x128xf32>
    %52 = arith.addf %43, %51 : vector<128x128xf32>
    %c2 = arith.constant 2 : index
    %c0_19 = arith.constant 0 : index
    %53 = vector.load %arg7[%c2, %c0_19] : memref<16x128xf32, #tpu.memory_space<vmem>>, vector<1x128xf32>
    %c2_i32 = arith.constant 2 : i32
    %54 = vector.broadcast %c2_i32 : i32 to vector<128x1xi32>
    %55 = arith.cmpi eq, %34, %54 : vector<128x1xi32>
    %56 = arith.extui %55 : vector<128x1xi1> to vector<128x1xi32>
    %57 = arith.sitofp %56 : vector<128x1xi32> to vector<128x1xf32>
    %58 = vector.broadcast %57 : vector<128x1xf32> to vector<128x128xf32>
    %59 = vector.broadcast %53 : vector<1x128xf32> to vector<128x128xf32>
    %60 = arith.mulf %58, %59 : vector<128x128xf32>
    %61 = arith.addf %52, %60 : vector<128x128xf32>
    %c3 = arith.constant 3 : index
    %c0_20 = arith.constant 0 : index
    %62 = vector.load %arg7[%c3, %c0_20] : memref<16x128xf32, #tpu.memory_space<vmem>>, vector<1x128xf32>
    %c3_i32 = arith.constant 3 : i32
    %63 = vector.broadcast %c3_i32 : i32 to vector<128x1xi32>
    %64 = arith.cmpi eq, %34, %63 : vector<128x1xi32>
    %65 = arith.extui %64 : vector<128x1xi1> to vector<128x1xi32>
    %66 = arith.sitofp %65 : vector<128x1xi32> to vector<128x1xf32>
    %67 = vector.broadcast %66 : vector<128x1xf32> to vector<128x128xf32>
    %68 = vector.broadcast %62 : vector<1x128xf32> to vector<128x128xf32>
    %69 = arith.mulf %67, %68 : vector<128x128xf32>
    %70 = arith.addf %61, %69 : vector<128x128xf32>
    %c4 = arith.constant 4 : index
    %c0_21 = arith.constant 0 : index
    %71 = vector.load %arg7[%c4, %c0_21] : memref<16x128xf32, #tpu.memory_space<vmem>>, vector<1x128xf32>
    %c4_i32 = arith.constant 4 : i32
    %72 = vector.broadcast %c4_i32 : i32 to vector<128x1xi32>
    %73 = arith.cmpi eq, %34, %72 : vector<128x1xi32>
    %74 = arith.extui %73 : vector<128x1xi1> to vector<128x1xi32>
    %75 = arith.sitofp %74 : vector<128x1xi32> to vector<128x1xf32>
    %76 = vector.broadcast %75 : vector<128x1xf32> to vector<128x128xf32>
    %77 = vector.broadcast %71 : vector<1x128xf32> to vector<128x128xf32>
    %78 = arith.mulf %76, %77 : vector<128x128xf32>
    %79 = arith.addf %70, %78 : vector<128x128xf32>
    %c5 = arith.constant 5 : index
    %c0_22 = arith.constant 0 : index
    %80 = vector.load %arg7[%c5, %c0_22] : memref<16x128xf32, #tpu.memory_space<vmem>>, vector<1x128xf32>
    %c5_i32 = arith.constant 5 : i32
    %81 = vector.broadcast %c5_i32 : i32 to vector<128x1xi32>
    %82 = arith.cmpi eq, %34, %81 : vector<128x1xi32>
    %83 = arith.extui %82 : vector<128x1xi1> to vector<128x1xi32>
    %84 = arith.sitofp %83 : vector<128x1xi32> to vector<128x1xf32>
    %85 = vector.broadcast %84 : vector<128x1xf32> to vector<128x128xf32>
    %86 = vector.broadcast %80 : vector<1x128xf32> to vector<128x128xf32>
    %87 = arith.mulf %85, %86 : vector<128x128xf32>
    %88 = arith.addf %79, %87 : vector<128x128xf32>
    %c6 = arith.constant 6 : index
    %c0_23 = arith.constant 0 : index
    %89 = vector.load %arg7[%c6, %c0_23] : memref<16x128xf32, #tpu.memory_space<vmem>>, vector<1x128xf32>
    %c6_i32 = arith.constant 6 : i32
    %90 = vector.broadcast %c6_i32 : i32 to vector<128x1xi32>
    %91 = arith.cmpi eq, %34, %90 : vector<128x1xi32>
    %92 = arith.extui %91 : vector<128x1xi1> to vector<128x1xi32>
    %93 = arith.sitofp %92 : vector<128x1xi32> to vector<128x1xf32>
    %94 = vector.broadcast %93 : vector<128x1xf32> to vector<128x128xf32>
    %95 = vector.broadcast %89 : vector<1x128xf32> to vector<128x128xf32>
    %96 = arith.mulf %94, %95 : vector<128x128xf32>
    %97 = arith.addf %88, %96 : vector<128x128xf32>
    %c7 = arith.constant 7 : index
    %c0_24 = arith.constant 0 : index
    %98 = vector.load %arg7[%c7, %c0_24] : memref<16x128xf32, #tpu.memory_space<vmem>>, vector<1x128xf32>
    %c7_i32 = arith.constant 7 : i32
    %99 = vector.broadcast %c7_i32 : i32 to vector<128x1xi32>
    %100 = arith.cmpi eq, %34, %99 : vector<128x1xi32>
    %101 = arith.extui %100 : vector<128x1xi1> to vector<128x1xi32>
    %102 = arith.sitofp %101 : vector<128x1xi32> to vector<128x1xf32>
    %103 = vector.broadcast %102 : vector<128x1xf32> to vector<128x128xf32>
    %104 = vector.broadcast %98 : vector<1x128xf32> to vector<128x128xf32>
    %105 = arith.mulf %103, %104 : vector<128x128xf32>
    %106 = arith.addf %97, %105 : vector<128x128xf32>
    %c8 = arith.constant 8 : index
    %c0_25 = arith.constant 0 : index
    %107 = vector.load %arg7[%c8, %c0_25] : memref<16x128xf32, #tpu.memory_space<vmem>>, vector<1x128xf32>
    %c8_i32 = arith.constant 8 : i32
    %108 = vector.broadcast %c8_i32 : i32 to vector<128x1xi32>
    %109 = arith.cmpi eq, %34, %108 : vector<128x1xi32>
    %110 = arith.extui %109 : vector<128x1xi1> to vector<128x1xi32>
    %111 = arith.sitofp %110 : vector<128x1xi32> to vector<128x1xf32>
    %112 = vector.broadcast %111 : vector<128x1xf32> to vector<128x128xf32>
    %113 = vector.broadcast %107 : vector<1x128xf32> to vector<128x128xf32>
    %114 = arith.mulf %112, %113 : vector<128x128xf32>
    %115 = arith.addf %106, %114 : vector<128x128xf32>
    %c9 = arith.constant 9 : index
    %c0_26 = arith.constant 0 : index
    %116 = vector.load %arg7[%c9, %c0_26] : memref<16x128xf32, #tpu.memory_space<vmem>>, vector<1x128xf32>
    %c9_i32 = arith.constant 9 : i32
    %117 = vector.broadcast %c9_i32 : i32 to vector<128x1xi32>
    %118 = arith.cmpi eq, %34, %117 : vector<128x1xi32>
    %119 = arith.extui %118 : vector<128x1xi1> to vector<128x1xi32>
    %120 = arith.sitofp %119 : vector<128x1xi32> to vector<128x1xf32>
    %121 = vector.broadcast %120 : vector<128x1xf32> to vector<128x128xf32>
    %122 = vector.broadcast %116 : vector<1x128xf32> to vector<128x128xf32>
    %123 = arith.mulf %121, %122 : vector<128x128xf32>
    %124 = arith.addf %115, %123 : vector<128x128xf32>
    %c10 = arith.constant 10 : index
    %c0_27 = arith.constant 0 : index
    %125 = vector.load %arg7[%c10, %c0_27] : memref<16x128xf32, #tpu.memory_space<vmem>>, vector<1x128xf32>
    %c10_i32 = arith.constant 10 : i32
    %126 = vector.broadcast %c10_i32 : i32 to vector<128x1xi32>
    %127 = arith.cmpi eq, %34, %126 : vector<128x1xi32>
    %128 = arith.extui %127 : vector<128x1xi1> to vector<128x1xi32>
    %129 = arith.sitofp %128 : vector<128x1xi32> to vector<128x1xf32>
    %130 = vector.broadcast %129 : vector<128x1xf32> to vector<128x128xf32>
    %131 = vector.broadcast %125 : vector<1x128xf32> to vector<128x128xf32>
    %132 = arith.mulf %130, %131 : vector<128x128xf32>
    %133 = arith.addf %124, %132 : vector<128x128xf32>
    %c11 = arith.constant 11 : index
    %c0_28 = arith.constant 0 : index
    %134 = vector.load %arg7[%c11, %c0_28] : memref<16x128xf32, #tpu.memory_space<vmem>>, vector<1x128xf32>
    %c11_i32 = arith.constant 11 : i32
    %135 = vector.broadcast %c11_i32 : i32 to vector<128x1xi32>
    %136 = arith.cmpi eq, %34, %135 : vector<128x1xi32>
    %137 = arith.extui %136 : vector<128x1xi1> to vector<128x1xi32>
    %138 = arith.sitofp %137 : vector<128x1xi32> to vector<128x1xf32>
    %139 = vector.broadcast %138 : vector<128x1xf32> to vector<128x128xf32>
    %140 = vector.broadcast %134 : vector<1x128xf32> to vector<128x128xf32>
    %141 = arith.mulf %139, %140 : vector<128x128xf32>
    %142 = arith.addf %133, %141 : vector<128x128xf32>
    %c12 = arith.constant 12 : index
    %c0_29 = arith.constant 0 : index
    %143 = vector.load %arg7[%c12, %c0_29] : memref<16x128xf32, #tpu.memory_space<vmem>>, vector<1x128xf32>
    %c12_i32 = arith.constant 12 : i32
    %144 = vector.broadcast %c12_i32 : i32 to vector<128x1xi32>
    %145 = arith.cmpi eq, %34, %144 : vector<128x1xi32>
    %146 = arith.extui %145 : vector<128x1xi1> to vector<128x1xi32>
    %147 = arith.sitofp %146 : vector<128x1xi32> to vector<128x1xf32>
    %148 = vector.broadcast %147 : vector<128x1xf32> to vector<128x128xf32>
    %149 = vector.broadcast %143 : vector<1x128xf32> to vector<128x128xf32>
    %150 = arith.mulf %148, %149 : vector<128x128xf32>
    %151 = arith.addf %142, %150 : vector<128x128xf32>
    %c13 = arith.constant 13 : index
    %c0_30 = arith.constant 0 : index
    %152 = vector.load %arg7[%c13, %c0_30] : memref<16x128xf32, #tpu.memory_space<vmem>>, vector<1x128xf32>
    %c13_i32 = arith.constant 13 : i32
    %153 = vector.broadcast %c13_i32 : i32 to vector<128x1xi32>
    %154 = arith.cmpi eq, %34, %153 : vector<128x1xi32>
    %155 = arith.extui %154 : vector<128x1xi1> to vector<128x1xi32>
    %156 = arith.sitofp %155 : vector<128x1xi32> to vector<128x1xf32>
    %157 = vector.broadcast %156 : vector<128x1xf32> to vector<128x128xf32>
    %158 = vector.broadcast %152 : vector<1x128xf32> to vector<128x128xf32>
    %159 = arith.mulf %157, %158 : vector<128x128xf32>
    %160 = arith.addf %151, %159 : vector<128x128xf32>
    %c14 = arith.constant 14 : index
    %c0_31 = arith.constant 0 : index
    %161 = vector.load %arg7[%c14, %c0_31] : memref<16x128xf32, #tpu.memory_space<vmem>>, vector<1x128xf32>
    %c14_i32 = arith.constant 14 : i32
    %162 = vector.broadcast %c14_i32 : i32 to vector<128x1xi32>
    %163 = arith.cmpi eq, %34, %162 : vector<128x1xi32>
    %164 = arith.extui %163 : vector<128x1xi1> to vector<128x1xi32>
    %165 = arith.sitofp %164 : vector<128x1xi32> to vector<128x1xf32>
    %166 = vector.broadcast %165 : vector<128x1xf32> to vector<128x128xf32>
    %167 = vector.broadcast %161 : vector<1x128xf32> to vector<128x128xf32>
    %168 = arith.mulf %166, %167 : vector<128x128xf32>
    %169 = arith.addf %160, %168 : vector<128x128xf32>
    %c15 = arith.constant 15 : index
    %c0_32 = arith.constant 0 : index
    %170 = vector.load %arg7[%c15, %c0_32] : memref<16x128xf32, #tpu.memory_space<vmem>>, vector<1x128xf32>
    %c15_i32 = arith.constant 15 : i32
    %171 = vector.broadcast %c15_i32 : i32 to vector<128x1xi32>
    %172 = arith.cmpi eq, %34, %171 : vector<128x1xi32>
    %173 = arith.extui %172 : vector<128x1xi1> to vector<128x1xi32>
    %174 = arith.sitofp %173 : vector<128x1xi32> to vector<128x1xf32>
    %175 = vector.broadcast %174 : vector<128x1xf32> to vector<128x128xf32>
    %176 = vector.broadcast %170 : vector<1x128xf32> to vector<128x128xf32>
    %177 = arith.mulf %175, %176 : vector<128x128xf32>
    %178 = arith.addf %169, %177 : vector<128x128xf32>
    %c0_33 = arith.constant 0 : index
    %c0_34 = arith.constant 0 : index
    %179 = vector.load %arg8[%c0_33, %c0_34] : memref<128x128xf32, #tpu.memory_space<vmem>>, vector<128x128xf32>
    tpu.vector_store %arg8[%c0_33, %c0_34], %178 {strides = array<i32>} : memref<128x128xf32, #tpu.memory_space<vmem>>, vector<128x128xf32>,
    return
  }
  func.func @transform_0(%arg0: i32) -> (i32, i32) {
    %c0_i32 = arith.constant 0 : i32
    %c0_i32_0 = arith.constant 0 : i32
    return %arg0, %c0_i32 : i32, i32
  }
  func.func @transform_1(%arg0: i32) -> (i32, i32) {
    %c0_i32 = arith.constant 0 : i32
    %c0_i32_0 = arith.constant 0 : i32
    return %arg0, %c0_i32 : i32, i32
  }
  func.func @transform_2(%arg0: i32) -> (i32, i32) {
    %c0_i32 = arith.constant 0 : i32
    %c0_i32_0 = arith.constant 0 : i32
    %c0_i32_1 = arith.constant 0 : i32
    return %c0_i32, %c0_i32_0 : i32, i32
  }
  func.func @transform_3(%arg0: i32) -> (i32, i32) {
    %c0_i32 = arith.constant 0 : i32
    %c0_i32_0 = arith.constant 0 : i32
    %c0_i32_1 = arith.constant 0 : i32
    return %c0_i32, %c0_i32_0 : i32, i32
  }
  func.func @transform_4(%arg0: i32) -> (i32, i32) {
    %c0_i32 = arith.constant 0 : i32
    %c0_i32_0 = arith.constant 0 : i32
    %c0_i32_1 = arith.constant 0 : i32
    return %c0_i32, %c0_i32_0 : i32, i32
  }
  func.func @transform_5(%arg0: i32) -> (i32, i32) {
    %c0_i32 = arith.constant 0 : i32
    %c0_i32_0 = arith.constant 0 : i32
    %c0_i32_1 = arith.constant 0 : i32
    return %c0_i32, %c0_i32_0 : i32, i32
  }
  func.func @transform_6(%arg0: i32) -> (i32, i32) {
    %c0_i32 = arith.constant 0 : i32
    %c0_i32_0 = arith.constant 0 : i32
    %c0_i32_1 = arith.constant 0 : i32
    return %c0_i32, %c0_i32_0 : i32, i32
  }
  func.func @transform_7(%arg0: i32) -> (i32, i32) {
    %c0_i32 = arith.constant 0 : i32
    %c0_i32_0 = arith.constant 0 : i32
    return %arg0, %c0_i32 : i32, i32
  }
}

</mosaic_0001>

<bundles_post_ra>
// kernel: tpu_custom_call.1
= control target key start
LH: loop header
LB: loop body
LE: loop exit
PB: predicated region body
PF: predicated region fallthrough
CT: control target
= control target key end

     0   :  { %vm30_vm0 = vcmask 122880   ;;  %v3839_v2 = vmov 0   ;;  %s6789_s0 = inlined_call_operand.vmem [shape: s32[128,1], index: 0, kind: input, shape index: {}]   ;;  %s6790_s1 = inlined_call_operand.vmem [shape: f32[128,1], index: 1, kind: input, shape index: {}]   ;;  %s6791_s2 = inlined_call_operand.vmem [shape: f32[1,16], index: 2, kind: input, shape index: {}]   ;;  %s6792_s3 = inlined_call_operand.vmem [shape: f32[1,128], index: 3, kind: input, shape index: {}]   ;;  %s6793_s4 = inlined_call_operand.vmem [shape: f32[1,128], index: 4, kind: input, shape index: {}]   ;;  %s6794_s5 = inlined_call_operand.vmem [shape: f32[1,128], index: 5, kind: input, shape index: {}]   ;;  %s6795_s6 = inlined_call_operand.vmem [shape: f32[16,128], index: 6, kind: input, shape index: {}]   ;;  %s6796_s7 = inlined_call_operand.hbm [shape: f32[128,128], index: 7, kind: output, shape index: {}]  }
   0x1   :  { %v52_v0 = vld [vmem:[%s6790_s1] sm:$0xff]  ;;  %3157 = vset.pattern.permute.xlu1 %v3839_v2  ;;  %3158 = vset.pattern.permute.xlu0 %v3839_v2  ;;  %v53_v4 = vld [vmem:[%s6790_s1 + $0x8] sm:$0xff]  ;;  %v55_v5 = vld [vmem:[%s6790_s1 + $0x18] sm:$0xff] }
   0x2   :  { %v3890_v1 = vld [vmem:[%s6791_s2] sm:$0x1]  ;;  %70 = vperm.xlu1 %3157, %v52_v0  }
   0x3   :  { %v31_v3 = vsel %vm30_vm0, %v3890_v1, 0.0  ;;  %v56_v6 = vld [vmem:[%s6790_s1 + $0x20] sm:$0xff] }
   0x4   :  { %32 = vadd.xlane.f32.xlu0 %v31_v3 }
   0x6   :  { %75 = vperm.xlu1 %3157, %v53_v4  }
   0xa   :  { %85 = vperm.xlu1 %3157, %v55_v5  }
   0xb   :  { %12 = vsyncpa [#allocation3], 0  ;;  %v57_v7 = vld [vmem:[%s6790_s1 + $0x28] sm:$0xff]  ;;  %v58_v8 = vld [vmem:[%s6790_s1 + $0x30] sm:$0xff]  ;;  %v6797_v16 = vmov 0.0  }
   0xc   :  { %v3912_v9 = vld [vmem:[%s6789_s0] sm:$0xff]  ;;  %v3917_v10 = vld [vmem:[%s6789_s0 + $0x8] sm:$0xff]  ;;  %v54_v11 = vld [vmem:[%s6790_s1 + $0x10] sm:$0xff] }
   0xd   :  { %vm209_vm1 = vcmp.eq.s32.totalorder %v3912_v9, 0  ;;  %vm210_vm2 = vcmp.eq.s32.totalorder %v3917_v10, 0  ;;  %v59_v12 = vld [vmem:[%s6790_s1 + $0x38] sm:$0xff]  ;;  %v3930_v13 = vld [vmem:[%s6789_s0 + $0x20] sm:$0xff]  ;;  %v3935_v14 = vld [vmem:[%s6789_s0 + $0x28] sm:$0xff]  ;;  %vm374_vm9 = vcmp.eq.s32.totalorder %v3912_v9, 1 }
   0xe   :  { %90 = vperm.xlu1 %3157, %v56_v6   ;;  %v66_v15 = vld [vmem:[%s6790_s1 + $0x70] sm:$0xff]  ;;  %v2880_v17 = vsel %vm209_vm1, 1.0, %v6797_v16  ;;  %v2881_v18 = vsel %vm210_vm2, 1.0, %v6797_v16  ;;  %vm213_vm3 = vcmp.eq.s32.totalorder %v3930_v13, 0  ;;  %vm214_vm4 = vcmp.eq.s32.totalorder %v3935_v14, 0  ;;  %v60_v19 = vld [vmem:[%s6790_s1 + $0x40] sm:$0xff] }
   0xf   :  { %v3950_v20 = vld [vmem:[%s6789_s0 + $0x40] sm:$0xff]  ;;  %v3955_v21 = vld [vmem:[%s6789_s0 + $0x48] sm:$0xff]  ;;  %v3159_v22 = vpack.i.bf16 %v2881_v18, %v2880_v17  ;;  %v2884_v23 = vsel %vm213_vm3, 1.0, %v6797_v16  ;;  %v2885_v24 = vsel %vm214_vm4, 1.0, %v6797_v16  ;;  %v62_v31 = vld [vmem:[%s6790_s1 + $0x50] sm:$0xff]  ;;  %vm375_vm10 = vcmp.eq.s32.totalorder %v3917_v10, 1 }
  0x10   :  { %vm217_vm5 = vcmp.eq.s32.totalorder %v3950_v20, 0  ;;  %vm218_vm6 = vcmp.eq.s32.totalorder %v3955_v21, 0  ;;  %v61_v25 = vld [vmem:[%s6790_s1 + $0x48] sm:$0xff]  ;;  %v3967_v26 = vld [vmem:[%s6789_s0 + $0x60] sm:$0xff]  ;;  %v3169_v28 = vpack.i.bf16 %v2885_v24, %v2884_v23  ;;  %v63_v35 = vld [vmem:[%s6790_s1 + $0x58] sm:$0xff]  ;;  %v2897_v37 = vsel %vm374_vm9, 1.0, %v6797_v16 }
  0x11   :  { %v3972_v27 = vld [vmem:[%s6789_s0 + $0x68] sm:$0xff]  ;;  %v2888_v29 = vsel %vm217_vm5, 1.0, %v6797_v16  ;;  %v2889_v30 = vsel %vm218_vm6, 1.0, %v6797_v16  ;;  %vm221_vm7 = vcmp.eq.s32.totalorder %v3967_v26, 0  ;;  %v2898_v38 = vsel %vm375_vm10, 1.0, %v6797_v16  ;;  %v64_v39 = vld [vmem:[%s6790_s1 + $0x60] sm:$0xff] }
  0x12   :  { %95 = vperm.xlu1 %3157, %v57_v7   ;;  %vm222_vm8 = vcmp.eq.s32.totalorder %v3972_v27, 0  ;;  %v3179_v32 = vpack.i.bf16 %v2889_v30, %v2888_v29  ;;  %v2892_v33 = vsel %vm221_vm7, 1.0, %v6797_v16  ;;  %vm378_vm11 = vcmp.eq.s32.totalorder %v3930_v13, 1  ;;  %v4000_v43 = vld [vmem:[%s6789_s0 + $0x10] sm:$0xff]  ;;  %v4005_v44 = vld [vmem:[%s6789_s0 + $0x18] sm:$0xff]  ;;  %v65_v45 = vld [vmem:[%s6790_s1 + $0x68] sm:$0xff] }
  0x13   :  { %v2893_v34 = vsel %vm222_vm8, 1.0, %v6797_v16  ;;  %vm379_vm12 = vcmp.eq.s32.totalorder %v3935_v14, 1  ;;  %v3199_v40 = vpack.i.bf16 %v2898_v38, %v2897_v37  ;;  %v2901_v41 = vsel %vm378_vm11, 1.0, %v6797_v16  ;;  %v4019_v49 = vld [vmem:[%s6789_s0 + $0x30] sm:$0xff]  ;;  %v4024_v50 = vld [vmem:[%s6789_s0 + $0x38] sm:$0xff] }
  0x14   :  { %v3189_v36 = vpack.i.bf16 %v2893_v34, %v2892_v33  ;;  %v2902_v42 = vsel %vm379_vm12, 1.0, %v6797_v16  ;;  %vm382_vm13 = vcmp.eq.s32.totalorder %v3950_v20, 1  ;;  %vm383_vm14 = vcmp.eq.s32.totalorder %v3955_v21, 1  ;;  %v67_v51 = vld [vmem:[%s6790_s1 + $0x78] sm:$0xff]  ;;  %v4040_v57 = vld [vmem:[%s6789_s0 + $0x50] sm:$0xff] }
  0x15   :  { %v3209_v46 = vpack.i.bf16 %v2902_v42, %v2901_v41  ;;  %vm211_vm15 = vcmp.eq.s32.totalorder %v4000_v43, 0  ;;  %vm212_vm1 = vcmp.eq.s32.totalorder %v4005_v44, 0  ;;  %v2905_v47 = vsel %vm382_vm13, 1.0, %v6797_v16  ;;  %v4045_v58 = vld [vmem:[%s6789_s0 + $0x58] sm:$0xff]  ;;  %v4058_v2 = vld [vmem:[%s6789_s0 + $0x70] sm:$0xff] }
  0x16   :  { %100 = vperm.xlu1 %3157, %v58_v8   ;;  %v2906_v48 = vsel %vm383_vm14, 1.0, %v6797_v16  ;;  %vm386_vm2 = vcmp.eq.s32.totalorder %v3967_v26, 1  ;;  %vm387_vm3 = vcmp.eq.s32.totalorder %v3972_v27, 1  ;;  %v2882_v52 = vsel %vm211_vm15, 1.0, %v6797_v16  ;;  %v4063_v3 = vld [vmem:[%s6789_s0 + $0x78] sm:$0xff] }
  0x17   :  { %v2883_v53 = vsel %vm212_vm1, 1.0, %v6797_v16  ;;  %v3219_v54 = vpack.i.bf16 %v2906_v48, %v2905_v47  ;;  %vm215_vm4 = vcmp.eq.s32.totalorder %v4019_v49, 0  ;;  %vm216_vm5 = vcmp.eq.s32.totalorder %v4024_v50, 0 }
  0x18   :  { %v2909_v55 = vsel %vm386_vm2, 1.0, %v6797_v16  ;;  %v2910_v56 = vsel %vm387_vm3, 1.0, %v6797_v16  ;;  %v3164_v59 = vpack.i.bf16 %v2883_v53, %v2882_v52  ;;  %vm539_vm6 = vcmp.eq.s32.totalorder %v3912_v9, 2 }
  0x19   :  { %vm540_vm7 = vcmp.eq.s32.totalorder %v3917_v10, 2  ;;  %v2886_v60 = vsel %vm215_vm4, 1.0, %v6797_v16  ;;  %v2887_v61 = vsel %vm216_vm5, 1.0, %v6797_v16  ;;  %v3229_v62 = vpack.i.bf16 %v2910_v56, %v2909_v55 }
  0x1a   :  { %80 = vperm.xlu0 %3158, %v54_v11   ;;  %105 = vperm.xlu1 %3157, %v59_v12   ;;  %vm219_vm8 = vcmp.eq.s32.totalorder %v4040_v57, 0  ;;  %vm220_vm9 = vcmp.eq.s32.totalorder %v4045_v58, 0  ;;  %v2914_v63 = vsel %vm539_vm6, 1.0, %v6797_v16  ;;  %v2915_v0 = vsel %vm540_vm7, 1.0, %v6797_v16 }
  0x1b   :  { %v3174_v4 = vpack.i.bf16 %v2887_v61, %v2886_v60  ;;  %vm543_vm10 = vcmp.eq.s32.totalorder %v3930_v13, 2  ;;  %vm544_vm11 = vcmp.eq.s32.totalorder %v3935_v14, 2  ;;  %v2890_v5 = vsel %vm219_vm8, 1.0, %v6797_v16 }
  0x1c   :  { %v2891_v6 = vsel %vm220_vm9, 1.0, %v6797_v16  ;;  %v3239_v7 = vpack.i.bf16 %v2915_v0, %v2914_v63  ;;  %vm223_vm12 = vcmp.eq.s32.totalorder %v4058_v2, 0  ;;  %vm224_vm13 = vcmp.eq.s32.totalorder %v4063_v3, 0 }
  0x1d   :  { %v2918_v8 = vsel %vm543_vm10, 1.0, %v6797_v16  ;;  %v2919_v11 = vsel %vm544_vm11, 1.0, %v6797_v16  ;;  %v3184_v12 = vpack.i.bf16 %v2891_v6, %v2890_v5  ;;  %vm547_vm14 = vcmp.eq.s32.totalorder %v3950_v20, 2 }
  0x1e   :  { %140 = vperm.xlu0 %3158, %v66_v15   ;;  %110 = vperm.xlu1 %3157, %v60_v19   ;;  %vm548_vm15 = vcmp.eq.s32.totalorder %v3955_v21, 2  ;;  %v2894_v15 = vsel %vm223_vm12, 1.0, %v6797_v16  ;;  %v2895_v17 = vsel %vm224_vm13, 1.0, %v6797_v16  ;;  %v3249_v18 = vpack.i.bf16 %v2919_v11, %v2918_v8 }
  0x1f   :  { %vm376_vm1 = vcmp.eq.s32.totalorder %v4000_v43, 1  ;;  %vm377_vm2 = vcmp.eq.s32.totalorder %v4005_v44, 1  ;;  %v2922_v19 = vsel %vm547_vm14, 1.0, %v6797_v16  ;;  %v3194_v23 = vpack.i.bf16 %v2895_v17, %v2894_v15 }
  0x20   :  { %vm551_vm3 = vcmp.eq.s32.totalorder %v3967_v26, 2  ;;  %vm552_vm4 = vcmp.eq.s32.totalorder %v3972_v27, 2  ;;  %v2899_v24 = vsel %vm376_vm1, 1.0, %v6797_v16  ;;  %vm380_vm5 = vcmp.eq.s32.totalorder %v4019_v49, 1 }
  0x21   :  { %vm381_vm6 = vcmp.eq.s32.totalorder %v4024_v50, 1  ;;  %v2926_v29 = vsel %vm551_vm3, 1.0, %v6797_v16  ;;  %v2927_v30 = vsel %vm552_vm4, 1.0, %v6797_v16  ;;  %vm704_vm7 = vcmp.eq.s32.totalorder %v3912_v9, 3 }
  0x22   :  { %3160 = vperm.xlu0 %3158, %v3159_v22   ;;  %115 = vperm.xlu1 %3157, %v61_v25   ;;  %v2923_v22 = vsel %vm548_vm15, 1.0, %v6797_v16  ;;  %v2900_v25 = vsel %vm377_vm2, 1.0, %v6797_v16  ;;  %vm705_vm8 = vcmp.eq.s32.totalorder %v3917_v10, 3  ;;  %v2904_v33 = vsel %vm381_vm6, 1.0, %v6797_v16 }
  0x23   :  { %v3269_v34 = vpack.i.bf16 %v2927_v30, %v2926_v29  ;;  %vm384_vm9 = vcmp.eq.s32.totalorder %v4040_v57, 1  ;;  %vm385_vm10 = vcmp.eq.s32.totalorder %v4045_v58, 1  ;;  %vm708_vm11 = vcmp.eq.s32.totalorder %v3930_v13, 3 }
  0x24   :  { %vm709_vm12 = vcmp.eq.s32.totalorder %v3935_v14, 3  ;;  %v2907_v38 = vsel %vm384_vm9, 1.0, %v6797_v16  ;;  %vm388_vm13 = vcmp.eq.s32.totalorder %v4058_v2, 1  ;;  %vm389_vm14 = vcmp.eq.s32.totalorder %v4063_v3, 1 }
  0x25   :  { %v2935_v41 = vsel %vm708_vm11, 1.0, %v6797_v16  ;;  %v2936_v42 = vsel %vm709_vm12, 1.0, %v6797_v16  ;;  %vm712_vm15 = vcmp.eq.s32.totalorder %v3950_v20, 3  ;;  %vm713_vm1 = vcmp.eq.s32.totalorder %v3955_v21, 3 }
  0x26   :  { %3170 = vperm.xlu0 %3158, %v3169_v28   ;;  %120 = vperm.xlu1 %3157, %v62_v31   ;;  %v3259_v28 = vpack.i.bf16 %v2923_v22, %v2922_v19  ;;  %v3204_v31 = vpack.i.bf16 %v2900_v25, %v2899_v24  ;;  %v2912_v47 = vsel %vm389_vm14, 1.0, %v6797_v16  ;;  %v3289_v48 = vpack.i.bf16 %v2936_v42, %v2935_v41 }
  0x27   :  { %vm541_vm2 = vcmp.eq.s32.totalorder %v4000_v43, 2  ;;  %vm542_vm3 = vcmp.eq.s32.totalorder %v4005_v44, 2  ;;  %v2940_v52 = vsel %vm713_vm1, 1.0, %v6797_v16  ;;  %vm716_vm4 = vcmp.eq.s32.totalorder %v3967_v26, 3 }
  0x28   :  { %v2917_v55 = vsel %vm542_vm3, 1.0, %v6797_v16  ;;  %vm545_vm6 = vcmp.eq.s32.totalorder %v4019_v49, 2  ;;  %vm870_vm9 = vcmp.eq.s32.totalorder %v3917_v10, 4  ;;  %vm550_vm11 = vcmp.eq.s32.totalorder %v4045_v58, 2 }
  0x29   :  { %v2949_v5 = vsel %vm870_vm9, 1.0, %v6797_v16  ;;  %vm873_vm12 = vcmp.eq.s32.totalorder %v3930_v13, 4  ;;  %v2925_v8 = vsel %vm550_vm11, 1.0, %v6797_v16  ;;  %vm553_vm14 = vcmp.eq.s32.totalorder %v4058_v2, 2 }
  0x2a   :  { %3180 = vperm.xlu0 %3158, %v3179_v32   ;;  %125 = vperm.xlu1 %3157, %v63_v35   ;;  %v2903_v32 = vsel %vm380_vm5, 1.0, %v6797_v16  ;;  %v2931_v35 = vsel %vm704_vm7, 1.0, %v6797_v16  ;;  %vm717_vm5 = vcmp.eq.s32.totalorder %v3972_v27, 3  ;;  %vm546_vm7 = vcmp.eq.s32.totalorder %v4024_v50, 2 }
  0x2b   :  { %v3214_v37 = vpack.i.bf16 %v2904_v33, %v2903_v32  ;;  %v2944_v60 = vsel %vm717_vm5, 1.0, %v6797_v16  ;;  %v2921_v63 = vsel %vm546_vm7, 1.0, %v6797_v16  ;;  %vm877_vm1 = vcmp.eq.s32.totalorder %v3950_v20, 4 }
  0x2c   :  { %vm706_vm3 = vcmp.eq.s32.totalorder %v4000_v43, 3  ;;  %vm881_vm5 = vcmp.eq.s32.totalorder %v3967_v26, 4  ;;  %vm710_vm7 = vcmp.eq.s32.totalorder %v4019_v49, 3  ;;  %vm1034_vm9 = vcmp.eq.s32.totalorder %v3912_v9, 5 }
  0x2d   :  { %vm714_vm11 = vcmp.eq.s32.totalorder %v4040_v57, 3 }
  0x2e   :  { %3190 = vperm.xlu0 %3158, %v3189_v36   ;;  %130 = vperm.xlu1 %3157, %v64_v39   ;;  %v2932_v36 = vsel %vm705_vm8, 1.0, %v6797_v16  ;;  %v2908_v39 = vsel %vm385_vm10, 1.0, %v6797_v16  ;;  %vm869_vm8 = vcmp.eq.s32.totalorder %v3912_v9, 4  ;;  %vm549_vm10 = vcmp.eq.s32.totalorder %v4040_v57, 2 }
  0x32   :  { %3200 = vperm.xlu0 %3158, %v3199_v40   ;;  %135 = vperm.xlu1 %3157, %v65_v45   ;;  %v3279_v40 = vpack.i.bf16 %v2932_v36, %v2931_v35  ;;  %v3224_v45 = vpack.i.bf16 %v2908_v39, %v2907_v38 }
  0x36   :  { %3210 = vperm.xlu0 %3158, %v3209_v46   ;;  %145 = vperm.xlu1 %3157, %v67_v51   ;;  %v2911_v46 = vsel %vm388_vm13, 1.0, %v6797_v16  ;;  %v2939_v51 = vsel %vm712_vm15, 1.0, %v6797_v16  ;;  %vm874_vm13 = vcmp.eq.s32.totalorder %v3935_v14, 4  ;;  %vm554_vm15 = vcmp.eq.s32.totalorder %v4063_v3, 2 }
  0x37   :  { %v3234_v53 = vpack.i.bf16 %v2912_v47, %v2911_v46  ;;  %v3299_v56 = vpack.i.bf16 %v2940_v52, %v2939_v51  ;;  %v2953_v15 = vsel %vm874_vm13, 1.0, %v6797_v16  ;;  %v2929_v19 = vsel %vm554_vm15, 1.0, %v6797_v16 }
  0x38   :  { %vm1038_vm13 = vcmp.eq.s32.totalorder %v3930_v13, 5  ;;  %vm718_vm15 = vcmp.eq.s32.totalorder %v4058_v2, 3 }
  0x3a   :  { %3220 = vperm.xlu0 %3158, %v3219_v54   ;;  %3165 = vperm.xlu1 %3157, %v3164_v59   ;;  %v2916_v54 = vsel %vm541_vm2, 1.0, %v6797_v16  ;;  %v2943_v59 = vsel %vm716_vm4, 1.0, %v6797_v16  ;;  %vm878_vm2 = vcmp.eq.s32.totalorder %v3955_v21, 4  ;;  %vm707_vm4 = vcmp.eq.s32.totalorder %v4005_v44, 3 }
  0x3b   :  { %v3244_v61 = vpack.i.bf16 %v2917_v55, %v2916_v54  ;;  %v3309_v0 = vpack.i.bf16 %v2944_v60, %v2943_v59  ;;  %v2957_v24 = vsel %vm878_vm2, 1.0, %v6797_v16  ;;  %v2934_v29 = vsel %vm707_vm4, 1.0, %v6797_v16 }
  0x3c   :  { %vm1042_vm2 = vcmp.eq.s32.totalorder %v3950_v20, 5  ;;  %vm871_vm4 = vcmp.eq.s32.totalorder %v4000_v43, 4 }
  0x3e   :  { %3230 = vperm.xlu0 %3158, %v3229_v62   ;;  %3175 = vperm.xlu1 %3157, %v3174_v4   ;;  %v2920_v62 = vsel %vm545_vm6, 1.0, %v6797_v16  ;;  %v2948_v4 = vsel %vm869_vm8, 1.0, %v6797_v16  ;;  %vm882_vm6 = vcmp.eq.s32.totalorder %v3972_v27, 4  ;;  %vm711_vm8 = vcmp.eq.s32.totalorder %v4024_v50, 3 }
  0x3f   :  { %v3254_v6 = vpack.i.bf16 %v2921_v63, %v2920_v62  ;;  %v3319_v11 = vpack.i.bf16 %v2949_v5, %v2948_v4  ;;  %v2961_v32 = vsel %vm882_vm6, 1.0, %v6797_v16  ;;  %v2938_v35 = vsel %vm711_vm8, 1.0, %v6797_v16 }
  0x40   :  { %vm875_vm6 = vcmp.eq.s32.totalorder %v4019_v49, 4  ;;  %vm879_vm8 = vcmp.eq.s32.totalorder %v4040_v57, 4 }
  0x41   :  { %v2954_v62 = vsel %vm875_vm6, 1.0, %v6797_v16  ;;  %v2958_v4 = vsel %vm879_vm8, 1.0, %v6797_v16  ;;  %vm1202_vm6 = vcmp.eq.s32.totalorder %v4005_v44, 6  ;;  %vm1206_vm8 = vcmp.eq.s32.totalorder %v4024_v50, 6 }
  0x42   :  { %3240 = vperm.xlu0 %3158, %v3239_v7   ;;  %3185 = vperm.xlu1 %3157, %v3184_v12   ;;  %v2924_v7 = vsel %vm549_vm10, 1.0, %v6797_v16  ;;  %v2952_v12 = vsel %vm873_vm12, 1.0, %v6797_v16  ;;  %vm1035_vm10 = vcmp.eq.s32.totalorder %v3917_v10, 5  ;;  %vm715_vm12 = vcmp.eq.s32.totalorder %v4045_v58, 3 }
  0x43   :  { %v3264_v17 = vpack.i.bf16 %v2925_v8, %v2924_v7  ;;  %v3329_v22 = vpack.i.bf16 %v2953_v15, %v2952_v12  ;;  %v2966_v38 = vsel %vm1035_vm10, 1.0, %v6797_v16  ;;  %v2942_v41 = vsel %vm715_vm12, 1.0, %v6797_v16 }
  0x44   :  { %vm883_vm10 = vcmp.eq.s32.totalorder %v4058_v2, 4  ;;  %vm1036_vm12 = vcmp.eq.s32.totalorder %v4000_v43, 5 }
  0x45   :  { %v2962_v8 = vsel %vm883_vm10, 1.0, %v6797_v16  ;;  %vm1210_vm10 = vcmp.eq.s32.totalorder %v4045_v58, 6 }
  0x46   :  { %3250 = vperm.xlu0 %3158, %v3249_v18   ;;  %3195 = vperm.xlu1 %3157, %v3194_v23   ;;  %v2928_v18 = vsel %vm553_vm14, 1.0, %v6797_v16  ;;  %v2956_v23 = vsel %vm877_vm1, 1.0, %v6797_v16  ;;  %vm1039_vm14 = vcmp.eq.s32.totalorder %v3935_v14, 5  ;;  %vm719_vm1 = vcmp.eq.s32.totalorder %v4063_v3, 3 }
  0x47   :  { %v3274_v25 = vpack.i.bf16 %v2929_v19, %v2928_v18  ;;  %v3339_v30 = vpack.i.bf16 %v2957_v24, %v2956_v23  ;;  %v2970_v46 = vsel %vm1039_vm14, 1.0, %v6797_v16  ;;  %v2946_v51 = vsel %vm719_vm1, 1.0, %v6797_v16 }
  0x48   :  { %vm1040_vm14 = vcmp.eq.s32.totalorder %v4019_v49, 5  ;;  %vm1044_vm1 = vcmp.eq.s32.totalorder %v4040_v57, 5 }
  0x49   :  { %v2971_v23 = vsel %vm1040_vm14, 1.0, %v6797_v16  ;;  %vm1046_vm14 = vcmp.eq.s32.totalorder %v3967_v26, 5 }
  0x4a   :  { %3260 = vperm.xlu0 %3158, %v3259_v28   ;;  %3205 = vperm.xlu1 %3157, %v3204_v31   ;;  %v2933_v28 = vsel %vm706_vm3, 1.0, %v6797_v16  ;;  %v2960_v31 = vsel %vm881_vm5, 1.0, %v6797_v16  ;;  %vm1043_vm3 = vcmp.eq.s32.totalorder %v3955_v21, 5  ;;  %vm872_vm5 = vcmp.eq.s32.totalorder %v4005_v44, 4 }
  0x4b   :  { %v3284_v33 = vpack.i.bf16 %v2934_v29, %v2933_v28  ;;  %v3349_v36 = vpack.i.bf16 %v2961_v32, %v2960_v31  ;;  %v2974_v54 = vsel %vm1043_vm3, 1.0, %v6797_v16  ;;  %v2951_v59 = vsel %vm872_vm5, 1.0, %v6797_v16 }
  0x4c   :  { %vm1048_vm3 = vcmp.eq.s32.totalorder %v4058_v2, 5  ;;  %vm1201_vm5 = vcmp.eq.s32.totalorder %v4000_v43, 6 }
  0x4e   :  { %3270 = vperm.xlu0 %3158, %v3269_v34   ;;  %3215 = vperm.xlu1 %3157, %v3214_v37   ;;  %v2937_v34 = vsel %vm710_vm7, 1.0, %v6797_v16  ;;  %v2965_v37 = vsel %vm1034_vm9, 1.0, %v6797_v16  ;;  %vm876_vm7 = vcmp.eq.s32.totalorder %v4024_v50, 4  ;;  %vm880_vm9 = vcmp.eq.s32.totalorder %v4045_v58, 4 }
  0x4f   :  { %v3294_v39 = vpack.i.bf16 %v2938_v35, %v2937_v34  ;;  %v3359_v42 = vpack.i.bf16 %v2966_v38, %v2965_v37  ;;  %v2955_v63 = vsel %vm876_vm7, 1.0, %v6797_v16  ;;  %v2959_v5 = vsel %vm880_vm9, 1.0, %v6797_v16 }
  0x50   :  { %v3344_v7 = vpack.i.bf16 %v2959_v5, %v2958_v4  ;;  %vm1205_vm7 = vcmp.eq.s32.totalorder %v4019_v49, 6  ;;  %vm1209_vm9 = vcmp.eq.s32.totalorder %v4040_v57, 6  ;;  %v4269_v5 = vsel %vm1046_vm14, 1.0, %v6797_v16 }
  0x51   :  { %vm1211_vm14 = vcmp.eq.s32.totalorder %v3967_v26, 6 }
  0x52   :  { %3280 = vperm.xlu0 %3158, %v3279_v40   ;;  %3225 = vperm.xlu1 %3157, %v3224_v45   ;;  %v2941_v40 = vsel %vm714_vm11, 1.0, %v6797_v16  ;;  %v2969_v45 = vsel %vm1038_vm13, 1.0, %v6797_v16  ;;  %vm884_vm11 = vcmp.eq.s32.totalorder %v4063_v3, 4  ;;  %vm1037_vm13 = vcmp.eq.s32.totalorder %v4005_v44, 5 }
  0x53   :  { %v3304_v47 = vpack.i.bf16 %v2942_v41, %v2941_v40  ;;  %v3369_v52 = vpack.i.bf16 %v2970_v46, %v2969_v45  ;;  %v2968_v18 = vsel %vm1037_vm13, 1.0, %v6797_v16  ;;  %vm1366_vm13 = vcmp.eq.s32.totalorder %v4000_v43, 7 }
  0x56   :  { %3290 = vperm.xlu0 %3158, %v3289_v48   ;;  %3235 = vperm.xlu1 %3157, %v3234_v53   ;;  %v2945_v48 = vsel %vm718_vm15, 1.0, %v6797_v16  ;;  %v2973_v53 = vsel %vm1042_vm2, 1.0, %v6797_v16  ;;  %vm1041_vm15 = vcmp.eq.s32.totalorder %v4024_v50, 5  ;;  %vm1045_vm2 = vcmp.eq.s32.totalorder %v4045_v58, 5 }
  0x57   :  { %v3314_v55 = vpack.i.bf16 %v2946_v51, %v2945_v48  ;;  %v3379_v60 = vpack.i.bf16 %v2974_v54, %v2973_v53  ;;  %v2972_v24 = vsel %vm1041_vm15, 1.0, %v6797_v16  ;;  %v2976_v31 = vsel %vm1045_vm2, 1.0, %v6797_v16 }
  0x58   :  { %v3374_v28 = vpack.i.bf16 %v2972_v24, %v2971_v23  ;;  %v2989_v48 = vsel %vm1206_vm8, 1.0, %v6797_v16  ;;  %v2993_v53 = vsel %vm1210_vm10, 1.0, %v6797_v16  ;;  %vm1047_vm15 = vcmp.eq.s32.totalorder %v3972_v27, 5 }
  0x59   :  { %vm1371_vm2 = vcmp.eq.s32.totalorder %v4024_v50, 7  ;;  %vm1204_vm8 = vcmp.eq.s32.totalorder %v3935_v14, 6  ;;  %vm1379_vm10 = vcmp.eq.s32.totalorder %v4063_v3, 7 }
  0x5a   :  { %3300 = vperm.xlu0 %3158, %v3299_v56   ;;  %3245 = vperm.xlu1 %3157, %v3244_v61   ;;  %v2950_v56 = vsel %vm871_vm4, 1.0, %v6797_v16  ;;  %vm1049_vm4 = vcmp.eq.s32.totalorder %v4063_v3, 5 }
  0x5b   :  { %v3324_v61 = vpack.i.bf16 %v2951_v59, %v2950_v56  ;;  %v2980_v37 = vsel %vm1049_vm4, 1.0, %v6797_v16  ;;  %vm1200_vm4 = vcmp.eq.s32.totalorder %v3917_v10, 6 }
  0x5e   :  { %3310 = vperm.xlu0 %3158, %v3309_v0   ;;  %3255 = vperm.xlu1 %3157, %v3254_v6   ;;  %v3334_v0 = vpack.i.bf16 %v2955_v63, %v2954_v62 }
  0x62   :  { %3320 = vperm.xlu0 %3158, %v3319_v11   ;;  %3265 = vperm.xlu1 %3157, %v3264_v17   ;;  %v2963_v11 = vsel %vm884_vm11, 1.0, %v6797_v16  ;;  %v2967_v17 = vsel %vm1036_vm12, 1.0, %v6797_v16  ;;  %vm1213_vm11 = vcmp.eq.s32.totalorder %v4058_v2, 6  ;;  %vm1214_vm12 = vcmp.eq.s32.totalorder %v4063_v3, 6 }
  0x63   :  { %v3354_v15 = vpack.i.bf16 %v2963_v11, %v2962_v8  ;;  %v4278_v11 = vsel %vm1371_vm2, 1.0, %v6797_v16  ;;  %vm1536_vm2 = vcmp.eq.s32.totalorder %v4024_v50, 8 }
  0x66   :  { %3330 = vperm.xlu0 %3158, %v3329_v22   ;;  %3275 = vperm.xlu1 %3157, %v3274_v25   ;;  %v3364_v22 = vpack.i.bf16 %v2968_v18, %v2967_v17  ;;  %v4284_v17 = vsel %vm1200_vm4, 1.0, %v6797_v16  ;;  %vm1365_vm4 = vcmp.eq.s32.totalorder %v3917_v10, 7 }
  0x6a   :  { %3340 = vperm.xlu0 %3158, %v3339_v30   ;;  %3285 = vperm.xlu1 %3157, %v3284_v33   ;;  %v2975_v30 = vsel %vm1044_vm1, 1.0, %v6797_v16  ;;  %vm1370_vm1 = vcmp.eq.s32.totalorder %v4019_v49, 7 }
  0x6b   :  { %v3384_v34 = vpack.i.bf16 %v2976_v31, %v2975_v30  ;;  %v4275_v8 = vsel %vm1370_vm1, 1.0, %v6797_v16  ;;  %vm1535_vm1 = vcmp.eq.s32.totalorder %v4019_v49, 8 }
  0x6e   :  { %3350 = vperm.xlu0 %3158, %v3349_v36   ;;  %3295 = vperm.xlu1 %3157, %v3294_v39   ;;  %v2979_v36 = vsel %vm1048_vm3, 1.0, %v6797_v16  ;;  %v2984_v39 = vsel %vm1201_vm5, 1.0, %v6797_v16  ;;  %vm1199_vm3 = vcmp.eq.s32.totalorder %v3912_v9, 6  ;;  %vm1374_vm5 = vcmp.eq.s32.totalorder %v4040_v57, 7 }
  0x6f   :  { %v3394_v40 = vpack.i.bf16 %v2980_v37, %v2979_v36  ;;  %v6910_v36 = vmov 0.0  }
  0x72   :  { %3360 = vperm.xlu0 %3158, %v3359_v42   ;;  %3305 = vperm.xlu1 %3157, %v3304_v47   ;;  %v2985_v42 = vsel %vm1202_vm6, 1.0, %v6797_v16  ;;  %v2988_v47 = vsel %vm1205_vm7, 1.0, %v6797_v16  ;;  %vm1375_vm6 = vcmp.eq.s32.totalorder %v4045_v58, 7  ;;  %vm1203_vm7 = vcmp.eq.s32.totalorder %v3930_v13, 6 }
  0x73   :  { %v3404_v46 = vpack.i.bf16 %v2985_v42, %v2984_v39  ;;  %v3414_v56 = vpack.i.bf16 %v2989_v48, %v2988_v47  ;;  %v4292_v23 = vsel %vm1375_vm6, 1.0, %v6797_v16  ;;  %v4295_v24 = vsel %vm1203_vm7, 1.0, %v6797_v16 }
  0x74   :  { %vm1540_vm6 = vcmp.eq.s32.totalorder %v4045_v58, 8  ;;  %vm1368_vm7 = vcmp.eq.s32.totalorder %v3930_v13, 7 }
  0x76   :  { %3370 = vperm.xlu0 %3158, %v3369_v52   ;;  %3315 = vperm.xlu1 %3157, %v3314_v55   ;;  %v2992_v52 = vsel %vm1209_vm9, 1.0, %v6797_v16  ;;  %vm1378_vm9 = vcmp.eq.s32.totalorder %v4058_v2, 7 }
  0x77   :  { %v3424_v59 = vpack.i.bf16 %v2993_v53, %v2992_v52  ;;  %v4353_v53 = vsel %vm1211_vm14, 1.0, %v6797_v16  ;;  %vm1376_vm14 = vcmp.eq.s32.totalorder %v3967_v26, 7 }
  0x7a   :  { %3380 = vperm.xlu0 %3158, %v3379_v60   ;;  %3325 = vperm.xlu1 %3157, %v3324_v61   ;;  %v2996_v60 = vsel %vm1213_vm11, 1.0, %v6797_v16  ;;  %v2997_v61 = vsel %vm1214_vm12, 1.0, %v6797_v16  ;;  %vm1207_vm11 = vcmp.eq.s32.totalorder %v3950_v20, 6  ;;  %vm1208_vm12 = vcmp.eq.s32.totalorder %v3955_v21, 6 }
  0x7b   :  { %v3434_v30 = vpack.i.bf16 %v2997_v61, %v2996_v60  ;;  %v4323_v42 = vsel %vm1207_vm11, 1.0, %v6797_v16  ;;  %v4329_v47 = vsel %vm1208_vm12, 1.0, %v6797_v16  ;;  %v4362_v60 = vsel %vm1536_vm2, 1.0, %v6797_v16 }
  0x7c   :  { %vm1372_vm11 = vcmp.eq.s32.totalorder %v3950_v20, 7  ;;  %vm1373_vm12 = vcmp.eq.s32.totalorder %v3955_v21, 7  ;;  %vm1701_vm2 = vcmp.eq.s32.totalorder %v4024_v50, 9 }
  0x7d   :  { %v4189_v6 = vpop.permute.xlu1 %70 }
  0x7e   :  { %6892 = vst [vmem:[#allocation5_spill] sm:$0xff] %v4189_v6  ;;  %3335 = vperm.xlu1 %3157, %v3334_v0   ;;  %v3001_v0 = vsel %vm1366_vm13, 1.0, %v6797_v16  ;;  %vm1531_vm13 = vcmp.eq.s32.totalorder %v4000_v43, 8 }
  0x81   :  { %v4195_v12 = vpop.permute.xlu1 %75 }
  0x82   :  { %6893 = vst [vmem:[#allocation6_spill] sm:$0xff] %v4195_v12  ;;  %3345 = vperm.xlu1 %3157, %v3344_v7   ;;  %v4272_v7 = vsel %vm1047_vm15, 1.0, %v6797_v16  ;;  %vm1212_vm15 = vcmp.eq.s32.totalorder %v3972_v27, 6 }
  0x85   :  { %v4201_v19 = vpop.permute.xlu1 %85 }
  0x86   :  { %6894 = vst [vmem:[#allocation7_spill] sm:$0xff] %v4201_v19  ;;  %3355 = vperm.xlu1 %3157, %v3354_v15   ;;  %v4281_v15 = vsel %vm1199_vm3, 1.0, %v6797_v16  ;;  %vm1364_vm3 = vcmp.eq.s32.totalorder %v3912_v9, 7 }
  0x87   :  { %v4365_v61 = vsel %vm1364_vm3, 1.0, %v6797_v16  ;;  %vm1529_vm3 = vcmp.eq.s32.totalorder %v3912_v9, 8  ;;  %v6913_v37 = vpack.i.bf16 %v4284_v17, %v4281_v15  ;;  %v4464_v17 = vsel %vm1701_vm2, 1.0, %v6910_v36 }
  0x88   :  { %vm1866_vm2 = vcmp.eq.s32.totalorder %v4024_v50, 10 }
  0x89   :  { %v4207_v25 = vpop.permute.xlu1 %90 }
  0x8a   :  { %6895 = vst [vmem:[#allocation8_spill] sm:$0xff] %v4207_v25  ;;  %3365 = vperm.xlu1 %3157, %v3364_v22   ;;  %v4289_v22 = vsel %vm1374_vm5, 1.0, %v6797_v16  ;;  %vm1539_vm5 = vcmp.eq.s32.totalorder %v4040_v57, 8  ;;  %v4448_v25 = vsel %vm1376_vm14, 1.0, %v6910_v36  ;;  %vm1541_vm14 = vcmp.eq.s32.totalorder %v3967_v26, 8 }
  0x8d   :  { %v33_v29 = vpop.xlane.xlu0 %32  ;;  %v4215_v33 = vpop.permute.xlu1 %95 }
  0x8e   :  { %v4211_v32 = vmul.f32 0.0625, %v33_v29  ;;  %6897 = vst [vmem:[#allocation10_spill] sm:$0xff] %v4215_v33  ;;  %3375 = vperm.xlu1 %3157, %v3374_v28   ;;  %v4298_v28 = vsel %vm1204_vm8, 1.0, %v6797_v16  ;;  %vm1369_vm8 = vcmp.eq.s32.totalorder %v3935_v14, 7 }
  0x90   :  { %6896 = vst [vmem:[#allocation9_spill] sm:$0xff] %v4211_v32  ;;  %v36_v35 = vsub.f32 %v3890_v1, %v4211_v32 }
  0x91   :  { %v4223_v38 = vpop.permute.xlu1 %100 }
  0x92   :  { %6898 = vst [vmem:[#allocation11_spill] sm:$0xff] %v4223_v38  ;;  %3385 = vperm.xlu1 %3157, %v3384_v34   ;;  %v37_v41 = vmul.f32 %v36_v35, %v36_v35  ;;  %v3389_v34 = vpack.i.bf16 %v4272_v7, %v4269_v5  ;;  %v3454_v35 = vpack.i.bf16 %v4278_v11, %v4275_v8  ;;  %v4373_v5 = vsel %vm1539_vm5, 1.0, %v6797_v16 }
  0x93   :  { %v4376_v7 = vsel %vm1540_vm6, 1.0, %v6797_v16  ;;  %v4379_v8 = vsel %vm1368_vm7, 1.0, %v6797_v16  ;;  %v4382_v11 = vsel %vm1369_vm8, 1.0, %v6797_v16  ;;  %vm1704_vm5 = vcmp.eq.s32.totalorder %v4040_v57, 9 }
  0x94   :  { %v38_v51 = vsel %vm30_vm0, %v37_v41, 0.0  ;;  %vm1367_vm0 = vcmp.eq.s32.totalorder %v4005_v44, 7  ;;  %v4320_v41 = vsel %vm1379_vm10, 1.0, %v6797_v16  ;;  %vm1544_vm10 = vcmp.eq.s32.totalorder %v4063_v3, 8 }
  0x95   :  { %v4229_v1 = vpop.permute.xlu0 %80  ;;  %v4233_v45 = vpop.permute.xlu1 %105  ;;  %v3002_v4 = vsel %vm1367_vm0, 1.0, %v6797_v16  ;;  %vm1532_vm0 = vcmp.eq.s32.totalorder %v4005_v44, 8  ;;  %vm1705_vm6 = vcmp.eq.s32.totalorder %v4045_v58, 9  ;;  %vm1533_vm7 = vcmp.eq.s32.totalorder %v3930_v13, 8 }
  0x96   :  { %6899 = vst [vmem:[#allocation12_spill] sm:$0xff] %v4229_v1  ;;  %6900 = vst [vmem:[#allocation13_spill] sm:$0xff] %v4233_v45  ;;  %3395 = vperm.xlu1 %3157, %v3394_v40   ;;  %v3444_v31 = vpack.i.bf16 %v3002_v4, %v3001_v0  ;;  %v4317_v40 = vsel %vm1378_vm9, 1.0, %v6797_v16  ;;  %v4350_v52 = vsel %vm1532_vm0, 1.0, %v6797_v16  ;;  %v4368_v0 = vsel %vm1365_vm4, 1.0, %v6797_v16 }
  0x97   :  { %v3474_v39 = vpack.i.bf16 %v4320_v41, %v4317_v40  ;;  %vm1543_vm9 = vcmp.eq.s32.totalorder %v4058_v2, 8  ;;  %v4419_v41 = vsel %vm1373_vm12, 1.0, %v6910_v36  ;;  %vm1697_vm0 = vcmp.eq.s32.totalorder %v4005_v44, 9 }
  0x98   :  { %vm1530_vm4 = vcmp.eq.s32.totalorder %v3917_v10, 8  ;;  %vm1534_vm8 = vcmp.eq.s32.totalorder %v3935_v14, 8  ;;  %v4445_v33 = vsel %vm1697_vm0, 1.0, %v6910_v36  ;;  %v4483_v12 = vsel %vm1533_vm7, 1.0, %v6910_v36 }
  0x99   :  { %39 = vadd.xlane.f32.xlu0 %v38_v51  ;;  %v4241_v54 = vpop.permute.xlu0 %140  ;;  %v4244_v55 = vpop.permute.xlu1 %110  ;;  %v4347_v51 = vsel %vm1531_vm13, 1.0, %v6797_v16  ;;  %vm1696_vm13 = vcmp.eq.s32.totalorder %v4000_v43, 9  ;;  %v4486_v6 = vsel %vm1534_vm8, 1.0, %v6910_v36  ;;  %vm1538_vm12 = vcmp.eq.s32.totalorder %v3955_v21, 8 }
  0x9a   :  { %6901 = vst [vmem:[#allocation14_spill] sm:$0xff] %v4241_v54  ;;  %6902 = vst [vmem:[#allocation15_spill] sm:$0xff] %v4244_v55  ;;  %3405 = vperm.xlu1 %3157, %v3404_v46   ;;  %v4409_v55 = vsel %vm1543_vm9, 1.0, %v6910_v36  ;;  %v4442_v40 = vsel %vm1696_vm13, 1.0, %v6910_v36  ;;  %vm1708_vm9 = vcmp.eq.s32.totalorder %v4058_v2, 9  ;;  %vm1861_vm13 = vcmp.eq.s32.totalorder %v4000_v43, 10 }
  0x9b   :  { %v4516_v19 = vsel %vm1708_vm9, 1.0, %v6910_v36  ;;  %vm1862_vm0 = vcmp.eq.s32.totalorder %v4005_v44, 10  ;;  %vm1698_vm7 = vcmp.eq.s32.totalorder %v3930_v13, 9  ;;  %vm1699_vm8 = vcmp.eq.s32.totalorder %v3935_v14, 9 }
  0x9c   :  { %v4550_v26 = vsel %vm1861_vm13, 1.0, %v6910_v36  ;;  %v4567_v14 = vsel %vm1866_vm2, 1.0, %v6910_v36  ;;  %vm1873_vm9 = vcmp.eq.s32.totalorder %v4058_v2, 10  ;;  %vm2026_vm13 = vcmp.eq.s32.totalorder %v4000_v43, 11 }
  0x9d   :  { %v4252_v62 = vpop.permute.xlu0 %3160  ;;  %v4262_v63 = vpop.permute.xlu1 %115  ;;  %vm2031_vm2 = vcmp.eq.s32.totalorder %v4024_v50, 11 }
  0x9e   :  { %6903 = vst [vmem:[#allocation16_spill] sm:$0xff] %v4262_v63  ;;  %3415 = vperm.xlu1 %3157, %v3414_v56   ;;  %v4356_v56 = vsel %vm1212_vm15, 1.0, %v6797_v16  ;;  %vm1377_vm15 = vcmp.eq.s32.totalorder %v3972_v27, 7 }
  0xa1   :  { %v4286_v18 = vpop.permute.xlu0 %3170  ;;  %v4303_v29 = vpop.permute.xlu1 %120 }
  0xa2   :  { %6904 = vst [vmem:[#allocation17_spill] sm:$0xff] %v4303_v29  ;;  %3425 = vperm.xlu1 %3157, %v3424_v59   ;;  %v4359_v59 = vsel %vm1535_vm1, 1.0, %v6797_v16  ;;  %v4412_v16 = vsel %vm1544_vm10, 1.0, %v6910_v36  ;;  %vm1700_vm1 = vcmp.eq.s32.totalorder %v4019_v49, 9  ;;  %v6914_v29 = vpack.i.bf16 %v4292_v23, %v4289_v22 }
  0xa3   :  { %v4459_v15 = vsel %vm1700_vm1, 1.0, %v6910_v36  ;;  %v4474_v22 = vsel %vm1530_vm4, 1.0, %v6910_v36  ;;  %v4477_v23 = vsel %vm1704_vm5, 1.0, %v6910_v36  ;;  %vm1709_vm10 = vcmp.eq.s32.totalorder %v4063_v3, 9 }
  0xa4   :  { %v4519_v21 = vsel %vm1709_vm10, 1.0, %v6910_v36  ;;  %vm1865_vm1 = vcmp.eq.s32.totalorder %v4019_v49, 10  ;;  %vm1695_vm4 = vcmp.eq.s32.totalorder %v3917_v10, 9  ;;  %vm1869_vm5 = vcmp.eq.s32.totalorder %v4040_v57, 10 }
  0xa5   :  { %v4326_v46 = vpop.permute.xlu0 %3180  ;;  %v4334_v48 = vpop.permute.xlu1 %125  ;;  %v4556_v10 = vsel %vm1541_vm14, 1.0, %v6910_v36  ;;  %v4564_v13 = vsel %vm1865_vm1, 1.0, %v6910_v36  ;;  %v6924_v54 = vpack.i.bf16 %v4362_v60, %v4359_v59  ;;  %vm1874_vm10 = vcmp.eq.s32.totalorder %v4063_v3, 10  ;;  %v4614_v60 = vld [vmem:[%s6789_s0 + $0x48] sm:$0xff] }
  0xa6   :  { %6905 = vst [vmem:[#allocation18_spill] sm:$0xff] %v4326_v46  ;;  %6906 = vst [vmem:[#allocation19_spill] sm:$0xff] %v4334_v48  ;;  %3435 = vperm.xlu1 %3157, %v3434_v30   ;;  %v4451_v48 = vsel %vm1377_vm15, 1.0, %v6910_v36  ;;  %vm1542_vm15 = vcmp.eq.s32.totalorder %v3972_v27, 8  ;;  %vm2030_vm1 = vcmp.eq.s32.totalorder %v4019_v49, 11  ;;  %v6935_v43 = vpack.i.bf16 %v4412_v16, %v4409_v55 }
  0xa7   :  { %v4559_v27 = vsel %vm1542_vm15, 1.0, %v6910_v36  ;;  %v6947_v46 = vpack.i.bf16 %v4445_v33, %v4442_v40  ;;  %v4800_v40 = vld [vmem:[%s6789_s0 + $0x10] sm:$0xff] }
  0xa9   :  { %v4370_v4 = vpop.permute.xlu1 %130  ;;  %v4384_v30 = vpop.permute.xlu0 %3190 }
  0xaa   :  { %6907 = vst [vmem:[#allocation20_spill] sm:$0xff] %v4370_v4  ;;  %6908 = vst [vmem:[#allocation21_spill] sm:$0xff] %v4384_v30  ;;  %3445 = vperm.xlu1 %3157, %v3444_v31   ;;  %v4415_v31 = vsel %vm1372_vm11, 1.0, %v6910_v36  ;;  %vm1537_vm11 = vcmp.eq.s32.totalorder %v3950_v20, 8  ;;  %v4526_v20 = vsel %vm1538_vm12, 1.0, %v6910_v36  ;;  %v4587_v4 = vsel %vm1698_vm7, 1.0, %v6910_v36 }
  0xab   :  { %vm1703_vm12 = vcmp.eq.s32.totalorder %v4614_v60, 9  ;;  %v4825_v30 = vld [vmem:[%s6789_s0 + $0x38] sm:$0xff] }
  0xad   :  { %v4406_v63 = vpop.permute.xlu1 %135 }
  0xae   :  { %6909 = vst [vmem:[#allocation22_spill] sm:$0xff] %v4406_v63  ;;  %3455 = vperm.xlu1 %3157, %v3454_v35   ;;  %v6916_v63 = vpack.i.bf16 %v4298_v28, %v4295_v24  ;;  %v6919_v24 = vpack.i.bf16 %v4329_v47, %v4323_v42 }
  0xaf   :  { %3390 = vperm.xlu0 %3158, %v3389_v34   ;;  %v4428_v34 = vpop.permute.xlu0 %3200 }
  0xb0   :  { %6911 = vst [vmem:[#allocation23_spill] sm:$0xff] %v4428_v34 }
  0xb1   :  { %v4434_v35 = vpop.permute.xlu1 %145 }
  0xb2   :  { %6912 = vst [vmem:[#allocation24_spill] sm:$0xff] %v4434_v35  ;;  %3465 = vperm.xlu1 %3157, %v6914_v29   ;;  %v4480_v29 = vsel %vm1705_vm6, 1.0, %v6910_v36  ;;  %vm1870_vm6 = vcmp.eq.s32.totalorder %v4045_v58, 10  ;;  %v4590_v35 = vsel %vm1699_vm8, 1.0, %v6910_v36 }
  0xb3   :  { %3400 = vperm.xlu0 %3158, %v6913_v37   ;;  %v4469_v37 = vsel %vm1529_vm3, 1.0, %v6910_v36  ;;  %v4505_v1 = vpop.permute.xlu0 %3210  ;;  %vm1694_vm3 = vcmp.eq.s32.totalorder %v3912_v9, 9  ;;  %v4553_v9 = vsel %vm1862_vm0, 1.0, %v6910_v36  ;;  %v4584_v45 = vsel %vm1870_vm6, 1.0, %v6910_v36 }
  0xb4   :  { %6917 = vst [vmem:[#allocation26_spill] sm:$0xff] %v4505_v1  ;;  %v4570_v47 = vsel %vm1694_vm3, 1.0, %v6910_v36  ;;  %vm2027_vm0 = vcmp.eq.s32.totalorder %v4005_v44, 11  ;;  %vm2035_vm6 = vcmp.eq.s32.totalorder %v4045_v58, 11  ;;  %v4720_v44 = vsel %vm2030_vm1, 1.0, %v6910_v36 }
  0xb5   :  { %v4493_v38 = vpop.permute.xlu1 %3165  ;;  %v4702_v1 = vsel %vm2027_vm0, 1.0, %v6910_v36  ;;  %6936 = vst [vmem:[#allocation37_spill] sm:$0xff] %v4720_v44  ;;  %v4745_v50 = vsel %vm2035_vm6, 1.0, %v6910_v36  ;;  %v6946_v58 = vpack.i.bf16 %v4419_v41, %v4415_v31  ;;  %v6950_v41 = vpack.i.bf16 %v4451_v48, %v4448_v25  ;;  %v4819_v31 = vld [vmem:[%s6789_s0 + $0x30] sm:$0xff] }
  0xb6   :  { %6915 = vst [vmem:[#allocation25_spill] sm:$0xff] %v4493_v38  ;;  %3475 = vperm.xlu1 %3157, %v3474_v39   ;;  %v4522_v39 = vsel %vm1537_vm11, 1.0, %v6910_v36  ;;  %v6930_v38 = vpack.i.bf16 %v4382_v11, %v4379_v8  ;;  %6932 = vst [vmem:[#allocation34_spill] sm:$0xff] %v4702_v1  ;;  %vm2195_vm1 = vcmp.eq.s32.totalorder %v4819_v31, 12  ;;  %v6952_v48 = vpack.i.bf16 %v4464_v17, %v4459_v15 }
  0xb7   :  { %3410 = vperm.xlu0 %3158, %v6916_v63   ;;  %v6920_v63 = vpack.i.bf16 %v4350_v52, %v4347_v51  ;;  %v4561_v42 = vpop.permute.xlu0 %3220  ;;  %v4573_v51 = vsel %vm1695_vm4, 1.0, %v6910_v36  ;;  %6941 = vst [vmem:[#allocation42_spill] sm:$0xff] %v4745_v50 }
  0xb8   :  { %6921 = vst [vmem:[#allocation28_spill] sm:$0xff] %v4561_v42  ;;  %v4697_v42 = vsel %vm2026_vm13, 1.0, %v6910_v36  ;;  %vm2191_vm13 = vcmp.eq.s32.totalorder %v4800_v40, 12 }
  0xb9   :  { %v4531_v28 = vpop.permute.xlu1 %3175  ;;  %6931 = vst [vmem:[#allocation33_spill] sm:$0xff] %v4697_v42  ;;  %v4852_v15 = vsel %vm2191_vm13, 1.0, %v6910_v36  ;;  %vm2356_vm13 = vcmp.eq.s32.totalorder %v4800_v40, 13 }
  0xba   :  { %6918 = vst [vmem:[#allocation27_spill] sm:$0xff] %v4531_v28  ;;  %3485 = vperm.xlu1 %3157, %v6920_v63   ;;  %v6923_v63 = vpack.i.bf16 %v4356_v56, %v4353_v53  ;;  %v4602_v56 = vld [vmem:[%s6789_s0 + $0x40] sm:$0xff]  ;;  %v4631_v28 = vsel %vm1873_vm9, 1.0, %v6910_v36  ;;  %v4634_v53 = vsel %vm1874_vm10, 1.0, %v6910_v36  ;;  %vm2038_vm9 = vcmp.eq.s32.totalorder %v4058_v2, 11 }
  0xbb   :  { %3420 = vperm.xlu0 %3158, %v6919_v24   ;;  %v4581_v24 = vsel %vm1869_vm5, 1.0, %v6910_v36  ;;  %vm1702_vm11 = vcmp.eq.s32.totalorder %v4602_v56, 9  ;;  %vm2034_vm5 = vcmp.eq.s32.totalorder %v4040_v57, 11  ;;  %vm2039_vm10 = vcmp.eq.s32.totalorder %v4063_v3, 11 }
  0xbc   :  { %v4637_v32 = vsel %vm1702_vm11, 1.0, %v6910_v36  ;;  %v4740_v49 = vsel %vm2034_vm5, 1.0, %v6910_v36  ;;  %vm1867_vm11 = vcmp.eq.s32.totalorder %v4602_v56, 10  ;;  %v4786_v2 = vsel %vm2038_vm9, 1.0, %v6910_v36 }
  0xbd   :  { %v4575_v52 = vpop.permute.xlu1 %3185  ;;  %6940 = vst [vmem:[#allocation41_spill] sm:$0xff] %v4740_v49  ;;  %v4789_v3 = vsel %vm2039_vm10, 1.0, %v6910_v36  ;;  %v4792_v33 = vsel %vm1867_vm11, 1.0, %v6910_v36  ;;  %vm2032_vm11 = vcmp.eq.s32.totalorder %v4602_v56, 11 }
  0xbe   :  { %6922 = vst [vmem:[#allocation29_spill] sm:$0xff] %v4575_v52  ;;  %3495 = vperm.xlu1 %3157, %v6924_v54   ;;  %v6926_v52 = vpack.i.bf16 %v4368_v0, %v4365_v61  ;;  %v6928_v54 = vpack.i.bf16 %v4376_v7, %v4373_v5  ;;  %v4646_v61 = vsel %vm1703_vm12, 1.0, %v6910_v36  ;;  %v4652_v0 = vld [vmem:[%s6789_s0 + $0x60] sm:$0xff]  ;;  %v4672_v7 = vld [vmem:[%s6789_s0 + $0x8] sm:$0xff]  ;;  %vm1868_vm12 = vcmp.eq.s32.totalorder %v4614_v60, 10  ;;  %6948 = vst [vmem:[#allocation47_spill] sm:$0xff] %v4792_v33 }
  0xbf   :  { %3430 = vperm.xlu0 %3158, %v6923_v63   ;;  %v4640_v63 = vpop.permute.xlu0 %3230  ;;  %vm1706_vm14 = vcmp.eq.s32.totalorder %v4652_v0, 9  ;;  %v4666_v5 = vld [vmem:[%s6789_s0] sm:$0xff]  ;;  %vm1860_vm4 = vcmp.eq.s32.totalorder %v4672_v7, 10  ;;  %v4955_v1 = vsel %vm2032_vm11, 1.0, %v6910_v36  ;;  %vm2197_vm11 = vcmp.eq.s32.totalorder %v4602_v56, 12 }
  0xc0   :  { %6927 = vst [vmem:[#allocation31_spill] sm:$0xff] %v4640_v63  ;;  %vm1859_vm3 = vcmp.eq.s32.totalorder %v4666_v5, 10  ;;  %v4707_v34 = vsel %vm1706_vm14, 1.0, %v6910_v36  ;;  %v4735_v16 = vsel %vm1860_vm4, 1.0, %v6910_v36  ;;  %vm1871_vm14 = vcmp.eq.s32.totalorder %v4652_v0, 10 }
  0xc1   :  { %v4625_v59 = vpop.permute.xlu1 %3195  ;;  %6933 = vst [vmem:[#allocation35_spill] sm:$0xff] %v4707_v34  ;;  %v4730_v11 = vsel %vm1859_vm3, 1.0, %v6910_v36  ;;  %6939 = vst [vmem:[#allocation40_spill] sm:$0xff] %v4735_v16  ;;  %vm2024_vm3 = vcmp.eq.s32.totalorder %v4666_v5, 11  ;;  %vm2025_vm4 = vcmp.eq.s32.totalorder %v4672_v7, 11 }
  0xc2   :  { %6925 = vst [vmem:[#allocation30_spill] sm:$0xff] %v4625_v59  ;;  %3505 = vperm.xlu1 %3157, %v6928_v54   ;;  %v4680_v54 = vld [vmem:[%s6789_s0 + $0x20] sm:$0xff]  ;;  %v4686_v59 = vld [vmem:[%s6789_s0 + $0x28] sm:$0xff]  ;;  %6938 = vst [vmem:[#allocation39_spill] sm:$0xff] %v4730_v11  ;;  %v4887_v49 = vsel %vm2025_vm4, 1.0, %v6910_v36  ;;  %v6958_v11 = vpack.i.bf16 %v4474_v22, %v4469_v37  ;;  %vm2190_vm4 = vcmp.eq.s32.totalorder %v4672_v7, 12 }
  0xc3   :  { %3440 = vperm.xlu0 %3158, %v6926_v52   ;;  %v4658_v52 = vld [vmem:[%s6789_s0 + $0x68] sm:$0xff]  ;;  %vm1863_vm7 = vcmp.eq.s32.totalorder %v4680_v54, 10  ;;  %vm1864_vm8 = vcmp.eq.s32.totalorder %v4686_v59, 10  ;;  %6956 = vst [vmem:[#allocation53_spill] sm:$0xff] %v4887_v49  ;;  %v4912_v37 = vld [vmem:[%s6789_s0 + $0x70] sm:$0xff]  ;;  %v4918_v22 = vld [vmem:[%s6789_s0 + $0x78] sm:$0xff] }
  0xc4   :  { %vm1707_vm15 = vcmp.eq.s32.totalorder %v4658_v52, 9  ;;  %v4750_v55 = vsel %vm1863_vm7, 1.0, %v6910_v36  ;;  %vm2028_vm7 = vcmp.eq.s32.totalorder %v4680_v54, 11  ;;  %vm2203_vm9 = vcmp.eq.s32.totalorder %v4912_v37, 12 }
  0xc5   :  { %v4689_v63 = vpop.permute.xlu1 %3205  ;;  %v4712_v8 = vsel %vm1707_vm15, 1.0, %v6910_v36  ;;  %6942 = vst [vmem:[#allocation43_spill] sm:$0xff] %v4750_v55  ;;  %vm1872_vm15 = vcmp.eq.s32.totalorder %v4658_v52, 10  ;;  %vm2204_vm10 = vcmp.eq.s32.totalorder %v4918_v22, 12 }
  0xc6   :  { %6929 = vst [vmem:[#allocation32_spill] sm:$0xff] %v4689_v63  ;;  %6934 = vst [vmem:[#allocation36_spill] sm:$0xff] %v4712_v8  ;;  %3515 = vperm.xlu1 %3157, %v6935_v43   ;;  %v4753_v43 = vsel %vm1864_vm8, 1.0, %v6910_v36  ;;  %v4755_v63 = vpop.permute.xlu0 %3240  ;;  %vm2029_vm8 = vcmp.eq.s32.totalorder %v4686_v59, 11  ;;  %v6963_v8 = vpack.i.bf16 %v4480_v29, %v4477_v23  ;;  %v4952_v42 = vsel %vm2204_vm10, 1.0, %v6910_v36 }
  0xc7   :  { %3450 = vperm.xlu0 %3158, %v6930_v38   ;;  %v4725_v38 = vsel %vm2031_vm2, 1.0, %v6910_v36  ;;  %6943 = vst [vmem:[#allocation44_spill] sm:$0xff] %v4753_v43  ;;  %6944 = vst [vmem:[#allocation45_spill] sm:$0xff] %v4755_v63  ;;  %v4806_v63 = vld [vmem:[%s6789_s0 + $0x18] sm:$0xff]  ;;  %vm2196_vm2 = vcmp.eq.s32.totalorder %v4825_v30, 12  ;;  %v4882_v43 = vsel %vm2024_vm3, 1.0, %v6910_v36  ;;  %v6966_v29 = vpack.i.bf16 %v4519_v21, %v4516_v19 }
  0xc8   :  { %6937 = vst [vmem:[#allocation38_spill] sm:$0xff] %v4725_v38  ;;  %vm2192_vm0 = vcmp.eq.s32.totalorder %v4806_v63, 12  ;;  %v4877_v55 = vsel %vm2196_vm2, 1.0, %v6910_v36  ;;  %6955 = vst [vmem:[#allocation52_spill] sm:$0xff] %v4882_v43  ;;  %v4901_v38 = vsel %vm2028_vm7, 1.0, %v6910_v36  ;;  %v4904_v34 = vsel %vm2029_vm8, 1.0, %v6910_v36 }
  0xc9   :  { %v4761_v57 = vpop.permute.xlu1 %3215  ;;  %v4857_v17 = vsel %vm2192_vm0, 1.0, %v6910_v36  ;;  %6954 = vst [vmem:[#allocation51_spill] sm:$0xff] %v4877_v55  ;;  %6961 = vst [vmem:[#allocation57_spill] sm:$0xff] %v4901_v38  ;;  %vm2357_vm0 = vcmp.eq.s32.totalorder %v4806_v63, 13  ;;  %vm2361_vm2 = vcmp.eq.s32.totalorder %v4825_v30, 13  ;;  %vm2189_vm3 = vcmp.eq.s32.totalorder %v4666_v5, 12 }
  0xca   :  { %6945 = vst [vmem:[#allocation46_spill] sm:$0xff] %v4761_v57  ;;  %3525 = vperm.xlu1 %3157, %v6947_v46   ;;  %v4795_v46 = vsel %vm1868_vm12, 1.0, %v6910_v36  ;;  %v4830_v25 = vpop.permute.xlu0 %3250  ;;  %v4867_v57 = vsel %vm1872_vm15, 1.0, %v6910_v36  ;;  %6962 = vst [vmem:[#allocation58_spill] sm:$0xff] %v4904_v34  ;;  %vm2033_vm12 = vcmp.eq.s32.totalorder %v4614_v60, 11  ;;  %vm2037_vm15 = vcmp.eq.s32.totalorder %v4658_v52, 11 }
  0xcb   :  { %3460 = vperm.xlu0 %3158, %v6946_v58   ;;  %6951 = vst [vmem:[#allocation49_spill] sm:$0xff] %v4830_v25  ;;  %v4872_v25 = vsel %vm2195_vm1, 1.0, %v6910_v36  ;;  %v4958_v23 = vsel %vm2033_vm12, 1.0, %v6910_v36  ;;  %vm2360_vm1 = vcmp.eq.s32.totalorder %v4819_v31, 13  ;;  %vm2193_vm7 = vcmp.eq.s32.totalorder %v4680_v54, 12 }
  0xcc   :  { %6953 = vst [vmem:[#allocation50_spill] sm:$0xff] %v4872_v25  ;;  %vm2194_vm8 = vcmp.eq.s32.totalorder %v4686_v59, 12  ;;  %v4981_v19 = vsel %vm2356_vm13, 1.0, %v6910_v36  ;;  %v4984_v21 = vsel %vm2357_vm0, 1.0, %v6910_v36  ;;  %v5030_v38 = vsel %vm2193_vm7, 1.0, %v6910_v36 }
  0xcd   :  { %v4811_v58 = vpop.permute.xlu1 %3225  ;;  %6977 = vst [vmem:[#allocation68_spill] sm:$0xff] %v5030_v38  ;;  %v5035_v34 = vsel %vm2194_vm8, 1.0, %v6910_v36  ;;  %v6979_v25 = vpack.i.bf16 %v4559_v27, %v4556_v10  ;;  %vm2369_vm10 = vcmp.eq.s32.totalorder %v4918_v22, 13  ;;  %v6980_v43 = vpack.i.bf16 %v4567_v14, %v4564_v13 }
  0xce   :  { %6949 = vst [vmem:[#allocation48_spill] sm:$0xff] %v4811_v58  ;;  %3535 = vperm.xlu1 %3157, %v6952_v48   ;;  %v4844_v58 = vld [vmem:[%s6789_s0 + $0x58] sm:$0xff]  ;;  %v4862_v48 = vsel %vm1871_vm14, 1.0, %v6910_v36  ;;  %vm2036_vm14 = vcmp.eq.s32.totalorder %v4652_v0, 11  ;;  %6978 = vst [vmem:[#allocation69_spill] sm:$0xff] %v5035_v34  ;;  %vm2198_vm12 = vcmp.eq.s32.totalorder %v4614_v60, 12  ;;  %v6985_v55 = vpack.i.bf16 %v4584_v45, %v4581_v24 }
  0xcf   :  { %3470 = vperm.xlu0 %3158, %v6950_v41   ;;  %v4838_v41 = vld [vmem:[%s6789_s0 + $0x50] sm:$0xff]  ;;  %vm2200_vm6 = vcmp.eq.s32.totalorder %v4844_v58, 12  ;;  %vm2521_vm13 = vcmp.eq.s32.totalorder %v4800_v40, 14  ;;  %vm2522_vm0 = vcmp.eq.s32.totalorder %v4806_v63, 14  ;;  %v5075_v14 = vsel %vm2369_vm10, 1.0, %v6910_v36 }
  0xd0   :  { %vm2199_vm5 = vcmp.eq.s32.totalorder %v4838_v41, 12  ;;  %v4898_v44 = vsel %vm2200_vm6, 1.0, %v6910_v36  ;;  %vm2365_vm6 = vcmp.eq.s32.totalorder %v4844_v58, 13  ;;  %6982 = vst [vmem:[#allocation71_spill] sm:$0xff] %v5075_v14  ;;  %v5085_v10 = vsel %vm2197_vm11, 1.0, %v6910_v36  ;;  %v7004_v14 = vld [vmem:[#allocation18_spill] sm:$0xff] }
  0xd1   :  { %v4889_v50 = vpop.permute.xlu1 %3235  ;;  %v4895_v16 = vsel %vm2199_vm5, 1.0, %v6910_v36  ;;  %6960 = vst [vmem:[#allocation56_spill] sm:$0xff] %v4898_v44  ;;  %vm2364_vm5 = vcmp.eq.s32.totalorder %v4838_v41, 13  ;;  %v5088_v49 = vsel %vm2198_vm12, 1.0, %v6910_v36  ;;  %v3163_v24 = vunpack.i.h.bf16 %v4252_v62  ;;  %v5133_v34 = vld [vmem:[%s6795_s6] ss:$0 sm:$0xff] }
  0xd2   :  { %6957 = vst [vmem:[#allocation54_spill] sm:$0xff] %v4889_v50  ;;  %6959 = vst [vmem:[#allocation55_spill] sm:$0xff] %v4895_v16  ;;  %3545 = vperm.xlu1 %3157, %v6963_v8   ;;  %v4931_v50 = vpop.permute.xlu0 %3260  ;;  %v6965_v8 = vpack.i.bf16 %v4486_v6, %v4483_v12  ;;  %v6968_v12 = vpack.i.bf16 %v4526_v20, %v4522_v39  ;;  %v5000_v20 = vsel %vm2360_vm1, 1.0, %v6910_v36  ;;  %v5005_v39 = vsel %vm2361_vm2, 1.0, %v6910_v36  ;;  %v27_v16 = vld [vmem:[%s6792_s3] sm:$0x1] }
  0xd3   :  { %3480 = vperm.xlu0 %3158, %v6958_v11   ;;  %v4949_v11 = vsel %vm2203_vm9, 1.0, %v6910_v36  ;;  %6971 = vst [vmem:[#allocation62_spill] sm:$0xff] %v5000_v20  ;;  %6972 = vst [vmem:[#allocation63_spill] sm:$0xff] %v5005_v39  ;;  %vm2368_vm9 = vcmp.eq.s32.totalorder %v4912_v37, 13  ;;  %vm2525_vm1 = vcmp.eq.s32.totalorder %v4819_v31, 14  ;;  %vm2526_vm2 = vcmp.eq.s32.totalorder %v4825_v30, 14 }
  0xd4   :  { %v5072_v13 = vsel %vm2368_vm9, 1.0, %v6910_v36  ;;  %v5123_v44 = vsel %vm2525_vm1, 1.0, %v6910_v36  ;;  %v5128_v38 = vsel %vm2526_vm2, 1.0, %v6910_v36  ;;  %v6994_v20 = vpack.i.bf16 %v4590_v35, %v4587_v4 }
  0xd5   :  { %v4941_v33 = vpop.permute.xlu1 %3245  ;;  %6981 = vst [vmem:[#allocation70_spill] sm:$0xff] %v5072_v13  ;;  %6988 = vst [vmem:[#allocation75_spill] sm:$0xff] %v5123_v44  ;;  %v149_v39 = vlaneseq  ;;  %vm2358_vm7 = vcmp.eq.s32.totalorder %v4680_v54, 13  ;;  %vm2359_vm8 = vcmp.eq.s32.totalorder %v4686_v59, 13  ;;  %vm2533_vm9 = vcmp.eq.s32.totalorder %v4912_v37, 14  ;;  %v7023_v44 = vld [vmem:[#allocation37_spill] sm:$0xff] }
  0xd6   :  { %6964 = vst [vmem:[#allocation59_spill] sm:$0xff] %v4941_v33  ;;  %3555 = vperm.xlu1 %3157, %v6966_v29   ;;  %v4987_v29 = vsel %vm2036_vm14, 1.0, %v6910_v36  ;;  %v4992_v33 = vpop.permute.xlu0 %3270  ;;  %vm2201_vm14 = vcmp.eq.s32.totalorder %v4652_v0, 12  ;;  %6989 = vst [vmem:[#allocation76_spill] sm:$0xff] %v5128_v38  ;;  %v3183_v13 = vunpack.i.h.bf16 %v7004_v14  ;;  %vm2534_vm10 = vcmp.eq.s32.totalorder %v4918_v22, 14 }
  0xd7   :  { %3490 = vperm.xlu0 %3158, %v6965_v8   ;;  %v4990_v8 = vsel %vm2037_vm15, 1.0, %v6910_v36  ;;  %6969 = vst [vmem:[#allocation61_spill] sm:$0xff] %v4992_v33  ;;  %vm2202_vm15 = vcmp.eq.s32.totalorder %v4658_v52, 12  ;;  %vm2362_vm11 = vcmp.eq.s32.totalorder %v4602_v56, 13  ;;  %vm2363_vm12 = vcmp.eq.s32.totalorder %v4614_v60, 13 }
  0xd8   :  { %v5116_v45 = vsel %vm2202_vm15, 1.0, %v6910_v36  ;;  %vm2367_vm15 = vcmp.eq.s32.totalorder %v4658_v52, 13  ;;  %vm2690_vm1 = vcmp.eq.s32.totalorder %v4819_v31, 15  ;;  %vm2691_vm2 = vcmp.eq.s32.totalorder %v4825_v30, 15 }
  0xd9   :  { %v4975_v6 = vpop.permute.xlu1 %3255  ;;  %6987 = vst [vmem:[#allocation74_spill] sm:$0xff] %v5116_v45 }
  0xda   :  { %6967 = vst [vmem:[#allocation60_spill] sm:$0xff] %v4975_v6  ;;  %v6970_v6 = vpack.i.bf16 %v4553_v9, %v4550_v26  ;;  %v5015_v26 = vsel %vm2190_vm4, 1.0, %v6910_v36  ;;  %v5020_v9 = vsel %vm2364_vm5, 1.0, %v6910_v36  ;;  %v5069_v27 = vpop.permute.xlu0 %3280  ;;  %vm2355_vm4 = vcmp.eq.s32.totalorder %v4672_v7, 13 }
  0xdb   :  { %3500 = vperm.xlu0 %3158, %v6968_v12   ;;  %v5010_v12 = vsel %vm2189_vm3, 1.0, %v6910_v36  ;;  %6974 = vst [vmem:[#allocation65_spill] sm:$0xff] %v5015_v26  ;;  %6975 = vst [vmem:[#allocation66_spill] sm:$0xff] %v5020_v9  ;;  %vm2354_vm3 = vcmp.eq.s32.totalorder %v4666_v5, 13  ;;  %v5137_v9 = vmax.f32 %v27_v16, 0.0  ;;  %vm2529_vm5 = vcmp.eq.s32.totalorder %v4838_v41, 14 }
  0xdc   :  { %3565 = vperm.xlu1 %3157, %v6970_v6   ;;  %6973 = vst [vmem:[#allocation64_spill] sm:$0xff] %v5010_v12  ;;  %v5025_v6 = vsel %vm2365_vm6, 1.0, %v6910_v36  ;;  %v3173_v12 = vunpack.i.h.bf16 %v4286_v18  ;;  %vm2530_vm6 = vcmp.eq.s32.totalorder %v4844_v58, 14  ;;  %v5180_v4 = vsel %vm2529_vm5, 1.0, %v6910_v36 }
  0xdd   :  { %6976 = vst [vmem:[#allocation67_spill] sm:$0xff] %v5025_v6  ;;  %v5045_v33 = vpop.permute.xlu1 %3265  ;;  %6990 = vst [vmem:[#allocation77_spill] sm:$0xff] %v5137_v9  ;;  %v5143_v6 = vsel %vm2355_vm4, 1.0, %v6910_v36  ;;  %v5183_v35 = vsel %vm2530_vm6, 1.0, %v6910_v36  ;;  %vm2520_vm4 = vcmp.eq.s32.totalorder %v4672_v7, 14  ;;  %vm2694_vm5 = vcmp.eq.s32.totalorder %v4838_v41, 15 }
  0xde   :  { %6992 = vst [vmem:[#allocation79_spill] sm:$0xff] %v5143_v6  ;;  %v5153_v16 = vpop.permute.xlu0 %3290  ;;  %6999 = vst [vmem:[#allocation84_spill] sm:$0xff] %v5180_v4  ;;  %v5236_v4 = vsel %vm2362_vm11, 1.0, %v6910_v36  ;;  %v7022_v6 = vld [vmem:[#allocation38_spill] sm:$0xff]  ;;  %vm2695_vm6 = vcmp.eq.s32.totalorder %v4844_v58, 15  ;;  %vm2527_vm11 = vcmp.eq.s32.totalorder %v4602_v56, 14 }
  0xdf   :  { %3510 = vperm.xlu0 %3158, %v6979_v25   ;;  %v6984_v25 = vpack.i.bf16 %v4573_v51, %v4570_v47  ;;  %v5101_v47 = vsel %vm2521_vm13, 1.0, %v6910_v36  ;;  %v5106_v51 = vsel %vm2522_vm0, 1.0, %v6910_v36  ;;  %7000 = vst [vmem:[#allocation85_spill] sm:$0xff] %v5183_v35  ;;  %vm2686_vm13 = vcmp.eq.s32.totalorder %v4800_v40, 15  ;;  %7018 = vst [vmem:[#allocation88_spill] sm:$0xff] %v5236_v4 }
  0xe0   :  { %3575 = vperm.xlu1 %3157, %v6980_v43   ;;  %vm2687_vm0 = vcmp.eq.s32.totalorder %v4806_v63, 15  ;;  %v5239_v35 = vsel %vm2363_vm12, 1.0, %v6910_v36  ;;  %v7024_v38 = vpack.i.bf16 %v7022_v6, %v7023_v44  ;;  %vm2528_vm12 = vcmp.eq.s32.totalorder %v4614_v60, 14 }
  0xe1   :  { %v5079_v43 = vpop.permute.xlu1 %3275  ;;  %7019 = vst [vmem:[#allocation89_spill] sm:$0xff] %v5239_v35  ;;  %v5268_v44 = vsel %vm2687_vm0, 1.0, %v6910_v36  ;;  %vm2532_vm0 = vcmp.eq.s32.totalorder %v4658_v52, 14 }
  0xe2   :  { %6983 = vst [vmem:[#allocation72_spill] sm:$0xff] %v5079_v43  ;;  %v6995_v43 = vpack.i.bf16 %v4634_v53, %v4631_v28  ;;  %v3172_v28 = vunpack.i.l.bf16 %v4286_v18  ;;  %v7002_v18 = vpack.i.bf16 %v4646_v61, %v4637_v32  ;;  %v5194_v53 = vshrl.u32 %v149_v39, 7  ;;  %7027 = vst [vmem:[#allocation37_spill] sm:$0xff] %v5268_v44  ;;  %v7050_v44 = vld [vmem:[#allocation45_spill] sm:$0xff] }
  0xe3   :  { %3520 = vperm.xlu0 %3158, %v6984_v25   ;;  %v5111_v25 = vsel %vm2201_vm14, 1.0, %v6910_v36  ;;  %v3182_v61 = vunpack.i.l.bf16 %v7004_v14  ;;  %v7013_v14 = vld [vmem:[#allocation36_spill] sm:$0xff]  ;;  %v5230_v39 = vsel %vm2533_vm9, 1.0, %v6910_v36  ;;  %vm2366_vm14 = vcmp.eq.s32.totalorder %v4652_v0, 13 }
  0xe4   :  { %3585 = vperm.xlu1 %3157, %v6985_v55   ;;  %6986 = vst [vmem:[#allocation73_spill] sm:$0xff] %v5111_v25  ;;  %v3162_v55 = vunpack.i.l.bf16 %v4252_v62  ;;  %v5140_v62 = vsel %vm2354_vm3, 1.0, %v6910_v36  ;;  %7003 = vst [vmem:[#allocation87_spill] sm:$0xff] %v5194_v53  ;;  %v5206_v32 = vmul.f32 %v3172_v28, %v5133_v34  ;;  %v7036_v25 = vld [vmem:[#allocation25_spill] sm:$0xff]  ;;  %vm2519_vm3 = vcmp.eq.s32.totalorder %v4666_v5, 14 }
  0xe5   :  { %6991 = vst [vmem:[#allocation78_spill] sm:$0xff] %v5140_v62  ;;  %v5146_v26 = vpop.permute.xlu1 %3285  ;;  %7016 = vst [vmem:[#allocation36_spill] sm:$0xff] %v5230_v39  ;;  %v5242_v62 = vmul.f32 %v3183_v13, %v5133_v34  ;;  %v5251_v45 = vmul.f32 %v3182_v61, %v5133_v34  ;;  %v7029_v13 = vld [vmem:[#allocation26_spill] sm:$0xff]  ;;  %v3168_v4 = vunpack.i.h.bf16 %v7036_v25  ;;  %v7038_v39 = vld [vmem:[#allocation41_spill] sm:$0xff]  ;;  %vm2698_vm9 = vcmp.eq.s32.totalorder %v4912_v37, 15 }
  0xe6   :  { %6993 = vst [vmem:[#allocation80_spill] sm:$0xff] %v5146_v26  ;;  %v5170_v26 = vmul.f32 %v3162_v55, %v5133_v34  ;;  %7008 = vst [vmem:[#allocation18_spill] sm:$0xff] %v5206_v32  ;;  %v3213_v40 = vunpack.i.h.bf16 %v7029_v13 }
  0xe7   :  { %3530 = vperm.xlu0 %3158, %v6994_v20   ;;  %v5167_v20 = vmul.f32 %v3163_v24, %v5133_v34  ;;  %v5187_v24 = vmul.f32 %v3173_v12, %v5133_v34  ;;  %v5212_v12 = vsel %vm2358_vm7, 1.0, %v6910_v36  ;;  %7020 = vst [vmem:[#allocation90_spill] sm:$0xff] %v5242_v62  ;;  %v3212_v62 = vunpack.i.l.bf16 %v7029_v13  ;;  %v7037_v13 = vld [vmem:[#allocation42_spill] sm:$0xff] }
  0xe8   :  { %3595 = vperm.xlu1 %3157, %v6995_v43   ;;  %6997 = vst [vmem:[#allocation82_spill] sm:$0xff] %v5170_v26  ;;  %v5177_v43 = vmul.f32 %v5137_v9, %v5137_v9  ;;  %v7006_v26 = vld [vmem:[#allocation33_spill] sm:$0xff]  ;;  %vm2523_vm7 = vcmp.eq.s32.totalorder %v4680_v54, 14 }
  0xe9   :  { %6996 = vst [vmem:[#allocation81_spill] sm:$0xff] %v5167_v20  ;;  %7001 = vst [vmem:[#allocation86_spill] sm:$0xff] %v5187_v24  ;;  %v5189_v55 = vpop.permute.xlu1 %3295  ;;  %v7005_v20 = vld [vmem:[#allocation34_spill] sm:$0xff]  ;;  %v7014_v24 = vld [vmem:[#allocation35_spill] sm:$0xff] }
  0xea   :  { %6998 = vst [vmem:[#allocation83_spill] sm:$0xff] %v5177_v43  ;;  %v7007_v9 = vpack.i.bf16 %v7005_v20, %v7006_v26  ;;  %7009 = vst [vmem:[#allocation34_spill] sm:$0xff] %v5212_v12  ;;  %v5218_v20 = vsel %vm2359_vm8, 1.0, %v6910_v36  ;;  %v7015_v32 = vpack.i.bf16 %v7013_v14, %v7014_v24  ;;  %v5233_v43 = vsel %vm2534_vm10, 1.0, %v6910_v36 }
  0xeb   :  { %3540 = vperm.xlu0 %3158, %v7002_v18   ;;  %v7010_v18 = vld [vmem:[#allocation21_spill] sm:$0xff]  ;;  %7011 = vst [vmem:[#allocation33_spill] sm:$0xff] %v5218_v20  ;;  %7017 = vst [vmem:[#allocation35_spill] sm:$0xff] %v5233_v43  ;;  %v7039_v43 = vpack.i.bf16 %v7037_v13, %v7038_v39  ;;  %vm2524_vm8 = vcmp.eq.s32.totalorder %v4686_v59, 14  ;;  %vm2699_vm10 = vcmp.eq.s32.totalorder %v4918_v22, 15 }
  0xec   :  { %3605 = vperm.xlu1 %3157, %v7007_v9   ;;  %v3193_v26 = vunpack.i.h.bf16 %v7010_v18  ;;  %v5215_v9 = vpop.permute.xlu0 %3300  ;;  %v3192_v24 = vunpack.i.l.bf16 %v7010_v18  ;;  %v5263_v18 = vsel %vm2686_vm13, 1.0, %v6910_v36  ;;  %vm2531_vm13 = vcmp.eq.s32.totalorder %v4652_v0, 14 }
  0xed   :  { %v5222_v28 = vpop.permute.xlu1 %3305  ;;  %7026 = vst [vmem:[#allocation38_spill] sm:$0xff] %v5263_v18  ;;  %v3303_v22 = vunpack.i.h.bf16 %v5215_v9 }
  0xee   :  { %7012 = vst [vmem:[#allocation21_spill] sm:$0xff] %v5222_v28  ;;  %v5256_v28 = vld [vmem:[%s6795_s6 + $0x1] ss:$0 sm:$0xff] }
  0xef   :  { %3550 = vperm.xlu0 %3158, %v7015_v32   ;;  %v7021_v32 = vld [vmem:[#allocation23_spill] sm:$0xff]  ;;  %v5312_v39 = vmul.f32 %v3213_v40, %v5256_v28  ;;  %v7051_v40 = vpack.i.bf16 %v4789_v3, %v4786_v2  ;;  %v5351_v2 = vld [vmem:[%s6795_s6 + $0x2] ss:$0 sm:$0xff] }
  0xf0   :  { %v3203_v14 = vunpack.i.h.bf16 %v7021_v32  ;;  %3615 = vperm.xlu1 %3157, %v7024_v38   ;;  %7025 = vst [vmem:[#allocation23_spill] sm:$0xff] %v5251_v45  ;;  %v5271_v38 = vmul.f32 %v3193_v26, %v5133_v34  ;;  %v3202_v6 = vunpack.i.l.bf16 %v7021_v32  ;;  %v7030_v45 = vld [vmem:[#allocation28_spill] sm:$0xff]  ;;  %v5288_v32 = vmul.f32 %v3192_v24, %v5133_v34  ;;  %v5294_v35 = vpop.permute.xlu0 %3310 }
  0xf1   :  { %v3223_v53 = vunpack.i.h.bf16 %v7030_v45  ;;  %v3222_v63 = vunpack.i.l.bf16 %v7030_v45  ;;  %v5282_v12 = vpop.permute.xlu1 %3315  ;;  %v7031_v26 = vld [vmem:[#allocation40_spill] sm:$0xff] }
  0xf2   :  { %7028 = vst [vmem:[#allocation91_spill] sm:$0xff] %v5271_v38  ;;  %v7032_v38 = vld [vmem:[#allocation39_spill] sm:$0xff]  ;;  %7034 = vst [vmem:[#allocation26_spill] sm:$0xff] %v5288_v32  ;;  %v5291_v61 = vmul.f32 %v3203_v14, %v5256_v28  ;;  %v5306_v24 = vmul.f32 %v3202_v6, %v5256_v28 }
  0xf3   :  { %v7033_v20 = vpack.i.bf16 %v7031_v26, %v7032_v38  ;;  %v3167_v38 = vunpack.i.l.bf16 %v7036_v25  ;;  %7043 = vst [vmem:[#allocation39_spill] sm:$0xff] %v5312_v39  ;;  %v5315_v25 = vmul.f32 %v3212_v62, %v5256_v28  ;;  %v5318_v13 = vmul.f32 %v3223_v53, %v5256_v28 }
  0xf4   :  { %7035 = vst [vmem:[#allocation28_spill] sm:$0xff] %v5291_v61  ;;  %3625 = vperm.xlu1 %3157, %v7039_v43   ;;  %7041 = vst [vmem:[#allocation40_spill] sm:$0xff] %v5306_v24  ;;  %v7042_v61 = vld [vmem:[#allocation27_spill] sm:$0xff]  ;;  %v5321_v45 = vmul.f32 %v3222_v63, %v5256_v28  ;;  %v7047_v24 = vld [vmem:[#allocation44_spill] sm:$0xff]  ;;  %v5333_v62 = vsel %vm2366_vm14, 1.0, %v6910_v36  ;;  %v5336_v53 = vsel %vm2367_vm15, 1.0, %v6910_v36  ;;  %v5340_v63 = vmul.f32 %v3168_v4, %v5133_v34 }
  0xf5   :  { %3560 = vperm.xlu0 %3158, %v7033_v20   ;;  %v7040_v20 = vld [vmem:[#allocation31_spill] sm:$0xff]  ;;  %v3178_v32 = vunpack.i.h.bf16 %v7042_v61  ;;  %v3177_v43 = vunpack.i.l.bf16 %v7042_v61  ;;  %7044 = vst [vmem:[#allocation25_spill] sm:$0xff] %v5315_v25  ;;  %7045 = vst [vmem:[#allocation42_spill] sm:$0xff] %v5318_v13  ;;  %v5323_v6 = vpop.permute.xlu1 %3325  ;;  %v3243_v61 = vunpack.i.h.bf16 %v7050_v44  ;;  %vm2684_vm14 = vcmp.eq.s32.totalorder %v4666_v5, 15 }
  0xf6   :  { %v3233_v26 = vunpack.i.h.bf16 %v7040_v20  ;;  %v3232_v14 = vunpack.i.l.bf16 %v7040_v20  ;;  %7046 = vst [vmem:[#allocation41_spill] sm:$0xff] %v5321_v45  ;;  %v7048_v20 = vld [vmem:[#allocation43_spill] sm:$0xff]  ;;  %7052 = vst [vmem:[#allocation31_spill] sm:$0xff] %v5333_v62  ;;  %v5374_v45 = vsel %vm2690_vm1, 1.0, %v6910_v36  ;;  %vm2685_vm15 = vcmp.eq.s32.totalorder %v4672_v7, 15 }
  0xf7   :  { %v7049_v18 = vpack.i.bf16 %v7047_v24, %v7048_v20  ;;  %7053 = vst [vmem:[#allocation27_spill] sm:$0xff] %v5340_v63  ;;  %v5343_v24 = vmul.f32 %v3167_v38, %v5133_v34  ;;  %v5358_v31 = vmul.f32 %v3178_v32, %v5133_v34  ;;  %v5361_v4 = vmul.f32 %v3177_v43, %v5133_v34  ;;  %v7062_v32 = vld [vmem:[#allocation29_spill] sm:$0xff] }
  0xf8   :  { %3635 = vperm.xlu1 %3157, %v7051_v40   ;;  %v5355_v3 = vmul.f32 %v3232_v14, %v5256_v28  ;;  %v3242_v38 = vunpack.i.l.bf16 %v7050_v44  ;;  %v7059_v40 = vld [vmem:[#allocation47_spill] sm:$0xff]  ;;  %v5379_v44 = vmul.f32 %v3243_v61, %v5351_v2  ;;  %v3188_v43 = vunpack.i.h.bf16 %v7062_v32  ;;  %v7065_v61 = vld [vmem:[#allocation30_spill] sm:$0xff] }
  0xf9   :  { %3570 = vperm.xlu0 %3158, %v7049_v18   ;;  %7054 = vst [vmem:[#allocation44_spill] sm:$0xff] %v5343_v24  ;;  %v5346_v18 = vmul.f32 %v3233_v26, %v5256_v28  ;;  %7057 = vst [vmem:[#allocation92_spill] sm:$0xff] %v5358_v31  ;;  %v5364_v26 = vpop.permute.xlu0 %3320  ;;  %v5366_v20 = vpop.permute.xlu1 %3335  ;;  %v7060_v13 = vpack.i.bf16 %v4795_v46, %v7059_v40  ;;  %v3187_v39 = vunpack.i.l.bf16 %v7062_v32  ;;  %v7064_v40 = vld [vmem:[#allocation49_spill] sm:$0xff]  ;;  %v3197_v32 = vunpack.i.l.bf16 %v7065_v61  ;;  %v7071_v24 = vld [vmem:[#allocation50_spill] sm:$0xff] }
  0xfa   :  { %7056 = vst [vmem:[#allocation45_spill] sm:$0xff] %v5355_v3  ;;  %7058 = vst [vmem:[#allocation93_spill] sm:$0xff] %v5361_v4  ;;  %v7063_v46 = vpack.i.bf16 %v4857_v17, %v4852_v15  ;;  %v3253_v14 = vunpack.i.h.bf16 %v7064_v40  ;;  %v3252_v25 = vunpack.i.l.bf16 %v7064_v40  ;;  %v5398_v15 = vsel %vm2519_vm3, 1.0, %v6910_v36  ;;  %v7069_v4 = vld [vmem:[#allocation32_spill] sm:$0xff] }
  0xfb   :  { %7055 = vst [vmem:[#allocation43_spill] sm:$0xff] %v5346_v18  ;;  %7061 = vst [vmem:[#allocation47_spill] sm:$0xff] %v5379_v44  ;;  %v3198_v44 = vunpack.i.h.bf16 %v7065_v61  ;;  %v5401_v17 = vsel %vm2520_vm4, 1.0, %v6910_v36  ;;  %v5404_v30 = vmul.f32 %v3242_v38, %v5351_v2  ;;  %v3262_v40 = vunpack.i.l.bf16 %v4931_v50 }
  0xfc   :  { %3645 = vperm.xlu1 %3157, %v7063_v46   ;;  %v3263_v46 = vunpack.i.h.bf16 %v4931_v50  ;;  %v7067_v3 = vpack.i.bf16 %v4867_v57, %v4862_v48  ;;  %v5416_v31 = vmul.f32 %v3188_v43, %v5133_v34  ;;  %v3208_v63 = vunpack.i.h.bf16 %v7069_v4 }
  0xfd   :  { %3580 = vperm.xlu0 %3158, %v7060_v13   ;;  %v5389_v13 = vsel %vm2691_vm2, 1.0, %v6910_v36  ;;  %7066 = vst [vmem:[#allocation29_spill] sm:$0xff] %v5404_v30  ;;  %v5408_v18 = vpop.permute.xlu1 %3345  ;;  %v5419_v38 = vpop.permute.xlu0 %3330  ;;  %v7070_v30 = vld [vmem:[#allocation51_spill] sm:$0xff]  ;;  %v5427_v50 = vsel %vm2694_vm5, 1.0, %v6910_v36  ;;  %v5432_v57 = vsel %vm2695_vm6, 1.0, %v6910_v36  ;;  %v5435_v48 = vmul.f32 %v3187_v39, %v5133_v34 }
  0xfe   :  { %7068 = vst [vmem:[#allocation49_spill] sm:$0xff] %v5416_v31  ;;  %v7072_v62 = vpack.i.bf16 %v7070_v30, %v7071_v24  ;;  %7073 = vst [vmem:[#allocation30_spill] sm:$0xff] %v5427_v50  ;;  %v5441_v43 = vmul.f32 %v3252_v25, %v5351_v2  ;;  %v5446_v41 = vmul.f32 %v3198_v44, %v5133_v34  ;;  %v3207_v58 = vunpack.i.l.bf16 %v7069_v4  ;;  %v7079_v30 = vld [vmem:[#allocation61_spill] sm:$0xff] }
  0xff   :  { %7074 = vst [vmem:[#allocation32_spill] sm:$0xff] %v5435_v48  ;;  %v5449_v24 = vmul.f32 %v3197_v32, %v5133_v34  ;;  %v3273_v39 = vunpack.i.h.bf16 %v7079_v30  ;;  %v5454_v61 = vmul.f32 %v3263_v46, %v5351_v2  ;;  %v5468_v4 = vmul.f32 %v3208_v63, %v5256_v28  ;;  %v7086_v32 = vld [vmem:[#allocation56_spill] sm:$0xff]  ;;  %v7087_v46 = vld [vmem:[#allocation55_spill] sm:$0xff]  ;;  %v7094_v48 = vld [vmem:[#allocation57_spill] sm:$0xff] }
 0x100   :  { %3655 = vperm.xlu1 %3157, %v7072_v62   ;;  %7076 = vst [vmem:[#allocation50_spill] sm:$0xff] %v5441_v43  ;;  %7077 = vst [vmem:[#allocation94_spill] sm:$0xff] %v5446_v41  ;;  %v7083_v62 = vld [vmem:[#allocation52_spill] sm:$0xff]  ;;  %v3272_v44 = vunpack.i.l.bf16 %v7079_v30  ;;  %v3283_v34 = vunpack.i.h.bf16 %v5069_v27  ;;  %v5481_v63 = vmul.f32 %v3207_v58, %v5256_v28  ;;  %v7096_v41 = vld [vmem:[#allocation54_spill] sm:$0xff]  ;;  %vm2688_vm1 = vcmp.eq.s32.totalorder %v4680_v54, 15 }
 0x101   :  { %3590 = vperm.xlu0 %3158, %v7067_v3   ;;  %v5438_v3 = vmul.f32 %v3253_v14, %v5351_v2  ;;  %7078 = vst [vmem:[#allocation95_spill] sm:$0xff] %v5449_v24  ;;  %7080 = vst [vmem:[#allocation61_spill] sm:$0xff] %v5454_v61  ;;  %v5457_v14 = vmul.f32 %v3262_v40, %v5351_v2  ;;  %v5459_v25 = vpop.permute.xlu1 %3355  ;;  %v7088_v40 = vpack.i.bf16 %v7086_v32, %v7087_v46  ;;  %v5489_v32 = vld [vmem:[%s6795_s6 + $0x3] ss:$0 sm:$0xff]  ;;  %v7092_v61 = vld [vmem:[#allocation48_spill] sm:$0xff] }
 0x102   :  { %7090 = vst [vmem:[#allocation52_spill] sm:$0xff] %v5481_v63  ;;  %v5484_v30 = vmul.f32 %v3273_v39, %v5351_v2  ;;  %v3282_v46 = vunpack.i.l.bf16 %v5069_v27  ;;  %v3227_v58 = vunpack.i.l.bf16 %v7092_v61  ;;  %v7093_v39 = vld [vmem:[#allocation58_spill] sm:$0xff]  ;;  %v5512_v27 = vsel %vm2698_vm9, 1.0, %v6910_v36 }
 0x103   :  { %7075 = vst [vmem:[#allocation51_spill] sm:$0xff] %v5438_v3  ;;  %7081 = vst [vmem:[#allocation96_spill] sm:$0xff] %v5457_v14  ;;  %v7082_v3 = vld [vmem:[#allocation53_spill] sm:$0xff]  ;;  %v3228_v14 = vunpack.i.h.bf16 %v7092_v61  ;;  %v3293_v63 = vunpack.i.h.bf16 %v5153_v16  ;;  %v3292_v61 = vunpack.i.l.bf16 %v5153_v16  ;;  %v3238_v24 = vunpack.i.h.bf16 %v7096_v41 }
 0x104   :  { %v7084_v43 = vpack.i.bf16 %v7082_v3, %v7083_v62  ;;  %7085 = vst [vmem:[#allocation53_spill] sm:$0xff] %v5468_v4  ;;  %3665 = vperm.xlu1 %3157, %v7088_v40   ;;  %v7089_v3 = vld [vmem:[#allocation46_spill] sm:$0xff]  ;;  %7091 = vst [vmem:[#allocation56_spill] sm:$0xff] %v5484_v30  ;;  %v5492_v40 = vpop.permute.xlu0 %3340  ;;  %v7095_v30 = vpack.i.bf16 %v7093_v39, %v7094_v48  ;;  %v5507_v4 = vsel %vm2524_vm8, 1.0, %v6910_v36  ;;  %vm2689_vm2 = vcmp.eq.s32.totalorder %v4686_v59, 15 }
 0x105   :  { %v3217_v62 = vunpack.i.l.bf16 %v7089_v3  ;;  %v5499_v31 = vpop.permute.xlu1 %3365  ;;  %v7097_v48 = vpack.i.bf16 %v4952_v42, %v4949_v11  ;;  %v5526_v39 = vmul.f32 %v3272_v44, %v5351_v2  ;;  %v5535_v16 = vmul.f32 %v3283_v34, %v5489_v32  ;;  %v7106_v44 = vld [vmem:[#allocation59_spill] sm:$0xff] }
 0x106   :  { %3600 = vperm.xlu0 %3158, %v7084_v43   ;;  %v3218_v43 = vunpack.i.h.bf16 %v7089_v3  ;;  %v5495_v3 = vsel %vm2523_vm7, 1.0, %v6910_v36  ;;  %v5538_v42 = vmul.f32 %v3282_v46, %v5489_v32  ;;  %v3237_v11 = vunpack.i.l.bf16 %v7096_v41  ;;  %v7109_v41 = vld [vmem:[#allocation60_spill] sm:$0xff] }
 0x107   :  { %7098 = vst [vmem:[#allocation55_spill] sm:$0xff] %v5526_v39  ;;  %v5532_v50 = vmul.f32 %v3217_v62, %v5256_v28  ;;  %7099 = vst [vmem:[#allocation46_spill] sm:$0xff] %v5535_v16  ;;  %v3302_v62 = vunpack.i.l.bf16 %v5215_v9  ;;  %v7103_v46 = vpack.i.bf16 %v4958_v23, %v4955_v1  ;;  %v5559_v16 = vmul.f32 %v3293_v63, %v5489_v32  ;;  %v7134_v39 = vld [vmem:[#allocation68_spill] sm:$0xff] }
 0x108   :  { %3675 = vperm.xlu1 %3157, %v7097_v48   ;;  %v5529_v37 = vmul.f32 %v3218_v43, %v5256_v28  ;;  %7100 = vst [vmem:[#allocation48_spill] sm:$0xff] %v5538_v42  ;;  %v5545_v48 = vmul.f32 %v3228_v14, %v5256_v28  ;;  %v5548_v43 = vmul.f32 %v3227_v58, %v5256_v28  ;;  %v3248_v9 = vunpack.i.h.bf16 %v7106_v44  ;;  %v5568_v42 = vpop.permute.xlu0 %3350 }
 0x109   :  { %v5551_v34 = vpop.permute.xlu1 %3375  ;;  %7104 = vst [vmem:[#allocation54_spill] sm:$0xff] %v5559_v16  ;;  %v5562_v14 = vmul.f32 %v3292_v61, %v5489_v32  ;;  %v5565_v58 = vmul.f32 %v3238_v24, %v5256_v28  ;;  %v7107_v1 = vpack.i.bf16 %v4984_v21, %v4981_v19  ;;  %v3247_v23 = vunpack.i.l.bf16 %v7106_v44 }
 0x10a   :  { %3610 = vperm.xlu0 %3158, %v7095_v30   ;;  %v5523_v30 = vsel %vm2699_vm10, 1.0, %v6910_v36  ;;  %7101 = vst [vmem:[#allocation58_spill] sm:$0xff] %v5545_v48  ;;  %7102 = vst [vmem:[#allocation57_spill] sm:$0xff] %v5548_v43  ;;  %v5578_v63 = vmul.f32 %v3237_v11, %v5256_v28  ;;  %v5581_v24 = vmul.f32 %v3303_v22, %v5489_v32  ;;  %v3312_v61 = vunpack.i.l.bf16 %v5294_v35  ;;  %v7122_v43 = vld [vmem:[#allocation65_spill] sm:$0xff] }
 0x10b   :  { %7105 = vst [vmem:[#allocation97_spill] sm:$0xff] %v5562_v14  ;;  %v3258_v16 = vunpack.i.h.bf16 %v7109_v41  ;;  %v5586_v19 = vmul.f32 %v3302_v62, %v5489_v32  ;;  %v3257_v21 = vunpack.i.l.bf16 %v7109_v41  ;;  %v3323_v44 = vunpack.i.h.bf16 %v5364_v26  ;;  %v7113_v62 = vld [vmem:[#allocation63_spill] sm:$0xff]  ;;  %v7114_v41 = vld [vmem:[#allocation62_spill] sm:$0xff] }
 0x10c   :  { %3685 = vperm.xlu1 %3157, %v7107_v1   ;;  %7108 = vst [vmem:[#allocation59_spill] sm:$0xff] %v5581_v24  ;;  %v3322_v1 = vunpack.i.l.bf16 %v5364_v26  ;;  %v7111_v28 = vpack.i.bf16 %v4990_v8, %v4987_v29  ;;  %v5597_v11 = vmul.f32 %v3248_v9, %v5351_v2  ;;  %v3268_v22 = vunpack.i.h.bf16 %v5045_v33 }
 0x10d   :  { %7110 = vst [vmem:[#allocation60_spill] sm:$0xff] %v5586_v19  ;;  %v5591_v14 = vpop.permute.xlu1 %3385  ;;  %v7115_v24 = vpack.i.bf16 %v7113_v62, %v7114_v41  ;;  %v5611_v26 = vsel %vm2527_vm11, 1.0, %v6910_v36  ;;  %v5616_v29 = vsel %vm2528_vm12, 1.0, %v6910_v36  ;;  %v5619_v8 = vmul.f32 %v3247_v23, %v5351_v2  ;;  %v5634_v19 = vpop.permute.xlu0 %3360 }
 0x10e   :  { %3620 = vperm.xlu0 %3158, %v7103_v46   ;;  %v3313_v46 = vunpack.i.h.bf16 %v5294_v35  ;;  %7112 = vst [vmem:[#allocation98_spill] sm:$0xff] %v5597_v11  ;;  %v5602_v35 = vld [vmem:[%s6795_s6 + $0x4] ss:$0 sm:$0xff]  ;;  %v3267_v62 = vunpack.i.l.bf16 %v5045_v33  ;;  %v3333_v41 = vunpack.i.h.bf16 %v5419_v38  ;;  %v5637_v23 = vmul.f32 %v3257_v21, %v5351_v2  ;;  %v7132_v33 = vld [vmem:[#allocation80_spill] sm:$0xff] }
 0x10f   :  { %v5643_v48 = vmul.f32 %v3322_v1, %v5602_v35  ;;  %v3332_v21 = vunpack.i.l.bf16 %v5419_v38  ;;  %v5662_v1 = vsel %vm2531_vm13, 1.0, %v6910_v36  ;;  %v5706_v59 = vsel %vm2685_vm15, 1.0, %v6910_v36 }
 0x110   :  { %3695 = vperm.xlu1 %3157, %v7115_v24   ;;  %v5622_v9 = vmul.f32 %v3313_v46, %v5489_v32  ;;  %v5627_v24 = vmul.f32 %v3312_v61, %v5489_v32  ;;  %7119 = vst [vmem:[#allocation100_spill] sm:$0xff] %v5637_v23  ;;  %v5640_v46 = vmul.f32 %v3323_v44, %v5602_v35  ;;  %v7127_v44 = vld [vmem:[#allocation66_spill] sm:$0xff]  ;;  %v5723_v7 = vsel %vm2688_vm1, 1.0, %v6910_v36 }
 0x111   :  { %7121 = vst [vmem:[#allocation102_spill] sm:$0xff] %v5643_v48  ;;  %v5645_v61 = vpop.permute.xlu1 %3395  ;;  %v5674_v38 = vmul.f32 %v3267_v62, %v5351_v2  ;;  %v3288_v48 = vunpack.i.h.bf16 %v7132_v33  ;;  %v5691_v62 = vmul.f32 %v3332_v21, %v5602_v35  ;;  %v3353_v21 = vunpack.i.h.bf16 %v5568_v42 }
 0x112   :  { %3630 = vperm.xlu0 %3158, %v7111_v28   ;;  %7116 = vst [vmem:[#allocation63_spill] sm:$0xff] %v5622_v9  ;;  %7117 = vst [vmem:[#allocation62_spill] sm:$0xff] %v5627_v24  ;;  %v5630_v28 = vmul.f32 %v3258_v16, %v5351_v2  ;;  %v7123_v16 = vld [vmem:[#allocation64_spill] sm:$0xff]  ;;  %v5653_v24 = vmul.f32 %v3268_v22, %v5351_v2  ;;  %vm2692_vm3 = vcmp.eq.s32.totalorder %v4602_v56, 15  ;;  %vm2693_vm4 = vcmp.eq.s32.totalorder %v4614_v60, 15 }
 0x113   :  { %7120 = vst [vmem:[#allocation101_spill] sm:$0xff] %v5640_v46  ;;  %v7124_v9 = vpack.i.bf16 %v7122_v43, %v7123_v16  ;;  %v5667_v43 = vsel %vm2532_vm0, 1.0, %v6910_v36  ;;  %7130 = vst [vmem:[#allocation64_spill] sm:$0xff] %v5674_v38  ;;  %v5758_v56 = vld [vmem:[%s6795_s6 + $0x5] ss:$0 sm:$0xff]  ;;  %vm2696_vm5 = vcmp.eq.s32.totalorder %v4652_v0, 15  ;;  %v3317_v60 = vunpack.i.l.bf16 %v5282_v12 }
 0x114   :  { %7118 = vst [vmem:[#allocation99_spill] sm:$0xff] %v5630_v28  ;;  %7125 = vst [vmem:[#allocation65_spill] sm:$0xff] %v5653_v24  ;;  %v7126_v28 = vld [vmem:[#allocation67_spill] sm:$0xff]  ;;  %v3287_v24 = vunpack.i.l.bf16 %v7132_v33  ;;  %vm2697_vm6 = vcmp.eq.s32.totalorder %v4658_v52, 15 }
 0x115   :  { %v7128_v46 = vpack.i.bf16 %v7126_v28, %v7127_v44  ;;  %v5677_v28 = vmul.f32 %v3333_v41, %v5602_v35  ;;  %v3342_v44 = vunpack.i.l.bf16 %v5492_v40  ;;  %v5683_v23 = vpop.permute.xlu1 %3405  ;;  %7136 = vst [vmem:[#allocation66_spill] sm:$0xff] %v5691_v62  ;;  %v3371_v41 = vpop.permute.xlu0 %3370 }
 0x116   :  { %3640 = vperm.xlu0 %3158, %v7124_v9   ;;  %v7129_v9 = vld [vmem:[#allocation72_spill] sm:$0xff]  ;;  %v3372_v33 = vunpack.i.l.bf16 %v3371_v41 }
 0x117   :  { %3705 = vperm.xlu1 %3157, %v7128_v46   ;;  %v3278_v16 = vunpack.i.h.bf16 %v7129_v9  ;;  %v3277_v22 = vunpack.i.l.bf16 %v7129_v9  ;;  %7131 = vst [vmem:[#allocation67_spill] sm:$0xff] %v5677_v28  ;;  %v3343_v46 = vunpack.i.h.bf16 %v5492_v40  ;;  %v7133_v9 = vld [vmem:[#allocation69_spill] sm:$0xff]  ;;  %v7137_v28 = vld [vmem:[#allocation71_spill] sm:$0xff]  ;;  %v7138_v40 = vld [vmem:[#allocation70_spill] sm:$0xff]  ;;  %v5720_v5 = vmul.f32 %v3342_v44, %v5602_v35 }
 0x118   :  { %v7135_v11 = vpack.i.bf16 %v7133_v9, %v7134_v39  ;;  %v7139_v38 = vpack.i.bf16 %v7137_v28, %v7138_v40  ;;  %v5701_v39 = vsel %vm2684_vm14, 1.0, %v6910_v36  ;;  %v5726_v9 = vsel %vm2689_vm2, 1.0, %v6910_v36 }
 0x119   :  { %v5709_v54 = vmul.f32 %v3278_v16, %v5351_v2  ;;  %v5717_v28 = vmul.f32 %v3343_v46, %v5602_v35  ;;  %7141 = vst [vmem:[#allocation80_spill] sm:$0xff] %v5720_v5  ;;  %v5729_v16 = vmul.f32 %v3288_v48, %v5489_v32  ;;  %v3298_v44 = vunpack.i.h.bf16 %v5189_v55  ;;  %v7148_v5 = vld [vmem:[#allocation73_spill] sm:$0xff] }
 0x11a   :  { %3650 = vperm.xlu0 %3158, %v7135_v11   ;;  %v5712_v11 = vmul.f32 %v3277_v22, %v5351_v2  ;;  %v5732_v2 = vmul.f32 %v3287_v24, %v5489_v32  ;;  %v5734_v22 = vpop.permute.xlu1 %3415  ;;  %v3297_v40 = vunpack.i.l.bf16 %v5189_v55  ;;  %v3363_v48 = vunpack.i.h.bf16 %v5634_v19 }
 0x11b   :  { %3715 = vperm.xlu1 %3157, %v7139_v38   ;;  %v3352_v38 = vunpack.i.l.bf16 %v5568_v42  ;;  %7140 = vst [vmem:[#allocation72_spill] sm:$0xff] %v5717_v28  ;;  %v7142_v42 = vpack.i.bf16 %v5088_v49, %v5085_v10  ;;  %v7143_v24 = vpack.i.bf16 %v5106_v51, %v5101_v47  ;;  %v5750_v49 = vmul.f32 %v3353_v21, %v5602_v35  ;;  %v7146_v47 = vld [vmem:[#allocation21_spill] sm:$0xff] }
 0x11c   :  { %v3362_v55 = vunpack.i.l.bf16 %v5634_v19  ;;  %v3308_v51 = vunpack.i.h.bf16 %v7146_v47  ;;  %v5765_v46 = vsel %vm2692_vm3, 1.0, %v6910_v36  ;;  %v3307_v21 = vunpack.i.l.bf16 %v7146_v47  ;;  %v7147_v19 = vld [vmem:[#allocation74_spill] sm:$0xff]  ;;  %v7152_v47 = vld [vmem:[#allocation76_spill] sm:$0xff] }
 0x11d   :  { %7144 = vst [vmem:[#allocation69_spill] sm:$0xff] %v5750_v49  ;;  %v5753_v10 = vmul.f32 %v3352_v38, %v5602_v35  ;;  %v3373_v38 = vunpack.i.h.bf16 %v3371_v41  ;;  %v7149_v62 = vpack.i.bf16 %v7147_v19, %v7148_v5  ;;  %v5781_v49 = vmul.f32 %v3298_v44, %v5489_v32 }
 0x11e   :  { %3660 = vperm.xlu0 %3158, %v7142_v42   ;;  %v5770_v28 = vpop.permute.xlu1 %3425  ;;  %v5778_v42 = vsel %vm2693_vm4, 1.0, %v6910_v36  ;;  %v5784_v0 = vmul.f32 %v3297_v40, %v5489_v32  ;;  %v5787_v52 = vmul.f32 %v3363_v48, %v5758_v56  ;;  %v3318_v41 = vunpack.i.h.bf16 %v5282_v12 }
 0x11f   :  { %3725 = vperm.xlu1 %3157, %v7143_v24   ;;  %7145 = vst [vmem:[#allocation68_spill] sm:$0xff] %v5753_v10  ;;  %v3381_v24 = vpop.permute.xlu0 %3380  ;;  %7150 = vst [vmem:[#allocation71_spill] sm:$0xff] %v5781_v49  ;;  %v7153_v10 = vld [vmem:[#allocation75_spill] sm:$0xff]  ;;  %v5798_v44 = vsel %vm2696_vm5, 1.0, %v6910_v36  ;;  %v5801_v40 = vsel %vm2697_vm6, 1.0, %v6910_v36  ;;  %v5804_v48 = vmul.f32 %v3308_v51, %v5489_v32  ;;  %v5812_v12 = vmul.f32 %v3373_v38, %v5758_v56  ;;  %v7166_v38 = vld [vmem:[#allocation84_spill] sm:$0xff] }
 0x120   :  { %7151 = vst [vmem:[#allocation70_spill] sm:$0xff] %v5787_v52  ;;  %v7154_v5 = vpack.i.bf16 %v7152_v47, %v7153_v10  ;;  %7156 = vst [vmem:[#allocation74_spill] sm:$0xff] %v5798_v44  ;;  %v3383_v19 = vunpack.i.h.bf16 %v3381_v24  ;;  %v3382_v52 = vunpack.i.l.bf16 %v3381_v24  ;;  %v5815_v47 = vmul.f32 %v3372_v33, %v5758_v56  ;;  %v7162_v51 = vld [vmem:[#allocation79_spill] sm:$0xff]  ;;  %v7175_v44 = vld [vmem:[#allocation36_spill] sm:$0xff] }
 0x121   :  { %7157 = vst [vmem:[#allocation73_spill] sm:$0xff] %v5801_v40  ;;  %7158 = vst [vmem:[#allocation76_spill] sm:$0xff] %v5804_v48  ;;  %v5823_v24 = vmul.f32 %v3318_v41, %v5489_v32  ;;  %v3328_v10 = vunpack.i.h.bf16 %v5323_v6  ;;  %v7168_v41 = vld [vmem:[#allocation83_spill] sm:$0xff] }
 0x122   :  { %3670 = vperm.xlu0 %3158, %v7149_v62   ;;  %v5794_v62 = vmul.f32 %v3362_v55, %v5758_v56  ;;  %v5809_v55 = vmul.f32 %v3307_v21, %v5489_v32  ;;  %7160 = vst [vmem:[#allocation103_spill] sm:$0xff] %v5812_v12  ;;  %7161 = vst [vmem:[#allocation104_spill] sm:$0xff] %v5815_v47  ;;  %v3327_v21 = vunpack.i.l.bf16 %v5323_v6 }
 0x123   :  { %3735 = vperm.xlu1 %3157, %v7154_v5   ;;  %v40_v49 = vpop.xlane.xlu0 %39  ;;  %v5817_v5 = vpop.permute.xlu1 %3435  ;;  %v5839_v47 = vmul.f32 %v3383_v19, %v5758_v56  ;;  %v5842_v6 = vmul.f32 %v3382_v52, %v5758_v56  ;;  %v5855_v52 = vmul.f32 %v3328_v10, %v5602_v35  ;;  %v3377_v10 = vunpack.i.l.bf16 %v5551_v34 }
 0x124   :  { %7155 = vst [vmem:[#allocation21_spill] sm:$0xff] %v5794_v62  ;;  %7159 = vst [vmem:[#allocation75_spill] sm:$0xff] %v5809_v55  ;;  %v41_v36 = vmul.f32 0.0625, %v40_v49  ;;  %v7163_v62 = vld [vmem:[#allocation78_spill] sm:$0xff]  ;;  %v7165_v55 = vld [vmem:[#allocation85_spill] sm:$0xff]  ;;  %v5833_v49 = vmul.f32 %v3317_v60, %v5489_v32  ;;  %v3357_v32 = vunpack.i.l.bf16 %v5459_v25  ;;  %v3368_v60 = vunpack.i.h.bf16 %v5499_v31 }
 0x125   :  { %v7164_v48 = vpack.i.bf16 %v7162_v51, %v7163_v62  ;;  %v7167_v12 = vpack.i.bf16 %v7165_v55, %v7166_v38  ;;  %v3338_v62 = vunpack.i.h.bf16 %v5366_v20  ;;  %7169 = vst [vmem:[#allocation79_spill] sm:$0xff] %v5839_v47  ;;  %7170 = vst [vmem:[#allocation78_spill] sm:$0xff] %v5842_v6  ;;  %v3348_v55 = vunpack.i.h.bf16 %v5408_v18 }
 0x126   :  { %v43_v51 = vmul.f32 %v7168_v41, %v41_v36  ;;  %v3358_v38 = vunpack.i.h.bf16 %v5459_v25  ;;  %v7171_v36 = vld [vmem:[#allocation33_spill] sm:$0xff]  ;;  %v7172_v41 = vld [vmem:[#allocation34_spill] sm:$0xff]  ;;  %v5858_v47 = vmul.f32 %v3327_v21, %v5602_v35  ;;  %v3378_v6 = vunpack.i.h.bf16 %v5551_v34  ;;  %v7174_v25 = vld [vmem:[#allocation35_spill] sm:$0xff] }
 0x127   :  { %3680 = vperm.xlu0 %3158, %v7164_v48   ;;  %3745 = vperm.xlu1 %3157, %v7167_v12   ;;  %v3337_v48 = vunpack.i.l.bf16 %v5366_v20  ;;  %v3347_v12 = vunpack.i.l.bf16 %v5408_v18  ;;  %v5849_v20 = vpop.permute.xlu1 %3445  ;;  %v7173_v19 = vpack.i.bf16 %v7171_v36, %v7172_v41  ;;  %v3367_v18 = vunpack.i.l.bf16 %v5499_v31 }
 0x128   :  { %v44_v33 = vadd.f32 1e-05, %v43_v51  ;;  %v7176_v40 = vpack.i.bf16 %v7174_v25, %v7175_v44  ;;  %v5866_v51 = vmul.f32 %v3338_v62, %v5602_v35  ;;  %v5873_v21 = vmul.f32 %v3348_v55, %v5602_v35 }
 0x129   :  { %v5869_v36 = vmul.f32 %v3337_v48, %v5602_v35  ;;  %v5876_v31 = vmul.f32 %v3347_v12, %v5602_v35  ;;  %v3388_v41 = vunpack.i.h.bf16 %v5591_v14  ;;  %v3387_v44 = vunpack.i.l.bf16 %v5591_v14  ;;  %v7181_v12 = vld [vmem:[#allocation88_spill] sm:$0xff] }
 0x12a   :  { %3799 = vrsqrt.f32 %v44_v33  ;;  %7177 = vst [vmem:[#allocation85_spill] sm:$0xff] %v5873_v21  ;;  %v5881_v62 = vmul.f32 %v3358_v38, %v5602_v35  ;;  %v5884_v48 = vmul.f32 %v3357_v32, %v5602_v35  ;;  %v5887_v34 = vmul.f32 %v3368_v60, %v5758_v56  ;;  %v7185_v32 = vld [vmem:[#allocation37_spill] sm:$0xff]  ;;  %v7186_v60 = vld [vmem:[#allocation38_spill] sm:$0xff] }
 0x12b   :  { %3690 = vperm.xlu0 %3158, %v7173_v19   ;;  %3755 = vperm.xlu1 %3157, %v7176_v40   ;;  %7178 = vst [vmem:[#allocation84_spill] sm:$0xff] %v5876_v31  ;;  %v3391_v40 = vpop.permute.xlu0 %3390  ;;  %v3398_v33 = vunpack.i.h.bf16 %v5645_v61  ;;  %v3456_v55 = vpop.permute.xlu1 %3455  ;;  %v7180_v19 = vld [vmem:[#allocation89_spill] sm:$0xff]  ;;  %v5894_v21 = vmul.f32 %v3367_v18, %v5758_v56  ;;  %v5897_v14 = vmul.f32 %v3378_v6, %v5758_v56  ;;  %v3397_v38 = vunpack.i.l.bf16 %v5645_v61 }
 0x12c   :  { %7179 = vst [vmem:[#allocation83_spill] sm:$0xff] %v5887_v34  ;;  %v7182_v25 = vpack.i.bf16 %v7180_v19, %v7181_v12  ;;  %v3408_v35 = vunpack.i.h.bf16 %v5683_v23  ;;  %v7187_v31 = vpack.i.bf16 %v7185_v32, %v7186_v60  ;;  %v5905_v34 = vmul.f32 %v3377_v10, %v5758_v56  ;;  %v5910_v19 = vld [vmem:[%s6795_s6 + $0x6] ss:$0 sm:$0xff] }
 0x12d   :  { %7183 = vst [vmem:[#allocation33_spill] sm:$0xff] %v5894_v21  ;;  %7184 = vst [vmem:[#allocation34_spill] sm:$0xff] %v5897_v14  ;;  %v3407_v18 = vunpack.i.l.bf16 %v5683_v23  ;;  %v3418_v6 = vunpack.i.h.bf16 %v5734_v22  ;;  %v3417_v61 = vunpack.i.l.bf16 %v5734_v22  ;;  %v5916_v12 = vmul.f32 %v3388_v41, %v5758_v56  ;;  %v7193_v41 = vld [vmem:[#allocation31_spill] sm:$0xff] }
 0x12e   :  { %7188 = vst [vmem:[#allocation35_spill] sm:$0xff] %v5905_v34  ;;  %7189 = vst [vmem:[#allocation36_spill] sm:$0xff] %v5910_v19  ;;  %v3428_v10 = vunpack.i.h.bf16 %v5770_v28  ;;  %v5924_v60 = vmul.f32 %v3398_v33, %v5758_v56  ;;  %v3438_v23 = vunpack.i.h.bf16 %v5817_v5  ;;  %v3437_v14 = vunpack.i.l.bf16 %v5817_v5  ;;  %v5941_v33 = vld [vmem:[%s6795_s6 + $0x7] ss:$0 sm:$0xff] }
 0x12f   :  { %3700 = vperm.xlu0 %3158, %v7182_v25   ;;  %3765 = vperm.xlu1 %3157, %v7187_v31   ;;  %7190 = vst [vmem:[#allocation89_spill] sm:$0xff] %v5916_v12  ;;  %v5919_v25 = vmul.f32 %v3387_v44, %v5758_v56  ;;  %v3427_v31 = vunpack.i.l.bf16 %v5770_v28  ;;  %v3401_v32 = vpop.permute.xlu0 %3400  ;;  %v3448_v22 = vunpack.i.h.bf16 %v5849_v20  ;;  %v3466_v34 = vpop.permute.xlu1 %3465  ;;  %v7194_v12 = vpack.i.bf16 %v5336_v53, %v7193_v41 }
 0x130   :  { %7192 = vst [vmem:[#allocation37_spill] sm:$0xff] %v5924_v60  ;;  %v5933_v44 = vmul.f32 %v3397_v38, %v5758_v56  ;;  %v5936_v28 = vmul.f32 %v3408_v35, %v5910_v19  ;;  %7196 = vst [vmem:[#allocation31_spill] sm:$0xff] %v5941_v33  ;;  %v3447_v5 = vunpack.i.l.bf16 %v5849_v20  ;;  %v7197_v21 = vpack.i.bf16 %v5389_v13, %v5374_v45 }
 0x131   :  { %7191 = vst [vmem:[#allocation88_spill] sm:$0xff] %v5919_v25  ;;  %v3393_v25 = vunpack.i.h.bf16 %v3391_v40  ;;  %v5948_v53 = vmul.f32 %v3407_v18, %v5910_v19  ;;  %v5951_v38 = vmul.f32 %v3418_v6, %v5910_v19  ;;  %v5954_v35 = vmul.f32 %v3417_v61, %v5910_v19 }
 0x132   :  { %7195 = vst [vmem:[#allocation38_spill] sm:$0xff] %v5936_v28  ;;  %v5957_v41 = vmul.f32 %v3428_v10, %v5910_v19  ;;  %v5960_v20 = vmul.f32 %v3427_v31, %v5910_v19  ;;  %v3458_v28 = vunpack.i.h.bf16 %v3456_v55  ;;  %v3457_v60 = vunpack.i.l.bf16 %v3456_v55 }
 0x133   :  { %3710 = vperm.xlu0 %3158, %v7194_v12   ;;  %3775 = vperm.xlu1 %3157, %v7197_v21   ;;  %7198 = vst [vmem:[#allocation105_spill] sm:$0xff] %v5951_v38  ;;  %v3392_v12 = vunpack.i.l.bf16 %v3391_v40  ;;  %v3411_v45 = vpop.permute.xlu0 %3410  ;;  %v5963_v13 = vmul.f32 %v3438_v23, %v5910_v19  ;;  %v5966_v21 = vmul.f32 %v3437_v14, %v5910_v19  ;;  %v3403_v6 = vunpack.i.h.bf16 %v3401_v32  ;;  %v3476_v40 = vpop.permute.xlu1 %3475  ;;  %v7204_v14 = vld [vmem:[#allocation30_spill] sm:$0xff] }
 0x134   :  { %7199 = vst [vmem:[#allocation106_spill] sm:$0xff] %v5957_v41  ;;  %7200 = vst [vmem:[#allocation107_spill] sm:$0xff] %v5960_v20  ;;  %v5969_v18 = vmul.f32 %v3448_v22, %v5941_v33  ;;  %v7202_v61 = vpack.i.bf16 %v5401_v17, %v5398_v15  ;;  %v5975_v10 = vmul.f32 %v3447_v5, %v5941_v33  ;;  %v3402_v31 = vunpack.i.l.bf16 %v3401_v32  ;;  %v47_v17 = vld [vmem:[%s6793_s4] sm:$0x1] }
 0x135   :  { %v5978_v55 = vmul.f32 %v3393_v25, %v5758_v56  ;;  %v3468_v23 = vunpack.i.h.bf16 %v3466_v34  ;;  %v7205_v41 = vpack.i.bf16 %v5432_v57, %v7204_v14  ;;  %v5984_v22 = vmul.f32 %v3392_v12, %v5758_v56 }
 0x136   :  { %7201 = vst [vmem:[#allocation108_spill] sm:$0xff] %v5969_v18  ;;  %7203 = vst [vmem:[#allocation109_spill] sm:$0xff] %v5975_v10  ;;  %v3467_v20 = vunpack.i.l.bf16 %v3466_v34  ;;  %v3413_v18 = vunpack.i.h.bf16 %v3411_v45  ;;  %v3412_v38 = vunpack.i.l.bf16 %v3411_v45  ;;  %v5990_v25 = vmul.f32 %v3458_v28, %v5941_v33 }
 0x137   :  { %3720 = vperm.xlu0 %3158, %v7202_v61   ;;  %3785 = vperm.xlu1 %3157, %v7205_v41   ;;  %v3800_v15 = vpop.eup %3799  ;;  %v5993_v32 = vmul.f32 %v3457_v60, %v5941_v33  ;;  %v3478_v5 = vunpack.i.h.bf16 %v3476_v40  ;;  %v3477_v57 = vunpack.i.l.bf16 %v3476_v40  ;;  %v3421_v41 = vpop.permute.xlu0 %3420  ;;  %v7206_v61 = vld [vmem:[#allocation77_spill] sm:$0xff]  ;;  %v5997_v34 = vmul.f32 %v3403_v6, %v5910_v19  ;;  %v6011_v40 = vld [vmem:[%s6795_s6 + $0x8] ss:$0 sm:$0xff] }
 0x138   :  { %v46_v56 = vmul.f32 %v3800_v15, %v7206_v61  ;;  %v3423_v12 = vunpack.i.h.bf16 %v3421_v41  ;;  %v3422_v45 = vunpack.i.l.bf16 %v3421_v41  ;;  %v3486_v14 = vpop.permute.xlu1 %3485  ;;  %v7208_v10 = vpack.i.bf16 %v5507_v4, %v5495_v3  ;;  %7211 = vst [vmem:[#allocation111_spill] sm:$0xff] %v6011_v40 }
 0x139   :  { %7207 = vst [vmem:[#allocation30_spill] sm:$0xff] %v5997_v34  ;;  %v6003_v28 = vmul.f32 %v3402_v31, %v5910_v19  ;;  %v6006_v60 = vmul.f32 %v3468_v23, %v5941_v33  ;;  %v3488_v6 = vunpack.i.h.bf16 %v3486_v14  ;;  %v3487_v15 = vunpack.i.l.bf16 %v3486_v14  ;;  %v49_v31 = vld [vmem:[%s6794_s5] sm:$0x1]  ;;  %v7250_v34 = vld [vmem:[#allocation94_spill] sm:$0xff] }
 0x13a   :  { %v7212_v41 = vpack.i.bf16 %v5523_v30, %v5512_v27  ;;  %v48_v61 = vmul.f32 %v47_v17, %v46_v56  ;;  %v6017_v4 = vmul.f32 %v3467_v20, %v5941_v33  ;;  %v6020_v3 = vmul.f32 %v3413_v18, %v5910_v19  ;;  %v7222_v56 = vld [vmem:[#allocation87_spill] sm:$0xff] }
 0x13b   :  { %3730 = vperm.xlu0 %3158, %v7208_v10   ;;  %7209 = vst [vmem:[#allocation77_spill] sm:$0xff] %v6003_v28  ;;  %7210 = vst [vmem:[#allocation110_spill] sm:$0xff] %v6006_v60  ;;  %v6023_v10 = vmul.f32 %v3412_v38, %v5910_v19  ;;  %v6029_v23 = vmul.f32 %v3478_v5, %v5941_v33  ;;  %v6032_v27 = vmul.f32 %v3477_v57, %v5941_v33  ;;  %v6040_v18 = vpop.permute.xlu0 %3430  ;;  %v7221_v38 = vld [vmem:[#allocation9_spill] sm:$0xff]  ;;  %v7251_v28 = vld [vmem:[#allocation44_spill] sm:$0xff] }
 0x13c   :  { %3795 = vperm.xlu1 %3157, %v7212_v41   ;;  %7213 = vst [vmem:[#allocation112_spill] sm:$0xff] %v6017_v4  ;;  %7214 = vst [vmem:[#allocation113_spill] sm:$0xff] %v6020_v3  ;;  %v6035_v30 = vmul.f32 %v3423_v12, %v5910_v19  ;;  %v6038_v20 = vmul.f32 %v3422_v45, %v5910_v19  ;;  %v50_v17 = vmul.f32 %v48_v61, %v7221_v38  ;;  %v6053_v33 = vpop.permute.xlu1 %3495  ;;  %v7231_v19 = vld [vmem:[#allocation12_spill] sm:$0xff]  ;;  %v7234_v45 = vld [vmem:[#allocation22_spill] sm:$0xff] }
 0x13d   :  { %7215 = vst [vmem:[#allocation114_spill] sm:$0xff] %v6023_v10  ;;  %7216 = vst [vmem:[#allocation115_spill] sm:$0xff] %v6029_v23  ;;  %v7223_v14 = vsub.s32 0, %v7222_v56  ;;  %v6048_v5 = vmul.f32 %v3488_v6, %v6011_v40  ;;  %v6051_v57 = vmul.f32 %v3487_v15, %v6011_v40  ;;  %v7228_v12 = vpack.i.bf16 %v5616_v29, %v5611_v26  ;;  %v7229_v6 = vld [vmem:[#allocation14_spill] sm:$0xff]  ;;  %v7230_v15 = vld [vmem:[#allocation24_spill] sm:$0xff] }
 0x13e   :  { %7217 = vst [vmem:[#allocation116_spill] sm:$0xff] %v6032_v27  ;;  %7218 = vst [vmem:[#allocation117_spill] sm:$0xff] %v6035_v30  ;;  %v7232_v26 = vld [vmem:[#allocation7_spill] sm:$0xff]  ;;  %v7257_v27 = vld [vmem:[#allocation93_spill] sm:$0xff] }
 0x13f   :  { %7219 = vst [vmem:[#allocation118_spill] sm:$0xff] %v6038_v20  ;;  %7220 = vst [vmem:[#allocation119_spill] sm:$0xff] %v6040_v18  ;;  %v6045_v41 = vrot.slane %v48_v61, %v7223_v14  ;;  %3740 = vperm.xlu0 %3158, %v7228_v12   ;;  %v51_v14 = vsub.f32 %v49_v31, %v50_v17  ;;  %v7233_v12 = vld [vmem:[#allocation20_spill] sm:$0xff]  ;;  %v7235_v61 = vld [vmem:[#allocation11_spill] sm:$0xff]  ;;  %v6076_v17 = vpop.permute.xlu0 %3440 }
 0x140   :  { %7225 = vst [vmem:[#allocation87_spill] sm:$0xff] %v6048_v5  ;;  %7226 = vst [vmem:[#allocation120_spill] sm:$0xff] %v6051_v57  ;;  %v7239_v18 = vld [vmem:[#allocation5_spill] sm:$0xff] }
 0x141   :  { %7224 = vst [vmem:[#allocation9_spill] sm:$0xff] %v6045_v41  ;;  %7227 = vst [vmem:[#allocation121_spill] sm:$0xff] %v6053_v33  ;;  %v168_v20 = vmul.f32 %v6045_v41, %v7229_v6  ;;  %v169_v40 = vmul.f32 %v6045_v41, %v7230_v15  ;;  %v156_v3 = vmul.f32 %v6045_v41, %v7231_v19  ;;  %v7237_v6 = vsub.s32 0, %v7222_v56  ;;  %v7238_v33 = vld [vmem:[#allocation13_spill] sm:$0xff] }
 0x142   :  { %v157_v29 = vmul.f32 %v6045_v41, %v7232_v26  ;;  %v166_v38 = vmul.f32 %v6045_v41, %v7233_v12  ;;  %v167_v30 = vmul.f32 %v6045_v41, %v7234_v45  ;;  %v160_v31 = vmul.f32 %v6045_v41, %v7235_v61  ;;  %7236 = vst [vmem:[#allocation14_spill] sm:$0xff] %v6076_v17  ;;  %v7240_v12 = vld [vmem:[#allocation6_spill] sm:$0xff]  ;;  %v6092_v45 = vpop.permute.xlu1 %3505  ;;  %v7243_v56 = vld [vmem:[#allocation17_spill] sm:$0xff] }
 0x143   :  { %v6080_v15 = vrot.slane %v51_v14, %v7237_v6  ;;  %v161_v19 = vmul.f32 %v6045_v41, %v7238_v33  ;;  %v6086_v26 = vmul.f32 %v6045_v41, %v7239_v18  ;;  %v6090_v10 = vmul.f32 %v6045_v41, %v7240_v12  ;;  %7241 = vst [vmem:[#allocation24_spill] sm:$0xff] %v6092_v45  ;;  %v7244_v6 = vld [vmem:[#allocation19_spill] sm:$0xff]  ;;  %v7245_v18 = vld [vmem:[#allocation8_spill] sm:$0xff]  ;;  %v7246_v12 = vld [vmem:[#allocation10_spill] sm:$0xff]  ;;  %v6121_v5 = vpop.permute.xlu0 %3450 }
 0x144   :  { %v7242_v61 = vpack.i.bf16 %v5667_v43, %v5662_v1  ;;  %v6099_v14 = vmul.f32 %v6045_v41, %v7243_v56  ;;  %v6103_v33 = vmul.f32 %v6045_v41, %v7244_v6  ;;  %v6107_v17 = vmul.f32 %v6045_v41, %v7245_v18  ;;  %7248 = vst [vmem:[#allocation7_spill] sm:$0xff] %v6121_v5 }
 0x145   :  { %v6111_v60 = vmul.f32 %v6045_v41, %v7246_v12  ;;  %v190_v45 = vadd.f32 %v6080_v15, %v168_v20  ;;  %v191_v1 = vadd.f32 %v6080_v15, %v169_v40  ;;  %v178_v43 = vadd.f32 %v6080_v15, %v156_v3  ;;  %v7249_v12 = vld [vmem:[#allocation95_spill] sm:$0xff] }
 0x146   :  { %3750 = vperm.xlu0 %3158, %v7242_v61   ;;  %v179_v61 = vadd.f32 %v6080_v15, %v157_v29  ;;  %v188_v56 = vadd.f32 %v6080_v15, %v166_v38  ;;  %v189_v6 = vadd.f32 %v6080_v15, %v167_v30  ;;  %v182_v4 = vadd.f32 %v6080_v15, %v160_v31  ;;  %v7252_v41 = vld [vmem:[#allocation27_spill] sm:$0xff]  ;;  %v6127_v23 = vpop.permute.xlu1 %3515  ;;  %v7255_v30 = vld [vmem:[#allocation26_spill] sm:$0xff] }
 0x147   :  { %7247 = vst [vmem:[#allocation12_spill] sm:$0xff] %v6111_v60  ;;  %v183_v18 = vadd.f32 %v6080_v15, %v161_v19  ;;  %v371_v57 = vadd.f32 %v7249_v12, %v190_v45  ;;  %v372_v20 = vadd.f32 %v7250_v34, %v191_v1  ;;  %v359_v40 = vadd.f32 %v7251_v28, %v178_v43  ;;  %v7256_v31 = vld [vmem:[#allocation91_spill] sm:$0xff]  ;;  %v7258_v60 = vld [vmem:[#allocation92_spill] sm:$0xff]  ;;  %v7260_v43 = vld [vmem:[#allocation53_spill] sm:$0xff] }
 0x148   :  { %v360_v3 = vadd.f32 %v7252_v41, %v179_v61  ;;  %7253 = vst [vmem:[#allocation20_spill] sm:$0xff] %v6127_v23  ;;  %v7254_v38 = vpack.i.bf16 %v5706_v59, %v5701_v39  ;;  %v369_v29 = vadd.f32 %v7255_v30, %v188_v56  ;;  %v370_v19 = vadd.f32 %v7256_v31, %v189_v6  ;;  %v7259_v1 = vld [vmem:[#allocation52_spill] sm:$0xff]  ;;  %v7261_v12 = vld [vmem:[#allocation45_spill] sm:$0xff]  ;;  %v7262_v39 = vld [vmem:[#allocation43_spill] sm:$0xff] }
 0x149   :  { %v363_v5 = vadd.f32 %v7257_v27, %v182_v4  ;;  %v364_v45 = vadd.f32 %v7258_v60, %v183_v18  ;;  %v536_v34 = vadd.f32 %v5578_v63, %v371_v57  ;;  %v537_v28 = vadd.f32 %v5565_v58, %v372_v20  ;;  %v7263_v4 = vld [vmem:[#allocation98_spill] sm:$0xff]  ;;  %v7265_v20 = vld [vmem:[#allocation55_spill] sm:$0xff] }
 0x14a   :  { %3760 = vperm.xlu0 %3158, %v7254_v38   ;;  %v524_v41 = vadd.f32 %v7259_v1, %v359_v40  ;;  %v525_v61 = vadd.f32 %v7260_v43, %v360_v3  ;;  %v534_v23 = vadd.f32 %v7261_v12, %v369_v29  ;;  %v535_v59 = vadd.f32 %v7262_v39, %v370_v19  ;;  %v6144_v38 = vpop.permute.xlu0 %3460  ;;  %v6150_v57 = vpop.permute.xlu1 %3525  ;;  %v7267_v40 = vld [vmem:[#allocation100_spill] sm:$0xff]  ;;  %v7268_v30 = vld [vmem:[#allocation99_spill] sm:$0xff]  ;;  %v7269_v19 = vld [vmem:[#allocation62_spill] sm:$0xff] }
 0x14b   :  { %v528_v56 = vadd.f32 %v5532_v50, %v363_v5  ;;  %v529_v6 = vadd.f32 %v5529_v37, %v364_v45  ;;  %v701_v60 = vadd.f32 %v5712_v11, %v536_v34  ;;  %v702_v63 = vadd.f32 %v5709_v54, %v537_v28  ;;  %v7266_v5 = vld [vmem:[#allocation56_spill] sm:$0xff]  ;;  %v7271_v34 = vld [vmem:[#allocation71_spill] sm:$0xff]  ;;  %v7274_v12 = vld [vmem:[#allocation69_spill] sm:$0xff] }
 0x14c   :  { %v689_v58 = vadd.f32 %v5619_v8, %v524_v41  ;;  %v690_v27 = vadd.f32 %v7263_v4, %v525_v61  ;;  %v7264_v18 = vpack.i.bf16 %v5726_v9, %v5723_v7  ;;  %v699_v50 = vadd.f32 %v7265_v20, %v534_v23  ;;  %v7270_v7 = vld [vmem:[#allocation63_spill] sm:$0xff]  ;;  %v7273_v61 = vld [vmem:[#allocation68_spill] sm:$0xff] }
 0x14d   :  { %v700_v37 = vadd.f32 %v7266_v5, %v535_v59  ;;  %v693_v3 = vadd.f32 %v7267_v40, %v528_v56  ;;  %v694_v11 = vadd.f32 %v7268_v30, %v529_v6  ;;  %v866_v54 = vadd.f32 %v5833_v49, %v701_v60  ;;  %v7275_v56 = vld [vmem:[#allocation37_spill] sm:$0xff]  ;;  %v7277_v60 = vld [vmem:[#allocation83_spill] sm:$0xff]  ;;  %v7282_v40 = vld [vmem:[#allocation74_spill] sm:$0xff] }
 0x14e   :  { %3770 = vperm.xlu0 %3158, %v7264_v18   ;;  %v867_v8 = vadd.f32 %v5823_v24, %v702_v63  ;;  %v854_v29 = vadd.f32 %v5732_v2, %v689_v58  ;;  %v855_v31 = vadd.f32 %v5729_v16, %v690_v27  ;;  %v864_v45 = vadd.f32 %v7269_v19, %v699_v50  ;;  %v6167_v1 = vpop.permute.xlu0 %3470  ;;  %v6173_v43 = vpop.permute.xlu1 %3535  ;;  %v7276_v6 = vld [vmem:[#allocation33_spill] sm:$0xff]  ;;  %v7279_v27 = vld [vmem:[#allocation34_spill] sm:$0xff] }
 0x14f   :  { %v865_v9 = vadd.f32 %v7270_v7, %v700_v37  ;;  %v858_v23 = vadd.f32 %v5784_v0, %v693_v3  ;;  %v859_v28 = vadd.f32 %v7271_v34, %v694_v11  ;;  %v1031_v41 = vadd.f32 %v5884_v48, %v866_v54  ;;  %v7280_v50 = vld [vmem:[#allocation38_spill] sm:$0xff]  ;;  %v7284_v30 = vld [vmem:[#allocation105_spill] sm:$0xff]  ;;  %v7289_v34 = vld [vmem:[#allocation32_spill] sm:$0xff] }
 0x150   :  { %v1032_v49 = vadd.f32 %v5881_v62, %v867_v8  ;;  %v1019_v24 = vadd.f32 %v5858_v47, %v854_v29  ;;  %v1020_v2 = vadd.f32 %v5855_v52, %v855_v31  ;;  %v7272_v16 = vpack.i.bf16 %v5778_v42, %v5765_v46  ;;  %v7278_v42 = vld [vmem:[#allocation35_spill] sm:$0xff]  ;;  %v7286_v8 = vld [vmem:[#allocation108_spill] sm:$0xff]  ;;  %v7288_v7 = vld [vmem:[#allocation81_spill] sm:$0xff] }
 0x151   :  { %v1029_v0 = vadd.f32 %v7273_v61, %v864_v45  ;;  %v1030_v39 = vadd.f32 %v7274_v12, %v865_v9  ;;  %v1023_v59 = vadd.f32 %v5869_v36, %v858_v23  ;;  %v1024_v48 = vadd.f32 %v5866_v51, %v859_v28  ;;  %v7287_v45 = vld [vmem:[#allocation82_spill] sm:$0xff] }
 0x152   :  { %3780 = vperm.xlu0 %3158, %v7272_v16   ;;  %v1196_v62 = vadd.f32 %v5933_v44, %v1031_v41  ;;  %v1197_v47 = vadd.f32 %v7275_v56, %v1032_v49  ;;  %v1184_v52 = vadd.f32 %v7276_v6, %v1019_v24  ;;  %v1185_v63 = vadd.f32 %v7277_v60, %v1020_v2  ;;  %v6194_v18 = vpop.permute.xlu0 %3480  ;;  %v6200_v37 = vpop.permute.xlu1 %3545  ;;  %v7290_v41 = vld [vmem:[#allocation49_spill] sm:$0xff]  ;;  %v7293_v16 = vld [vmem:[#allocation28_spill] sm:$0xff]  ;;  %v7297_v56 = vld [vmem:[#allocation58_spill] sm:$0xff] }
 0x153   :  { %v6187_v58 = vadd.f32 %v5984_v22, %v1029_v0  ;;  %v6190_v46 = vadd.f32 %v5978_v55, %v1030_v39  ;;  %v1188_v4 = vadd.f32 %v7278_v42, %v1023_v59  ;;  %v1189_v36 = vadd.f32 %v7279_v27, %v1024_v48  ;;  %v7281_v22 = vld [vmem:[#allocation73_spill] sm:$0xff]  ;;  %v7294_v0 = vld [vmem:[#allocation116_spill] sm:$0xff]  ;;  %v7295_v39 = vld [vmem:[#allocation115_spill] sm:$0xff] }
 0x154   :  { %v1361_v51 = vadd.f32 %v5966_v21, %v1196_v62  ;;  %v1362_v44 = vadd.f32 %v5963_v13, %v1197_v47  ;;  %v1349_v20 = vadd.f32 %v5948_v53, %v1184_v52  ;;  %v1350_v5 = vadd.f32 %v7280_v50, %v1185_v63  ;;  %v7285_v21 = vld [vmem:[#allocation109_spill] sm:$0xff]  ;;  %v7299_v52 = vld [vmem:[#allocation86_spill] sm:$0xff] }
 0x155   :  { %v7283_v55 = vpack.i.bf16 %v7281_v22, %v7282_v40  ;;  %v1353_v3 = vadd.f32 %v5954_v35, %v1188_v4  ;;  %v1354_v11 = vadd.f32 %v7284_v30, %v1189_v36  ;;  %v176_v54 = vadd.f32 %v6080_v15, %v6086_v26  ;;  %v7296_v48 = vld [vmem:[#allocation57_spill] sm:$0xff]  ;;  %v7301_v4 = vld [vmem:[#allocation47_spill] sm:$0xff]  ;;  %v7305_v22 = vld [vmem:[#allocation64_spill] sm:$0xff] }
 0x156   :  { %v177_v13 = vadd.f32 %v6080_v15, %v6090_v10  ;;  %v6212_v53 = vadd.f32 %v7285_v21, %v1349_v20  ;;  %v6215_v29 = vadd.f32 %v7286_v8, %v1350_v5  ;;  %v186_v31 = vadd.f32 %v6080_v15, %v6099_v14  ;;  %v6229_v23 = vpop.permute.xlu0 %3490  ;;  %v6237_v24 = vpop.permute.xlu1 %3555  ;;  %v7300_v63 = vld [vmem:[#allocation29_spill] sm:$0xff]  ;;  %v7302_v36 = vld [vmem:[#allocation15_spill] sm:$0xff]  ;;  %v7309_v8 = vld [vmem:[#allocation48_spill] sm:$0xff] }
 0x157   :  { %3790 = vperm.xlu0 %3158, %v7283_v55   ;;  %v187_v35 = vadd.f32 %v6080_v15, %v6103_v33  ;;  %v6222_v19 = vadd.f32 %v5993_v32, %v1353_v3  ;;  %v6225_v26 = vadd.f32 %v5990_v25, %v1354_v11  ;;  %v357_v10 = vadd.f32 %v7287_v45, %v176_v54  ;;  %v7291_v33 = vld [vmem:[#allocation12_spill] sm:$0xff]  ;;  %v7303_v20 = vld [vmem:[#allocation9_spill] sm:$0xff]  ;;  %v7308_v54 = vld [vmem:[#allocation39_spill] sm:$0xff] }
 0x158   :  { %v358_v9 = vadd.f32 %v7288_v7, %v177_v13  ;;  %v367_v28 = vadd.f32 %v7289_v34, %v186_v31  ;;  %v180_v14 = vadd.f32 %v6080_v15, %v6107_v17  ;;  %v181_v32 = vadd.f32 %v6080_v15, %v7291_v33  ;;  %v7292_v25 = vld [vmem:[#allocation40_spill] sm:$0xff]  ;;  %v7298_v17 = vld [vmem:[#allocation18_spill] sm:$0xff]  ;;  %v7306_v55 = vld [vmem:[#allocation65_spill] sm:$0xff] }
 0x159   :  { %v368_v49 = vadd.f32 %v7290_v41, %v187_v35  ;;  %v522_v2 = vadd.f32 %v7292_v25, %v357_v10  ;;  %v6242_v12 = vadd.f32 %v7294_v0, %v1361_v51  ;;  %v6245_v59 = vadd.f32 %v7295_v39, %v1362_v44  ;;  %v7304_v51 = vld [vmem:[#allocation16_spill] sm:$0xff]  ;;  %v7307_v30 = vld [vmem:[#allocation25_spill] sm:$0xff]  ;;  %v7310_v35 = vld [vmem:[#allocation46_spill] sm:$0xff] }
 0x15a   :  { %v523_v61 = vadd.f32 %v7293_v16, %v358_v9  ;;  %v532_v62 = vadd.f32 %v7296_v48, %v367_v28  ;;  %v361_v6 = vadd.f32 %v7298_v17, %v180_v14  ;;  %v362_v60 = vadd.f32 %v7299_v52, %v181_v32  ;;  %v6257_v44 = vpop.permute.xlu0 %3500  ;;  %v6263_v21 = vpop.permute.xlu1 %3565  ;;  %v7311_v9 = vld [vmem:[#allocation75_spill] sm:$0xff]  ;;  %v7312_v28 = vld [vmem:[#allocation76_spill] sm:$0xff]  ;;  %v7315_v25 = vld [vmem:[#allocation102_spill] sm:$0xff] }
 0x15b   :  { %v533_v47 = vadd.f32 %v7297_v56, %v368_v49  ;;  %v687_v42 = vadd.f32 %v7300_v63, %v522_v2  ;;  %v162_v50 = vmul.f32 %v7303_v20, %v7302_v36  ;;  %v163_v5 = vmul.f32 %v7303_v20, %v7304_v51  ;;  %v7313_v49 = vld [vmem:[#allocation50_spill] sm:$0xff]  ;;  %v7314_v33 = vld [vmem:[#allocation51_spill] sm:$0xff]  ;;  %v7316_v16 = vld [vmem:[#allocation101_spill] sm:$0xff] }
 0x15c   :  { %v688_v27 = vadd.f32 %v7301_v4, %v523_v61  ;;  %v697_v40 = vadd.f32 %v7305_v22, %v532_v62  ;;  %v526_v11 = vadd.f32 %v7307_v30, %v361_v6  ;;  %v527_v13 = vadd.f32 %v7308_v54, %v362_v60  ;;  %v7317_v0 = vld [vmem:[#allocation23_spill] sm:$0xff]  ;;  %v7318_v48 = vld [vmem:[#allocation90_spill] sm:$0xff]  ;;  %v7320_v17 = vld [vmem:[#allocation85_spill] sm:$0xff] }
 0x15d   :  { %v698_v3 = vadd.f32 %v7306_v55, %v533_v47  ;;  %v852_v31 = vadd.f32 %v7309_v8, %v687_v42  ;;  %v184_v10 = vadd.f32 %v6080_v15, %v162_v50  ;;  %v185_v7 = vadd.f32 %v6080_v15, %v163_v5  ;;  %v7319_v47 = vld [vmem:[#allocation84_spill] sm:$0xff]  ;;  %v7321_v52 = vld [vmem:[#allocation97_spill] sm:$0xff]  ;;  %v7322_v63 = vld [vmem:[#allocation54_spill] sm:$0xff] }
 0x15e   :  { %v853_v45 = vadd.f32 %v7310_v35, %v688_v27  ;;  %v862_v34 = vadd.f32 %v7311_v9, %v697_v40  ;;  %v691_v14 = vadd.f32 %v7313_v49, %v526_v11  ;;  %v692_v32 = vadd.f32 %v7314_v33, %v527_v13  ;;  %v6277_v56 = vpop.permute.xlu0 %3510  ;;  %v6283_v4 = vpop.permute.xlu1 %3575  ;;  %v7323_v27 = vld [vmem:[#allocation21_spill] sm:$0xff]  ;;  %v7324_v20 = vld [vmem:[#allocation70_spill] sm:$0xff]  ;;  %v7327_v55 = vld [vmem:[#allocation88_spill] sm:$0xff] }
 0x15f   :  { %v863_v41 = vadd.f32 %v7312_v28, %v698_v3  ;;  %v1017_v2 = vadd.f32 %v7315_v25, %v852_v31  ;;  %v365_v39 = vadd.f32 %v7317_v0, %v184_v10  ;;  %v366_v62 = vadd.f32 %v7318_v48, %v185_v7  ;;  %v7325_v51 = vld [vmem:[#allocation41_spill] sm:$0xff]  ;;  %v7326_v22 = vld [vmem:[#allocation42_spill] sm:$0xff]  ;;  %v7330_v8 = vld [vmem:[#allocation67_spill] sm:$0xff] }
 0x160   :  { %v1018_v61 = vadd.f32 %v7316_v16, %v853_v45  ;;  %v1027_v15 = vadd.f32 %v7319_v47, %v862_v34  ;;  %v856_v60 = vadd.f32 %v7321_v52, %v691_v14  ;;  %v857_v42 = vadd.f32 %v7322_v63, %v692_v32  ;;  %v7328_v30 = vld [vmem:[#allocation89_spill] sm:$0xff]  ;;  %v7329_v54 = vld [vmem:[#allocation66_spill] sm:$0xff]  ;;  %v7333_v9 = vld [vmem:[#allocation96_spill] sm:$0xff] }
 0x161   :  { %v1028_v6 = vadd.f32 %v7320_v17, %v863_v41  ;;  %v1182_v36 = vadd.f32 %v7323_v27, %v1017_v2  ;;  %v530_v5 = vadd.f32 %v7325_v51, %v365_v39  ;;  %v531_v40 = vadd.f32 %v7326_v22, %v366_v62  ;;  %v7331_v35 = vld [vmem:[#allocation77_spill] sm:$0xff]  ;;  %v7332_v10 = vld [vmem:[#allocation30_spill] sm:$0xff]  ;;  %v7335_v14 = vld [vmem:[#allocation107_spill] sm:$0xff] }
 0x162   :  { %v1183_v50 = vadd.f32 %v7324_v20, %v1018_v61  ;;  %v1192_v3 = vadd.f32 %v7327_v55, %v1027_v15  ;;  %v1021_v13 = vadd.f32 %v7329_v54, %v856_v60  ;;  %v1022_v31 = vadd.f32 %v7330_v8, %v857_v42  ;;  %v7334_v28 = vld [vmem:[#allocation61_spill] sm:$0xff]  ;;  %v6297_v49 = vpop.permute.xlu0 %3520  ;;  %v7336_v32 = vld [vmem:[#allocation106_spill] sm:$0xff]  ;;  %v7337_v2 = vld [vmem:[#allocation104_spill] sm:$0xff]  ;;  %v6303_v39 = vpop.permute.xlu1 %3585 }
 0x163   :  { %v1193_v11 = vadd.f32 %v7328_v30, %v1028_v6  ;;  %v1347_v45 = vadd.f32 %v7331_v35, %v1182_v36  ;;  %v695_v34 = vadd.f32 %v7333_v9, %v530_v5  ;;  %v696_v41 = vadd.f32 %v7334_v28, %v531_v40  ;;  %v7338_v61 = vld [vmem:[#allocation103_spill] sm:$0xff]  ;;  %v7339_v48 = vld [vmem:[#allocation60_spill] sm:$0xff]  ;;  %v7344_v27 = vld [vmem:[#allocation110_spill] sm:$0xff] }
 0x164   :  { %v1348_v7 = vadd.f32 %v7332_v10, %v1183_v50  ;;  %v1357_v33 = vadd.f32 %v7335_v14, %v1192_v3  ;;  %v1186_v16 = vadd.f32 %v7337_v2, %v1021_v13  ;;  %v1187_v0 = vadd.f32 %v7338_v61, %v1022_v31  ;;  %v7340_v47 = vld [vmem:[#allocation59_spill] sm:$0xff]  ;;  %v7341_v17 = vld [vmem:[#allocation120_spill] sm:$0xff]  ;;  %v7345_v20 = vld [vmem:[#allocation114_spill] sm:$0xff] }
 0x165   :  { %v1358_v25 = vadd.f32 %v7336_v32, %v1193_v11  ;;  %v860_v62 = vadd.f32 %v7339_v48, %v695_v34  ;;  %v861_v15 = vadd.f32 %v7340_v47, %v696_v41  ;;  %v6309_v6 = vadd.f32 %v7341_v17, %v6212_v53  ;;  %v7342_v52 = vld [vmem:[#allocation87_spill] sm:$0xff]  ;;  %v7343_v63 = vld [vmem:[#allocation112_spill] sm:$0xff]  ;;  %v7346_v51 = vld [vmem:[#allocation113_spill] sm:$0xff] }
 0x166   :  { %v6313_v60 = vadd.f32 %v7342_v52, %v6215_v29  ;;  %v1522_v42 = vadd.f32 %v7343_v63, %v1357_v33  ;;  %v1351_v50 = vadd.f32 %v7345_v20, %v1186_v16  ;;  %v1352_v5 = vadd.f32 %v7346_v51, %v1187_v0  ;;  %v7347_v22 = vld [vmem:[#allocation80_spill] sm:$0xff]  ;;  %v7350_v11 = vld [vmem:[#allocation119_spill] sm:$0xff]  ;;  %v6327_v8 = vpop.permute.xlu0 %3530  ;;  %v7354_v35 = vld [vmem:[#allocation121_spill] sm:$0xff]  ;;  %v6337_v32 = vpop.permute.xlu1 %3595 }
 0x167   :  { %v1523_v36 = vadd.f32 %v7344_v27, %v1358_v25  ;;  %v1025_v40 = vadd.f32 %v7347_v22, %v860_v62  ;;  %v7348_v55 = vld [vmem:[#allocation72_spill] sm:$0xff]  ;;  %v7351_v53 = vunpack.i.h.bf16 %v7350_v11  ;;  %v7352_v29 = vunpack.i.l.bf16 %v7350_v11  ;;  %v7353_v31 = vld [vmem:[#allocation111_spill] sm:$0xff]  ;;  %v7357_v41 = vld [vmem:[#allocation14_spill] sm:$0xff] }
 0x168   :  { %v1026_v3 = vadd.f32 %v7348_v55, %v861_v15  ;;  %v7349_v30 = vld [vmem:[#allocation36_spill] sm:$0xff]  ;;  %v7355_v10 = vunpack.i.h.bf16 %v7354_v35  ;;  %v7356_v34 = vunpack.i.l.bf16 %v7354_v35  ;;  %v3443_v14 = vunpack.i.h.bf16 %v7357_v41  ;;  %v7358_v25 = vld [vmem:[#allocation78_spill] sm:$0xff]  ;;  %v7359_v16 = vld [vmem:[#allocation79_spill] sm:$0xff] }
 0x169   :  { %v1344_v54 = vmul.f32 %v7351_v53, %v7349_v30  ;;  %v1343_v13 = vmul.f32 %v7352_v29, %v7349_v30  ;;  %v3442_v33 = vunpack.i.l.bf16 %v7357_v41  ;;  %v1190_v2 = vadd.f32 %v7358_v25, %v1025_v40  ;;  %v7360_v15 = vld [vmem:[#allocation31_spill] sm:$0xff]  ;;  %v7361_v63 = vld [vmem:[#allocation118_spill] sm:$0xff]  ;;  %v7362_v20 = vld [vmem:[#allocation117_spill] sm:$0xff] }
 0x16a   :  { %v1668_v9 = vmul.f32 %v7355_v10, %v7353_v31  ;;  %v1667_v28 = vmul.f32 %v7356_v34, %v7353_v31  ;;  %v1191_v61 = vadd.f32 %v7359_v16, %v1026_v3  ;;  %v1497_v17 = vmul.f32 %v3443_v14, %v7360_v15  ;;  %v7363_v22 = vld [vmem:[#allocation24_spill] sm:$0xff]  ;;  %v6351_v3 = vpop.permute.xlu0 %3540  ;;  %v7364_v30 = vld [vmem:[#allocation7_spill] sm:$0xff]  ;;  %v6355_v11 = vpop.permute.xlu1 %3605 }
 0x16b   :  { %v1359_v0 = vadd.f32 %v1343_v13, %v6187_v58  ;;  %v1360_v48 = vadd.f32 %v1344_v54, %v6190_v46  ;;  %v1496_v52 = vmul.f32 %v3442_v33, %v7360_v15  ;;  %v1355_v27 = vadd.f32 %v7361_v63, %v1190_v2  ;;  %v7365_v29 = vld [vmem:[#allocation20_spill] sm:$0xff] }
 0x16c   :  { %v1683_v62 = vadd.f32 %v1667_v28, %v6222_v19  ;;  %v1684_v47 = vadd.f32 %v1668_v9, %v6225_v26  ;;  %v1356_v51 = vadd.f32 %v7362_v20, %v1191_v61  ;;  %v3508_v40 = vunpack.i.h.bf16 %v7363_v22 }
 0x16d   :  { %v3507_v55 = vunpack.i.l.bf16 %v7363_v22  ;;  %v1512_v58 = vadd.f32 %v1496_v52, %v1347_v45  ;;  %v1513_v46 = vadd.f32 %v1497_v17, %v1348_v7  ;;  %v3453_v19 = vunpack.i.h.bf16 %v7364_v30  ;;  %v6374_v17 = vld [vmem:[%s6795_s6 + $0x9] ss:$0 sm:$0xff] }
 0x16e   :  { %v3452_v26 = vunpack.i.l.bf16 %v7364_v30  ;;  %v1672_v53 = vmul.f32 %v3508_v40, %v7353_v31  ;;  %v3518_v13 = vunpack.i.h.bf16 %v7365_v29  ;;  %v3517_v35 = vunpack.i.l.bf16 %v7365_v29  ;;  %v6367_v33 = vpop.permute.xlu0 %3550 }
 0x16f   :  { %v1671_v54 = vmul.f32 %v3507_v55, %v7353_v31  ;;  %v1501_v10 = vmul.f32 %v3453_v19, %v7360_v15  ;;  %v3463_v45 = vunpack.i.h.bf16 %v6144_v38  ;;  %v3462_v7 = vunpack.i.l.bf16 %v6144_v38  ;;  %v6376_v38 = vpop.permute.xlu1 %3615 }
 0x170   :  { %v1500_v9 = vmul.f32 %v3452_v26, %v7360_v15  ;;  %v1688_v28 = vadd.f32 %v1672_v53, %v1523_v36  ;;  %v1676_v41 = vmul.f32 %v3518_v13, %v7353_v31  ;;  %v1675_v14 = vmul.f32 %v3517_v35, %v7353_v31 }
 0x171   :  { %v1687_v34 = vadd.f32 %v1671_v54, %v1522_v42  ;;  %v1517_v2 = vadd.f32 %v1501_v10, %v1352_v5  ;;  %v1505_v16 = vmul.f32 %v3463_v45, %v7360_v15  ;;  %v1504_v61 = vmul.f32 %v3462_v7, %v7360_v15 }
 0x172   :  { %v1516_v25 = vadd.f32 %v1500_v9, %v1351_v50  ;;  %v1691_v42 = vadd.f32 %v1675_v14, %v6242_v12  ;;  %v1692_v36 = vadd.f32 %v1676_v41, %v6245_v59  ;;  %v3528_v52 = vunpack.i.h.bf16 %v6150_v57  ;;  %v6388_v19 = vpop.permute.xlu0 %3560 }
 0x173   :  { %v3527_v50 = vunpack.i.l.bf16 %v6150_v57  ;;  %v1520_v5 = vadd.f32 %v1504_v61, %v1355_v27  ;;  %v1521_v63 = vadd.f32 %v1505_v16, %v1356_v51  ;;  %v3473_v20 = vunpack.i.h.bf16 %v6167_v1  ;;  %v6394_v26 = vpop.permute.xlu1 %3625 }
 0x174   :  { %v3472_v22 = vunpack.i.l.bf16 %v6167_v1  ;;  %v1829_v40 = vmul.f32 %v3528_v52, %v6374_v17  ;;  %v3538_v30 = vunpack.i.h.bf16 %v6173_v43  ;;  %v3537_v12 = vunpack.i.l.bf16 %v6173_v43 }
 0x175   :  { %v1828_v55 = vmul.f32 %v3527_v50, %v6374_v17  ;;  %v1509_v59 = vmul.f32 %v3473_v20, %v7360_v15  ;;  %v3483_v27 = vunpack.i.h.bf16 %v6194_v18  ;;  %v3482_v51 = vunpack.i.l.bf16 %v6194_v18 }
 0x176   :  { %v1508_v57 = vmul.f32 %v3472_v22, %v7360_v15  ;;  %v1845_v53 = vadd.f32 %v1829_v40, %v6313_v60  ;;  %v1833_v54 = vmul.f32 %v3538_v30, %v6374_v17  ;;  %v1832_v43 = vmul.f32 %v3537_v12, %v6374_v17  ;;  %v6404_v7 = vpop.permute.xlu0 %3570  ;;  %v6427_v12 = vld [vmem:[%s6795_s6 + $0xa] ss:$0 sm:$0xff] }
 0x177   :  { %v1844_v1 = vadd.f32 %v1828_v55, %v6309_v6  ;;  %v1525_v13 = vadd.f32 %v1509_v59, %v1360_v48  ;;  %v1662_v35 = vmul.f32 %v3483_v27, %v7353_v31  ;;  %v1661_v15 = vmul.f32 %v3482_v51, %v7353_v31 }
 0x178   :  { %v1524_v29 = vadd.f32 %v1508_v57, %v1359_v0  ;;  %v1848_v10 = vadd.f32 %v1832_v43, %v1683_v62  ;;  %v1849_v9 = vadd.f32 %v1833_v54, %v1684_v47  ;;  %v3548_v18 = vunpack.i.h.bf16 %v6200_v37  ;;  %v6408_v0 = vpop.permute.xlu1 %3635 }
 0x179   :  { %v3547_v45 = vunpack.i.l.bf16 %v6200_v37  ;;  %v1677_v6 = vadd.f32 %v1661_v15, %v1512_v58  ;;  %v1678_v60 = vadd.f32 %v1662_v35, %v1513_v46  ;;  %v3493_v41 = vunpack.i.h.bf16 %v6229_v23 }
 0x17a   :  { %v3492_v14 = vunpack.i.l.bf16 %v6229_v23  ;;  %v1837_v48 = vmul.f32 %v3548_v18, %v6374_v17  ;;  %v3558_v62 = vunpack.i.h.bf16 %v6237_v24  ;;  %v3557_v47 = vunpack.i.l.bf16 %v6237_v24  ;;  %v6420_v22 = vpop.permute.xlu0 %3580 }
 0x17b   :  { %v1836_v16 = vmul.f32 %v3547_v45, %v6374_v17  ;;  %v1666_v37 = vmul.f32 %v3493_v41, %v7353_v31  ;;  %v3503_v58 = vunpack.i.h.bf16 %v6257_v44  ;;  %v3502_v46 = vunpack.i.l.bf16 %v6257_v44 }
 0x17c   :  { %v1665_v61 = vmul.f32 %v3492_v14, %v7353_v31  ;;  %v1853_v23 = vadd.f32 %v1837_v48, %v1688_v28  ;;  %v1841_v50 = vmul.f32 %v3558_v62, %v6374_v17  ;;  %v1840_v20 = vmul.f32 %v3557_v47, %v6374_v17  ;;  %v6429_v44 = vpop.permute.xlu1 %3645 }
 0x17d   :  { %v1852_v52 = vadd.f32 %v1836_v16, %v1687_v34  ;;  %v1682_v55 = vadd.f32 %v1666_v37, %v1517_v2  ;;  %v1670_v24 = vmul.f32 %v3503_v58, %v7353_v31  ;;  %v1669_v30 = vmul.f32 %v3502_v46, %v7353_v31 }
 0x17e   :  { %v1681_v40 = vadd.f32 %v1665_v61, %v1516_v25  ;;  %v1856_v34 = vadd.f32 %v1840_v20, %v1691_v42  ;;  %v1857_v28 = vadd.f32 %v1841_v50, %v1692_v36  ;;  %v3568_v59 = vunpack.i.h.bf16 %v6263_v21  ;;  %v6439_v42 = vpop.permute.xlu0 %3590 }
 0x17f   :  { %v3567_v57 = vunpack.i.l.bf16 %v6263_v21  ;;  %v1685_v27 = vadd.f32 %v1669_v30, %v1520_v5  ;;  %v1686_v25 = vadd.f32 %v1670_v24, %v1521_v63  ;;  %v3513_v2 = vunpack.i.h.bf16 %v6277_v56 }
 0x180   :  { %v3512_v51 = vunpack.i.l.bf16 %v6277_v56  ;;  %v1994_v54 = vmul.f32 %v3568_v59, %v6427_v12  ;;  %v3578_v35 = vunpack.i.h.bf16 %v6283_v4  ;;  %v3577_v15 = vunpack.i.l.bf16 %v6283_v4  ;;  %v6445_v18 = vpop.permute.xlu1 %3655 }
 0x181   :  { %v1993_v43 = vmul.f32 %v3567_v57, %v6427_v12  ;;  %v1674_v36 = vmul.f32 %v3513_v2, %v7353_v31  ;;  %v3523_v5 = vunpack.i.h.bf16 %v6297_v49  ;;  %v3522_v63 = vunpack.i.l.bf16 %v6297_v49 }
 0x182   :  { %v1673_v21 = vmul.f32 %v3512_v51, %v7353_v31  ;;  %v6449_v45 = vadd.f32 %v1994_v54, %v1845_v53  ;;  %v1998_v41 = vmul.f32 %v3578_v35, %v6427_v12  ;;  %v1997_v4 = vmul.f32 %v3577_v15, %v6427_v12  ;;  %v6461_v53 = vpop.permute.xlu0 %3600 }
 0x183   :  { %v6447_v56 = vadd.f32 %v1993_v43, %v1844_v1  ;;  %v1690_v48 = vadd.f32 %v1674_v36, %v1525_v13  ;;  %v1827_v16 = vmul.f32 %v3523_v5, %v6374_v17  ;;  %v1826_v31 = vmul.f32 %v3522_v63, %v6374_v17 }
 0x184   :  { %v1689_v14 = vadd.f32 %v1673_v21, %v1524_v29  ;;  %v6455_v62 = vadd.f32 %v1997_v4, %v1848_v10  ;;  %v6457_v47 = vadd.f32 %v1998_v41, %v1849_v9  ;;  %v3588_v49 = vunpack.i.h.bf16 %v6303_v39  ;;  %v6465_v13 = vpop.permute.xlu1 %3665 }
 0x185   :  { %v3587_v1 = vunpack.i.l.bf16 %v6303_v39  ;;  %v1842_v37 = vadd.f32 %v1826_v31, %v1677_v6  ;;  %v1843_v61 = vadd.f32 %v1827_v16, %v1678_v60  ;;  %v3533_v58 = vunpack.i.h.bf16 %v6327_v8 }
 0x186   :  { %v3532_v29 = vunpack.i.l.bf16 %v6327_v8  ;;  %v2002_v46 = vmul.f32 %v3588_v49, %v6427_v12  ;;  %v3598_v9 = vunpack.i.h.bf16 %v6337_v32  ;;  %v3597_v50 = vunpack.i.l.bf16 %v6337_v32  ;;  %v6481_v57 = vpop.permute.xlu0 %3610 }
 0x187   :  { %v2001_v10 = vmul.f32 %v3587_v1, %v6427_v12  ;;  %v1831_v39 = vmul.f32 %v3533_v58, %v6374_v17  ;;  %v3543_v6 = vunpack.i.h.bf16 %v6351_v3  ;;  %v3542_v60 = vunpack.i.l.bf16 %v6351_v3 }
 0x188   :  { %v1830_v20 = vmul.f32 %v3532_v29, %v6374_v17  ;;  %v6477_v8 = vadd.f32 %v2002_v46, %v1853_v23  ;;  %v2006_v30 = vmul.f32 %v3598_v9, %v6427_v12  ;;  %v2005_v59 = vmul.f32 %v3597_v50, %v6427_v12  ;;  %v6485_v43 = vpop.permute.xlu1 %3675 }
 0x189   :  { %v6475_v24 = vadd.f32 %v2001_v10, %v1852_v52  ;;  %v1847_v32 = vadd.f32 %v1831_v39, %v1682_v55  ;;  %v1835_v51 = vmul.f32 %v3543_v6, %v6374_v17  ;;  %v1834_v54 = vmul.f32 %v3542_v60, %v6374_v17 }
 0x18a   :  { %v1846_v2 = vadd.f32 %v1830_v20, %v1681_v40  ;;  %v6487_v35 = vadd.f32 %v2005_v59, %v1856_v34  ;;  %v6489_v3 = vadd.f32 %v2006_v30, %v1857_v28  ;;  %v3553_v15 = vunpack.i.h.bf16 %v6367_v33  ;;  %v6493_v21 = vpop.permute.xlu0 %3620 }
 0x18b   :  { %v1850_v52 = vadd.f32 %v1834_v54, %v1685_v27  ;;  %v1851_v23 = vadd.f32 %v1835_v51, %v1686_v25  ;;  %v3552_v36 = vunpack.i.l.bf16 %v6367_v33  ;;  %v3563_v5 = vunpack.i.h.bf16 %v6388_v19 }
 0x18c   :  { %v1839_v40 = vmul.f32 %v3553_v15, %v6374_v17  ;;  %v3562_v63 = vunpack.i.l.bf16 %v6388_v19  ;;  %v6499_v34 = vpop.permute.xlu1 %3685  ;;  %v3572_v31 = vunpack.i.l.bf16 %v6404_v7  ;;  %v3608_v19 = vunpack.i.h.bf16 %v6355_v11 }
 0x18d   :  { %v1838_v55 = vmul.f32 %v3552_v36, %v6374_v17  ;;  %v1992_v27 = vmul.f32 %v3563_v5, %v6427_v12  ;;  %v3573_v17 = vunpack.i.h.bf16 %v6404_v7  ;;  %v3582_v58 = vunpack.i.l.bf16 %v6420_v22 }
 0x18e   :  { %v1855_v41 = vadd.f32 %v1839_v40, %v1690_v48  ;;  %v1991_v25 = vmul.f32 %v3562_v63, %v6427_v12  ;;  %v6503_v4 = vpop.permute.xlu0 %3630  ;;  %v6518_v48 = vld [vmem:[%s6795_s6 + $0xb] ss:$0 sm:$0xff]  ;;  %v3618_v7 = vunpack.i.h.bf16 %v6376_v38  ;;  %v3617_v29 = vunpack.i.l.bf16 %v6376_v38 }
 0x18f   :  { %v1854_v28 = vadd.f32 %v1838_v55, %v1689_v14  ;;  %v6507_v16 = vadd.f32 %v1992_v27, %v1843_v61  ;;  %v3607_v14 = vunpack.i.l.bf16 %v6355_v11  ;;  %v1996_v1 = vmul.f32 %v3573_v17, %v6427_v12 }
 0x190   :  { %v6505_v33 = vadd.f32 %v1991_v25, %v1842_v37  ;;  %v6511_v49 = vpop.permute.xlu1 %3695  ;;  %v1995_v37 = vmul.f32 %v3572_v31, %v6427_v12  ;;  %v3583_v61 = vunpack.i.h.bf16 %v6420_v22  ;;  %v1999_v50 = vmul.f32 %v3582_v58, %v6427_v12 }
 0x191   :  { %v6530_v10 = vadd.f32 %v1996_v1, %v1847_v32  ;;  %v2159_v20 = vmul.f32 %v3608_v19, %v6518_v48  ;;  %v2158_v22 = vmul.f32 %v3607_v14, %v6518_v48  ;;  %v3628_v6 = vunpack.i.h.bf16 %v6394_v26 }
 0x192   :  { %v6526_v46 = vpop.permute.xlu0 %3640  ;;  %v6528_v11 = vadd.f32 %v1995_v37, %v1846_v2  ;;  %v2000_v9 = vmul.f32 %v3583_v61, %v6427_v12  ;;  %v3627_v38 = vunpack.i.l.bf16 %v6394_v26  ;;  %v6540_v60 = vadd.f32 %v1999_v50, %v1850_v52 }
 0x193   :  { %v3593_v59 = vunpack.i.h.bf16 %v6439_v42  ;;  %v3592_v2 = vunpack.i.l.bf16 %v6439_v42  ;;  %v2163_v32 = vmul.f32 %v3618_v7, %v6518_v48  ;;  %v2162_v51 = vmul.f32 %v3617_v29, %v6518_v48 }
 0x194   :  { %v6534_v39 = vpop.permute.xlu1 %3705  ;;  %v6542_v30 = vadd.f32 %v2000_v9, %v1851_v23  ;;  %v3638_v54 = vunpack.i.h.bf16 %v6408_v0  ;;  %v3637_v15 = vunpack.i.l.bf16 %v6408_v0  ;;  %v3648_v26 = vunpack.i.h.bf16 %v6429_v44  ;;  %v6563_v0 = vld [vmem:[%s6795_s6 + $0xc] ss:$0 sm:$0xff] }
 0x195   :  { %v3647_v52 = vunpack.i.l.bf16 %v6429_v44  ;;  %v2004_v23 = vmul.f32 %v3593_v59, %v6427_v12  ;;  %v2003_v40 = vmul.f32 %v3592_v2, %v6427_v12  ;;  %v2167_v42 = vmul.f32 %v3628_v6, %v6518_v48 }
 0x196   :  { %v6550_v36 = vpop.permute.xlu0 %3650  ;;  %v2166_v5 = vmul.f32 %v3627_v38, %v6518_v48  ;;  %v3658_v63 = vunpack.i.h.bf16 %v6445_v18  ;;  %v3657_v27 = vunpack.i.l.bf16 %v6445_v18  ;;  %v2174_v44 = vadd.f32 %v2158_v22, %v6447_v56 }
 0x197   :  { %v2175_v25 = vadd.f32 %v2159_v20, %v6449_v45  ;;  %v6569_v12 = vadd.f32 %v2003_v40, %v1854_v28  ;;  %v6571_v17 = vadd.f32 %v2004_v23, %v1855_v41  ;;  %v2171_v31 = vmul.f32 %v3638_v54, %v6518_v48 }
 0x198   :  { %v6556_v55 = vpop.permute.xlu1 %3715  ;;  %v2170_v19 = vmul.f32 %v3637_v15, %v6518_v48  ;;  %v3603_v14 = vunpack.i.h.bf16 %v6461_v53  ;;  %v3602_v1 = vunpack.i.l.bf16 %v6461_v53  ;;  %v2178_v18 = vadd.f32 %v2162_v51, %v6455_v62 }
 0x199   :  { %v2179_v56 = vadd.f32 %v2163_v32, %v6457_v47  ;;  %v2324_v45 = vmul.f32 %v3648_v26, %v6563_v0  ;;  %v2323_v28 = vmul.f32 %v3647_v52, %v6563_v0  ;;  %v2182_v61 = vadd.f32 %v2166_v5, %v6475_v24 }
 0x19a   :  { %v6577_v37 = vpop.permute.xlu0 %3660  ;;  %v2183_v58 = vadd.f32 %v2167_v42, %v6477_v8  ;;  %v2328_v7 = vmul.f32 %v3658_v63, %v6563_v0  ;;  %v2327_v53 = vmul.f32 %v3657_v27, %v6563_v0  ;;  %v3668_v29 = vunpack.i.h.bf16 %v6465_v13  ;;  %v6620_v63 = vld [vmem:[%s6795_s6 + $0xd] ss:$0 sm:$0xff] }
 0x19b   :  { %v3667_v62 = vunpack.i.l.bf16 %v6465_v13  ;;  %v3613_v47 = vunpack.i.h.bf16 %v6481_v57  ;;  %v3612_v9 = vunpack.i.l.bf16 %v6481_v57  ;;  %v2186_v50 = vadd.f32 %v2170_v19, %v6487_v35 }
 0x19c   :  { %v6583_v41 = vpop.permute.xlu1 %3725  ;;  %v2187_v20 = vadd.f32 %v2171_v31, %v6489_v3  ;;  %v2157_v24 = vmul.f32 %v3603_v14, %v6518_v48  ;;  %v2156_v8 = vmul.f32 %v3602_v1, %v6518_v48  ;;  %v2339_v6 = vadd.f32 %v2323_v28, %v2174_v44 }
 0x19d   :  { %v2340_v38 = vadd.f32 %v2324_v45, %v2175_v25  ;;  %v3678_v59 = vunpack.i.h.bf16 %v6485_v43  ;;  %v3677_v13 = vunpack.i.l.bf16 %v6485_v43  ;;  %v2343_v32 = vadd.f32 %v2327_v53, %v2178_v18 }
 0x19e   :  { %v6597_v22 = vpop.permute.xlu0 %3670  ;;  %v2344_v57 = vadd.f32 %v2328_v7, %v2179_v56  ;;  %v3623_v35 = vunpack.i.h.bf16 %v6493_v21  ;;  %v3622_v3 = vunpack.i.l.bf16 %v6493_v21  ;;  %v2332_v51 = vmul.f32 %v3668_v29, %v6563_v0 }
 0x19f   :  { %v2331_v54 = vmul.f32 %v3667_v62, %v6563_v0  ;;  %v2161_v15 = vmul.f32 %v3613_v47, %v6518_v48  ;;  %v2160_v26 = vmul.f32 %v3612_v9, %v6518_v48  ;;  %v2172_v52 = vadd.f32 %v2156_v8, %v6505_v33 }
 0x1a0   :  { %v6601_v2 = vpop.permute.xlu1 %3735  ;;  %v2173_v43 = vadd.f32 %v2157_v24, %v6507_v16  ;;  %v3688_v23 = vunpack.i.h.bf16 %v6499_v34  ;;  %v3687_v40 = vunpack.i.l.bf16 %v6499_v34  ;;  %v2336_v21 = vmul.f32 %v3678_v59, %v6563_v0 }
 0x1a1   :  { %v2335_v5 = vmul.f32 %v3677_v13, %v6563_v0  ;;  %v3633_v27 = vunpack.i.h.bf16 %v6503_v4  ;;  %v3632_v33 = vunpack.i.l.bf16 %v6503_v4  ;;  %v2165_v44 = vmul.f32 %v3623_v35, %v6518_v48 }
 0x1a2   :  { %v6613_v42 = vpop.permute.xlu0 %3680  ;;  %v2164_v34 = vmul.f32 %v3622_v3, %v6518_v48  ;;  %v3698_v25 = vunpack.i.h.bf16 %v6511_v49  ;;  %v3697_v31 = vunpack.i.l.bf16 %v6511_v49  ;;  %v2347_v19 = vadd.f32 %v2331_v54, %v2182_v61 }
 0x1a3   :  { %v2348_v14 = vadd.f32 %v2332_v51, %v2183_v58  ;;  %v2176_v1 = vadd.f32 %v2160_v26, %v6528_v11  ;;  %v2177_v18 = vadd.f32 %v2161_v15, %v6530_v10  ;;  %v2489_v56 = vmul.f32 %v3688_v23, %v6620_v63 }
 0x1a4   :  { %v6624_v16 = vpop.permute.xlu1 %3745  ;;  %v2488_v4 = vmul.f32 %v3687_v40, %v6620_v63  ;;  %v3643_v45 = vunpack.i.h.bf16 %v6526_v46  ;;  %v3642_v28 = vunpack.i.l.bf16 %v6526_v46  ;;  %v2351_v53 = vadd.f32 %v2335_v5, %v2186_v50 }
 0x1a5   :  { %v2352_v29 = vadd.f32 %v2336_v21, %v2187_v20  ;;  %v2169_v49 = vmul.f32 %v3633_v27, %v6518_v48  ;;  %v2168_v61 = vmul.f32 %v3632_v33, %v6518_v48  ;;  %v2180_v11 = vadd.f32 %v2164_v34, %v6540_v60  ;;  %v6679_v21 = vld [vmem:[%s6795_s6 + $0xe] ss:$0 sm:$0xff] }
 0x1a6   :  { %v6636_v7 = vpop.permute.xlu0 %3690  ;;  %v2181_v10 = vadd.f32 %v2165_v44, %v6542_v30  ;;  %v2493_v62 = vmul.f32 %v3698_v25, %v6620_v63  ;;  %v2492_v47 = vmul.f32 %v3697_v31, %v6620_v63  ;;  %v3708_v46 = vunpack.i.h.bf16 %v6534_v39 }
 0x1a7   :  { %v3707_v9 = vunpack.i.l.bf16 %v6534_v39  ;;  %v3653_v50 = vunpack.i.h.bf16 %v6550_v36  ;;  %v3652_v20 = vunpack.i.l.bf16 %v6550_v36  ;;  %v2504_v24 = vadd.f32 %v2488_v4, %v2339_v6 }
 0x1a8   :  { %v6640_v58 = vpop.permute.xlu1 %3755  ;;  %v2505_v48 = vadd.f32 %v2489_v56, %v2340_v38  ;;  %v2322_v8 = vmul.f32 %v3643_v45, %v6563_v0  ;;  %v2321_v60 = vmul.f32 %v3642_v28, %v6563_v0  ;;  %v6655_v30 = vadd.f32 %v2168_v61, %v6569_v12 }
 0x1a9   :  { %v6658_v13 = vadd.f32 %v2169_v49, %v6571_v17  ;;  %v3718_v39 = vunpack.i.h.bf16 %v6556_v55  ;;  %v3717_v35 = vunpack.i.l.bf16 %v6556_v55  ;;  %v2508_v36 = vadd.f32 %v2492_v47, %v2343_v32 }
 0x1aa   :  { %v6652_v59 = vpop.permute.xlu0 %3700  ;;  %v2509_v6 = vadd.f32 %v2493_v62, %v2344_v57  ;;  %v3663_v38 = vunpack.i.h.bf16 %v6577_v37  ;;  %v3662_v51 = vunpack.i.l.bf16 %v6577_v37  ;;  %v2497_v54 = vmul.f32 %v3708_v46, %v6620_v63 }
 0x1ab   :  { %v2496_v12 = vmul.f32 %v3707_v9, %v6620_v63  ;;  %v2326_v15 = vmul.f32 %v3653_v50, %v6563_v0  ;;  %v2325_v17 = vmul.f32 %v3652_v20, %v6563_v0  ;;  %v2337_v26 = vadd.f32 %v2321_v60, %v2172_v52 }
 0x1ac   :  { %v6662_v3 = vpop.permute.xlu1 %3765  ;;  %v2338_v23 = vadd.f32 %v2322_v8, %v2173_v43  ;;  %v3728_v55 = vunpack.i.h.bf16 %v6583_v41  ;;  %v3727_v40 = vunpack.i.l.bf16 %v6583_v41  ;;  %v2501_v57 = vmul.f32 %v3718_v39, %v6620_v63 }
 0x1ad   :  { %v2500_v37 = vmul.f32 %v3717_v35, %v6620_v63  ;;  %v3738_v5 = vunpack.i.h.bf16 %v6601_v2  ;;  %v3737_v52 = vunpack.i.l.bf16 %v6601_v2  ;;  %v2330_v43 = vmul.f32 %v3663_v38, %v6563_v0 }
 0x1ae   :  { %v6672_v32 = vpop.permute.xlu0 %3710  ;;  %v2329_v27 = vmul.f32 %v3662_v51, %v6563_v0  ;;  %v3683_v41 = vunpack.i.h.bf16 %v6613_v42  ;;  %v3682_v33 = vunpack.i.l.bf16 %v6613_v42  ;;  %v2512_v44 = vadd.f32 %v2496_v12, %v2347_v19 }
 0x1af   :  { %v2513_v34 = vadd.f32 %v2497_v54, %v2348_v14  ;;  %v6687_v25 = vadd.f32 %v2325_v17, %v2176_v1  ;;  %v6689_v31 = vadd.f32 %v2326_v15, %v2177_v18  ;;  %v2654_v4 = vmul.f32 %v3728_v55, %v6679_v21 }
 0x1b0   :  { %v3776_v56 = vpop.permute.xlu1 %3775  ;;  %v2653_v45 = vmul.f32 %v3727_v40, %v6679_v21  ;;  %v3673_v2 = vunpack.i.h.bf16 %v6597_v22  ;;  %v3672_v28 = vunpack.i.l.bf16 %v6597_v22  ;;  %v2516_v61 = vadd.f32 %v2500_v37, %v2351_v53 }
 0x1b1   :  { %v2517_v62 = vadd.f32 %v2501_v57, %v2352_v29  ;;  %v2658_v42 = vmul.f32 %v3738_v5, %v6679_v21  ;;  %v2657_v19 = vmul.f32 %v3737_v52, %v6679_v21  ;;  %v6699_v14 = vadd.f32 %v2329_v27, %v2180_v11 }
 0x1b2   :  { %v6695_v49 = vpop.permute.xlu0 %3720  ;;  %v6701_v1 = vadd.f32 %v2330_v43, %v2181_v10  ;;  %v2487_v18 = vmul.f32 %v3683_v41, %v6620_v63  ;;  %v2486_v47 = vmul.f32 %v3682_v33, %v6620_v63  ;;  %v3748_v46 = vunpack.i.h.bf16 %v6624_v16 }
 0x1b3   :  { %v3747_v22 = vunpack.i.l.bf16 %v6624_v16  ;;  %v3693_v9 = vunpack.i.h.bf16 %v6636_v7  ;;  %v3692_v53 = vunpack.i.l.bf16 %v6636_v7  ;;  %v2669_v29 = vadd.f32 %v2653_v45, %v2504_v24  ;;  %v6720_v16 = vld [vmem:[%s6795_s6 + $0xf] ss:$0 sm:$0xff]  ;;  %s3841_s6 = smov [#allocation2]  }
 0x1b4   :  { %v2670_v50 = vadd.f32 %v2654_v4, %v2505_v48  ;;  %v6710_v20 = vmul.f32 %v3673_v2, %v6563_v0  ;;  %v6713_v11 = vmul.f32 %v3672_v28, %v6563_v0  ;;  %v2673_v8 = vadd.f32 %v2657_v19, %v2508_v36  ;;  %v3786_v7 = vpop.permute.xlu1 %3785  ;;  %s2869_s8 = sshll.u32 %s3841_s6, 4  ;;  %s2870_s8 = int_to_ptr.vmem [resolvable:$true] %s2869_s8 }
 0x1b5   :  { %v2674_v60 = vadd.f32 %v2658_v42, %v2509_v6  ;;  %v3758_v39 = vunpack.i.h.bf16 %v6640_v58  ;;  %v3757_v35 = vunpack.i.l.bf16 %v6640_v58  ;;  %v6722_v24 = vadd.f32 %v2486_v47, %v2337_v26  ;;  %s3817_s2 = scalar_lea.vmem %s2870_s8, 2048  ;;  %p3822_p1 = scmp.lt.s32.totalorder %s2870_s8, %s2870_s8 }
 0x1b6   :  { %v3731_v10 = vpop.permute.xlu0 %3730  ;;  %v6724_v48 = vadd.f32 %v2487_v18, %v2338_v23  ;;  %v3768_v0 = vunpack.i.h.bf16 %v6662_v3  ;;  %v3767_v38 = vunpack.i.l.bf16 %v6662_v3  ;;  %v2662_v36 = vmul.f32 %v3748_v46, %v6679_v21  ;;  %p3818_p0 = scmp.ne.s32.totalorder %s2870_s8, %s3817_s2  ;;  %p3823_p2 = scmp.lt.s32.totalorder %s3817_s2, %s3817_s2 }
 0x1b7   :  { %v2661_v6 = vmul.f32 %v3747_v22, %v6679_v21  ;;  %v2491_v58 = vmul.f32 %v3693_v9, %v6620_v63  ;;  %v2490_v51 = vmul.f32 %v3692_v53, %v6620_v63  ;;  %v3778_v15 = vunpack.i.h.bf16 %v3776_v56 }
 0x1b8   :  { %v2819_v54 = vmul.f32 %v3768_v0, %v6720_v16  ;;  %v2818_v12 = vmul.f32 %v3767_v38, %v6720_v16  ;;  %v3777_v17 = vunpack.i.l.bf16 %v3776_v56  ;;  %v2666_v23 = vmul.f32 %v3758_v39, %v6679_v21  ;;  %v3796_v56 = vpop.permute.xlu1 %3795  ;;  %p3824_p3 = por %p3823_p2, %p3822_p1 }
 0x1b9   :  { %v2665_v3 = vmul.f32 %v3757_v35, %v6679_v21  ;;  %v3703_v55 = vunpack.i.h.bf16 %v6652_v59  ;;  %v3702_v40 = vunpack.i.l.bf16 %v6652_v59  ;;  %v2823_v5 = vmul.f32 %v3778_v15, %v6720_v16 }
 0x1ba   :  { %v6734_v26 = vpop.permute.xlu0 %3740  ;;  %v2834_v57 = vadd.f32 %v2818_v12, %v2669_v29  ;;  %v2835_v37 = vadd.f32 %v2819_v54, %v2670_v50  ;;  %v2822_v52 = vmul.f32 %v3777_v17, %v6720_v16  ;;  %v2677_v43 = vadd.f32 %v2661_v6, %v2512_v44  ;;  %p3825_p4 = pnand %p3824_p3, %p3818_p0 }
 0x1bb   :  { %v2678_v27 = vadd.f32 %v2662_v36, %v2513_v34  ;;  %v3723_v41 = vunpack.i.h.bf16 %v6695_v49  ;;  %v3722_v33 = vunpack.i.l.bf16 %v6695_v49  ;;  %v2839_v45 = vadd.f32 %v2823_v5, %v2674_v60 }
 0x1bc   :  { %2850 = vst [vmem:[#allocation2 + $0x10] sm:$0xff] %v2834_v57  ;;  %2851 = vst [vmem:[#allocation2 + $0x18] sm:$0xff] %v2835_v37  ;;  %v2838_v4 = vadd.f32 %v2822_v52, %v2673_v8  ;;  %v3788_v2 = vunpack.i.h.bf16 %v3786_v7  ;;  %v3787_v28 = vunpack.i.l.bf16 %v3786_v7  ;;  %v2681_v42 = vadd.f32 %v2665_v3, %v2516_v61 }
 0x1bd   :  { %v2682_v19 = vadd.f32 %v2666_v23, %v2517_v62  ;;  %v3733_v18 = vunpack.i.h.bf16 %v3731_v10  ;;  %v3732_v47 = vunpack.i.l.bf16 %v3731_v10  ;;  %2855 = vst [vmem:[#allocation2 + $0x38] sm:$0xff] %v2839_v45  ;;  %v3798_v49 = vunpack.i.h.bf16 %v3796_v56 }
 0x1be   :  { %2854 = vst [vmem:[#allocation2 + $0x30] sm:$0xff] %v2838_v4  ;;  %v2827_v44 = vmul.f32 %v3788_v2, %v6720_v16  ;;  %v2826_v34 = vmul.f32 %v3787_v28, %v6720_v16  ;;  %v3797_v46 = vunpack.i.l.bf16 %v3796_v56  ;;  %v2652_v22 = vmul.f32 %v3723_v41, %v6679_v21 }
 0x1bf   :  { %v2651_v9 = vmul.f32 %v3722_v33, %v6679_v21  ;;  %v2656_v53 = vmul.f32 %v3733_v18, %v6679_v21  ;;  %v2655_v29 = vmul.f32 %v3732_v47, %v6679_v21  ;;  %v2831_v50 = vmul.f32 %v3798_v49, %v6720_v16 }
 0x1c0   :  { %v2842_v61 = vadd.f32 %v2826_v34, %v2677_v43  ;;  %v2843_v62 = vadd.f32 %v2827_v44, %v2678_v27  ;;  %v2830_v10 = vmul.f32 %v3797_v46, %v6720_v16  ;;  %v2506_v60 = vadd.f32 %v2490_v51, %v6687_v25 }
 0x1c1   :  { %v6744_v59 = vpop.permute.xlu0 %3750  ;;  %v2507_v39 = vadd.f32 %v2491_v58, %v6689_v31  ;;  %v2495_v35 = vmul.f32 %v3703_v55, %v6620_v63  ;;  %v2494_v7 = vmul.f32 %v3702_v40, %v6620_v63  ;;  %v2847_v38 = vadd.f32 %v2831_v50, %v2682_v19 }
 0x1c2   :  { %2858 = vst [vmem:[#allocation2 + $0x50] sm:$0xff] %v2842_v61  ;;  %2859 = vst [vmem:[#allocation2 + $0x58] sm:$0xff] %v2843_v62  ;;  %v2846_v0 = vadd.f32 %v2830_v10, %v2681_v42  ;;  %v3743_v36 = vunpack.i.h.bf16 %v6734_v26  ;;  %v3742_v6 = vunpack.i.l.bf16 %v6734_v26  ;;  %v3713_v54 = vunpack.i.h.bf16 %v6672_v32 }
 0x1c3   :  { %v3712_v12 = vunpack.i.l.bf16 %v6672_v32  ;;  %v2667_v31 = vadd.f32 %v2651_v9, %v6722_v24  ;;  %v2668_v58 = vadd.f32 %v2652_v22, %v6724_v48  ;;  %v2671_v51 = vadd.f32 %v2655_v29, %v2506_v60  ;;  %2863 = vst [vmem:[#allocation2 + $0x78] sm:$0xff] %v2847_v38 }
 0x1c4   :  { %v2672_v17 = vadd.f32 %v2656_v53, %v2507_v39  ;;  %2862 = vst [vmem:[#allocation2 + $0x70] sm:$0xff] %v2846_v0  ;;  %v2660_v57 = vmul.f32 %v3743_v36, %v6679_v21  ;;  %v2659_v32 = vmul.f32 %v3742_v6, %v6679_v21  ;;  %v3753_v37 = vunpack.i.h.bf16 %v6744_v59 }
 0x1c5   :  { %v3761_v8 = vpop.permute.xlu0 %3760  ;;  %v3752_v24 = vunpack.i.l.bf16 %v6744_v59  ;;  %v2510_v27 = vadd.f32 %v2494_v7, %v6699_v14  ;;  %v2511_v41 = vadd.f32 %v2495_v35, %v6701_v1  ;;  %v2499_v33 = vmul.f32 %v3713_v54, %v6620_v63 }
 0x1c6   :  { %v3763_v15 = vunpack.i.h.bf16 %v3761_v8  ;;  %v3762_v25 = vunpack.i.l.bf16 %v3761_v8  ;;  %v2498_v56 = vmul.f32 %v3712_v12, %v6620_v63  ;;  %v2349_v42 = vadd.f32 %v6713_v11, %v6655_v30 }
 0x1c7   :  { %v2350_v19 = vadd.f32 %v6710_v20, %v6658_v13  ;;  %v2675_v14 = vadd.f32 %v2659_v32, %v2510_v27  ;;  %v2676_v18 = vadd.f32 %v2660_v57, %v2511_v41  ;;  %v2664_v1 = vmul.f32 %v3753_v37, %v6679_v21 }
 0x1c8   :  { %v2817_v3 = vmul.f32 %v3763_v15, %v6720_v16  ;;  %v2816_v55 = vmul.f32 %v3762_v25, %v6720_v16  ;;  %v2663_v47 = vmul.f32 %v3752_v24, %v6679_v21  ;;  %v2514_v34 = vadd.f32 %v2498_v56, %v2349_v42 }
 0x1c9   :  { %v3771_v23 = vpop.permute.xlu0 %3770  ;;  %v2515_v49 = vadd.f32 %v2499_v33, %v2350_v19 }
 0x1ca   :  { %v3773_v26 = vunpack.i.h.bf16 %v3771_v23  ;;  %v3772_v40 = vunpack.i.l.bf16 %v3771_v23  ;;  %v2832_v48 = vadd.f32 %v2816_v55, %v2667_v31  ;;  %v2833_v5 = vadd.f32 %v2817_v3, %v2668_v58 }
 0x1cb   :  { %v2679_v13 = vadd.f32 %v2663_v47, %v2514_v34  ;;  %v2680_v20 = vadd.f32 %v2664_v1, %v2515_v49 }
 0x1cc   :  { %v2821_v52 = vmul.f32 %v3773_v26, %v6720_v16  ;;  %v2820_v43 = vmul.f32 %v3772_v40, %v6720_v16  ;;  %2848 = vst [vmem:[#allocation2] sm:$0xff] %v2832_v48  ;;  %2849 = vst [vmem:[#allocation2 + $0x8] sm:$0xff] %v2833_v5 }
 0x1cd   :  { %v3781_v4 = vpop.permute.xlu0 %3780 }
 0x1ce   :  { %v2836_v45 = vadd.f32 %v2820_v43, %v2671_v51  ;;  %v2837_v2 = vadd.f32 %v2821_v52, %v2672_v17  ;;  %v3783_v28 = vunpack.i.h.bf16 %v3781_v4  ;;  %v3782_v59 = vunpack.i.l.bf16 %v3781_v4 }
 0x1d0   :  { %2852 = vst [vmem:[#allocation2 + $0x20] sm:$0xff] %v2836_v45  ;;  %2853 = vst [vmem:[#allocation2 + $0x28] sm:$0xff] %v2837_v2  ;;  %v2825_v63 = vmul.f32 %v3783_v28, %v6720_v16  ;;  %v2824_v44 = vmul.f32 %v3782_v59, %v6720_v16 }
 0x1d2   :  { %v3791_v46 = vpop.permute.xlu0 %3790  ;;  %v2840_v22 = vadd.f32 %v2824_v44, %v2675_v14  ;;  %v2841_v30 = vadd.f32 %v2825_v63, %v2676_v18 }
 0x1d3   :  { %v3793_v11 = vunpack.i.h.bf16 %v3791_v46  ;;  %v3792_v9 = vunpack.i.l.bf16 %v3791_v46 }
 0x1d4   :  { %2856 = vst [vmem:[#allocation2 + $0x40] sm:$0xff] %v2840_v22  ;;  %2857 = vst [vmem:[#allocation2 + $0x48] sm:$0xff] %v2841_v30 }
 0x1d5   :  { %v2829_v21 = vmul.f32 %v3793_v11, %v6720_v16  ;;  %v2828_v53 = vmul.f32 %v3792_v9, %v6720_v16 }
 0x1d7   :  { %v2844_v29 = vadd.f32 %v2828_v53, %v2679_v13  ;;  %v2845_v61 = vadd.f32 %v2829_v21, %v2680_v20 }
 0x1d9   :  { %2860 = vst [vmem:[#allocation2 + $0x60] sm:$0xff] %v2844_v29  ;;  %2861 = vst [vmem:[#allocation2 + $0x68] sm:$0xff] %v2845_v61 }
 0x1da   :  { %3828 = shalt.err (!%p3825_p4)
}
 0x1db   :  { %s3842_s9 = smov 128   ;;  %s3843_s10 = smov 8  }
 0x1dc   :  { %2875 = dma.vmem_to_hbm [thread:$0]  %s2870_s8, 2048, %s6796_s7, [#allocation3], %s3842_s9, %s3842_s9, %s3843_s10  }
 0x1dd   :  { %3837 = dma.done.wait [#allocation3], 2048  }
 0x1de   :  { %3838 = vsyncadd [#allocation3], 4294965248 }
 0x1df   :  { %2879 = vsyncpa [#allocation3], 1 }

</bundles_post_ra>
